<compile_context>
chip_gen: v6e
topology: v6e:2x2x1
jax: 0.10.0
libtpu: 0.0.40
codegen_flags: <defaults>
</compile_context>

<pallas_src>
import math
import functools

import jax
import jax.numpy as jnp
from jax.experimental import pallas as pl
from jax.experimental.pallas import tpu as pltpu

# --- model hyper-parameters (from the PyTorch module) -----------------------
Z_DIM = 128
LABEL_DIM = 10            # synthetic stand-in for encoded_tensor.shape[1]
IN_OUT = 111
HL_DIM = (100, 150, 150, 150, 150)
BN_EPS = 1e-5
LRELU_SLOPE = 0.2
NUM_HL = len(HL_DIM)


def _round_up(x, m):
    return (x + m - 1) // m * m


# --- padded slab layout (all segments 128-lane aligned) ----------------------
REAL_SEG = (Z_DIM + LABEL_DIM,) + HL_DIM                 # (138, 100, 150, 150, 150, 150)
PAD_SEG = tuple(_round_up(w, 128) for w in REAL_SEG)     # (256, 128, 256, 256, 256, 256)
SEG_OFF = []
_acc = 0
for _w in PAD_SEG:
    SEG_OFF.append(_acc)
    _acc += _w
SEG_OFF = tuple(SEG_OFF)                                 # (0, 256, 384, 640, 896, 1152)
SLAB_W = _acc                                            # 1408
PREFIX_PAD = tuple(SEG_OFF[k] + PAD_SEG[k] for k in range(len(PAD_SEG)))
#                                                        # (256, 384, 640, 896, 1152, 1408)
HL_OUT_PAD = PAD_SEG[1:]                                 # (128, 256, 256, 256, 256)
FINAL_OUT_PAD = _round_up(IN_OUT, 128)                   # 128
MAX_OUT_PAD = max(HL_OUT_PAD + (FINAL_OUT_PAD,))         # 256 (packed bias/gamma/beta width)


# --- fully fused Pallas kernel -----------------------------------------------
def _decoder_kernel(x_ref, w0, w1, w2, w3, w4, w5,
                    b_ref, g_ref, beta_ref, o_ref, slab_ref, *, batch):
    """Fused Decoder forward: 5 hl blocks (skip-concat via VMEM slab) + Linear->Tanh."""
    b_pad = slab_ref.shape[0]

    # Stage the (already padded) input into segment 0 of the bf16 slab.
    slab_ref[:, 0:PAD_SEG[0]] = x_ref[...].astype(jnp.bfloat16)

    # Row mask for BatchNorm stats when the batch was padded to a sublane multiple.
    if batch == b_pad:
        row_mask = None
    else:
        rid = jax.lax.broadcasted_iota(jnp.int32, (b_pad, 1), 0)
        row_mask = (rid < batch).astype(jnp.float32)
    inv_b = jnp.float32(1.0 / batch)

    w_refs = (w0, w1, w2, w3, w4)
    for k in range(NUM_HL):
        d_out = HL_OUT_PAD[k]

        # Linear over the growing skip-concat prefix (bf16 MXU, f32 accumulation).
        lhs = slab_ref[:, 0:PREFIX_PAD[k]]
        h = jnp.dot(lhs, w_refs[k][...], preferred_element_type=jnp.float32)
        h = h + b_ref[k:k + 1, 0:d_out]

        # LeakyReLU(0.2)
        h = jnp.where(h >= 0.0, h, LRELU_SLOPE * h)

        # BatchNorm1d (training-mode biased batch stats), folded into scale/shift.
        hm = h if row_mask is None else h * row_mask
        mean = jnp.sum(hm, axis=0, keepdims=True) * inv_b
        msq = jnp.sum(hm * hm, axis=0, keepdims=True) * inv_b
        var = jnp.maximum(msq - mean * mean, 0.0)
        scale = g_ref[k:k + 1, 0:d_out] * jax.lax.rsqrt(var + BN_EPS)
        shift = beta_ref[k:k + 1, 0:d_out] - mean * scale
        y = h * scale + shift

        # "concat([y, prev], dim=1)" == write y into its lane-slice of the slab.
        off = SEG_OFF[k + 1]
        slab_ref[:, off:off + d_out] = y.astype(jnp.bfloat16)

    # Final Linear -> Tanh over the full slab.
    h = jnp.dot(slab_ref[...], w5[...], preferred_element_type=jnp.float32)
    h = h + b_ref[NUM_HL:NUM_HL + 1, 0:FINAL_OUT_PAD]
    o_ref[...] = jnp.tanh(h)


# --- deterministic parameter init (PyTorch Linear default over REAL fan-in) ---
def _init_linear_padded(key, n_segs, real_out, pad_out):
    """U(-1/sqrt(fan_in), +1/sqrt(fan_in)) init over the real fan-in, embedded
    into the padded (PREFIX_PAD[n_segs-1], pad_out) layout; padded rows/cols zero."""
    fan_in = sum(REAL_SEG[:n_segs])
    bound = 1.0 / math.sqrt(fan_in)
    kw, kb = jax.random.split(key)
    w_real = jax.random.uniform(kw, (fan_in, real_out), jnp.float32, -bound, bound)
    b_real = jax.random.uniform(kb, (real_out,), jnp.float32, -bound, bound)
    pad_in = PREFIX_PAD[n_segs - 1]
    w_pad = jnp.zeros((pad_in, pad_out), jnp.float32)
    row = 0
    for j in range(n_segs):
        rw = REAL_SEG[j]
        w_pad = w_pad.at[SEG_OFF[j]:SEG_OFF[j] + rw, :real_out].set(w_real[row:row + rw])
        row += rw
    b_pad = jnp.zeros((pad_out,), jnp.float32).at[:real_out].set(b_real)
    return w_pad.astype(jnp.bfloat16), b_pad


def init_decoder_params(key):
    weights = []
    b_pack = jnp.zeros((NUM_HL + 1, MAX_OUT_PAD), jnp.float32)
    for k in range(NUM_HL):
        key, sub = jax.random.split(key)
        w, b = _init_linear_padded(sub, k + 1, HL_DIM[k], HL_OUT_PAD[k])
        weights.append(w)
        b_pack = b_pack.at[k, :HL_OUT_PAD[k]].set(b)
    key, sub = jax.random.split(key)
    w_out, b_out = _init_linear_padded(sub, NUM_HL + 1, IN_OUT, FINAL_OUT_PAD)
    weights.append(w_out)
    b_pack = b_pack.at[NUM_HL, :FINAL_OUT_PAD].set(b_out)
    # BatchNorm1d affine params (PyTorch init: gamma=1, beta=0); padded lanes inert.
    g_pack = jnp.ones((NUM_HL, MAX_OUT_PAD), jnp.float32)
    beta_pack = jnp.zeros((NUM_HL, MAX_OUT_PAD), jnp.float32)
    return {"w": tuple(weights), "b": b_pack, "gamma": g_pack, "beta": beta_pack}


# --- Decoder forward: ONE fused pallas_call ----------------------------------
@jax.jit
def decoder_forward(x, params):
    B = x.shape[0]
    b_pad = _round_up(max(B, 8), 8)
    x_pad = jnp.zeros((b_pad, PAD_SEG[0]), jnp.float32)
    x_pad = x_pad.at[:B, :REAL_SEG[0]].set(x.astype(jnp.float32))

    num_inputs = 1 + (NUM_HL + 1) + 3
    out = pl.pallas_call(
        functools.partial(_decoder_kernel, batch=B),
        out_shape=jax.ShapeDtypeStruct((b_pad, FINAL_OUT_PAD), jnp.float32),
        in_specs=[pl.BlockSpec(memory_space=pltpu.MemorySpace.VMEM)] * num_inputs,
        out_specs=pl.BlockSpec(memory_space=pltpu.MemorySpace.VMEM),
        scratch_shapes=[pltpu.VMEM((b_pad, SLAB_W), jnp.bfloat16)],
        compiler_params=pltpu.CompilerParams(vmem_limit_bytes=64 << 20),
    )(x_pad, *params["w"], params["b"], params["gamma"], params["beta"])
    return out[:B, :IN_OUT]


if __name__ == "__main__":
    key = jax.random.PRNGKey(0)
    k_params, k_x = jax.random.split(key)

    params = init_decoder_params(k_params)

    batch = 8  # > 1 so training-mode BatchNorm statistics are well defined
    x = jax.random.normal(k_x, (batch, Z_DIM + LABEL_DIM), jnp.float32)

    out = decoder_forward(x, params)
    out = jax.block_until_ready(out)

    assert out.shape == (batch, IN_OUT), out.shape
    assert bool(jnp.all(jnp.isfinite(out)))
    assert bool(jnp.all(jnp.abs(out) <= 1.0 + 1e-6))  # tanh range
    print("KERNEL_OK")
</pallas_src>

<mosaic_0001>
module attributes {stable_mosaic.version = 11 : i64} {
  func.func @_decoder_kernel(%arg0: memref<8x256xf32, #tpu.memory_space<vmem>>, %arg1: memref<256x128xbf16, #tpu.memory_space<vmem>>, %arg2: memref<384x256xbf16, #tpu.memory_space<vmem>>, %arg3: memref<640x256xbf16, #tpu.memory_space<vmem>>, %arg4: memref<896x256xbf16, #tpu.memory_space<vmem>>, %arg5: memref<1152x256xbf16, #tpu.memory_space<vmem>>, %arg6: memref<1408x128xbf16, #tpu.memory_space<vmem>>, %arg7: memref<6x256xf32, #tpu.memory_space<vmem>>, %arg8: memref<5x256xf32, #tpu.memory_space<vmem>>, %arg9: memref<5x256xf32, #tpu.memory_space<vmem>>, %arg10: memref<8x128xf32, #tpu.memory_space<vmem>>, %arg11: memref<8x1408xbf16, #tpu.memory_space<vmem>>) attributes {dimension_semantics = [], scalar_prefetch = 0 : i64, scratch_operands = 1 : i64, tpu.core_type = #tpu.core_type<tc>} {
    %c0 = arith.constant 0 : index
    %c0_0 = arith.constant 0 : index
    %0 = vector.load %arg0[%c0, %c0_0] : memref<8x256xf32, #tpu.memory_space<vmem>>, vector<8x256xf32>
    %1 = arith.truncf %0 : vector<8x256xf32> to vector<8x256xbf16>
    %c0_1 = arith.constant 0 : index
    %c0_2 = arith.constant 0 : index
    %2 = vector.load %arg11[%c0_1, %c0_2] : memref<8x1408xbf16, #tpu.memory_space<vmem>>, vector<8x256xbf16>
    tpu.vector_store %arg11[%c0_1, %c0_2], %1 {strides = array<i32>} : memref<8x1408xbf16, #tpu.memory_space<vmem>>, vector<8x256xbf16>,
    %c0_3 = arith.constant 0 : index
    %c0_4 = arith.constant 0 : index
    %3 = vector.load %arg11[%c0_3, %c0_4] : memref<8x1408xbf16, #tpu.memory_space<vmem>>, vector<8x256xbf16>
    %c0_5 = arith.constant 0 : index
    %c0_6 = arith.constant 0 : index
    %4 = vector.load %arg1[%c0_5, %c0_6] : memref<256x128xbf16, #tpu.memory_space<vmem>>, vector<256x128xbf16>
    %cst = arith.constant dense<0.000000e+00> : vector<8x128xf32>
    %5 = tpu.matmul %3, %4, %cst {dimension_numbers = #tpu.dot_dimension_numbers<[1], [0], [0], [1], [0, 0, 1, 1], [], []>} : vector<8x256xbf16>, vector<256x128xbf16>, vector<8x128xf32> -> vector<8x128xf32>
    %c0_7 = arith.constant 0 : index
    %c0_8 = arith.constant 0 : index
    %6 = vector.load %arg7[%c0_7, %c0_8] : memref<6x256xf32, #tpu.memory_space<vmem>>, vector<1x128xf32>
    %7 = vector.broadcast %6 : vector<1x128xf32> to vector<8x128xf32>
    %8 = arith.addf %5, %7 : vector<8x128xf32>
    %cst_9 = arith.constant 0.000000e+00 : f32
    %9 = vector.broadcast %cst_9 : f32 to vector<8x128xf32>
    %10 = arith.cmpf oge, %8, %9 : vector<8x128xf32>
    %cst_10 = arith.constant 2.000000e-01 : f32
    %11 = vector.broadcast %cst_10 : f32 to vector<8x128xf32>
    %12 = arith.mulf %11, %8 : vector<8x128xf32>
    %13 = arith.select %10, %8, %12 : vector<8x128xi1>, vector<8x128xf32>
    %cst_11 = arith.constant dense<0.000000e+00> : vector<128xf32>
    %14 = vector.multi_reduction <add>, %13, %cst_11 [0] : vector<8x128xf32> to vector<128xf32>
    %15 = vector.shape_cast %14 : vector<128xf32> to vector<1x128xf32>
    %cst_12 = arith.constant 1.250000e-01 : f32
    %16 = vector.broadcast %cst_12 : f32 to vector<1x128xf32>
    %17 = arith.mulf %15, %16 : vector<1x128xf32>
    %18 = arith.mulf %13, %13 : vector<8x128xf32>
    %cst_13 = arith.constant dense<0.000000e+00> : vector<128xf32>
    %19 = vector.multi_reduction <add>, %18, %cst_13 [0] : vector<8x128xf32> to vector<128xf32>
    %20 = vector.shape_cast %19 : vector<128xf32> to vector<1x128xf32>
    %cst_14 = arith.constant 1.250000e-01 : f32
    %21 = vector.broadcast %cst_14 : f32 to vector<1x128xf32>
    %22 = arith.mulf %20, %21 : vector<1x128xf32>
    %23 = arith.mulf %17, %17 : vector<1x128xf32>
    %24 = arith.subf %22, %23 : vector<1x128xf32>
    %cst_15 = arith.constant 0.000000e+00 : f32
    %25 = vector.broadcast %cst_15 : f32 to vector<1x128xf32>
    %26 = arith.maximumf %24, %25 : vector<1x128xf32>
    %c0_16 = arith.constant 0 : index
    %c0_17 = arith.constant 0 : index
    %27 = vector.load %arg8[%c0_16, %c0_17] : memref<5x256xf32, #tpu.memory_space<vmem>>, vector<1x128xf32>
    %cst_18 = arith.constant 9.99999974E-6 : f32
    %28 = vector.broadcast %cst_18 : f32 to vector<1x128xf32>
    %29 = arith.addf %26, %28 : vector<1x128xf32>
    %30 = math.rsqrt %29 : vector<1x128xf32>
    %31 = arith.mulf %27, %30 : vector<1x128xf32>
    %c0_19 = arith.constant 0 : index
    %c0_20 = arith.constant 0 : index
    %32 = vector.load %arg9[%c0_19, %c0_20] : memref<5x256xf32, #tpu.memory_space<vmem>>, vector<1x128xf32>
    %33 = arith.mulf %17, %31 : vector<1x128xf32>
    %34 = arith.subf %32, %33 : vector<1x128xf32>
    %35 = vector.broadcast %31 : vector<1x128xf32> to vector<8x128xf32>
    %36 = arith.mulf %13, %35 : vector<8x128xf32>
    %37 = vector.broadcast %34 : vector<1x128xf32> to vector<8x128xf32>
    %38 = arith.addf %36, %37 : vector<8x128xf32>
    %39 = arith.truncf %38 : vector<8x128xf32> to vector<8x128xbf16>
    %c0_21 = arith.constant 0 : index
    %c256 = arith.constant 256 : index
    %40 = vector.load %arg11[%c0_21, %c256] : memref<8x1408xbf16, #tpu.memory_space<vmem>>, vector<8x128xbf16>
    tpu.vector_store %arg11[%c0_21, %c256], %39 {strides = array<i32>} : memref<8x1408xbf16, #tpu.memory_space<vmem>>, vector<8x128xbf16>,
    %c0_22 = arith.constant 0 : index
    %c0_23 = arith.constant 0 : index
    %41 = vector.load %arg11[%c0_22, %c0_23] : memref<8x1408xbf16, #tpu.memory_space<vmem>>, vector<8x384xbf16>
    %c0_24 = arith.constant 0 : index
    %c0_25 = arith.constant 0 : index
    %42 = vector.load %arg2[%c0_24, %c0_25] : memref<384x256xbf16, #tpu.memory_space<vmem>>, vector<384x256xbf16>
    %cst_26 = arith.constant dense<0.000000e+00> : vector<8x256xf32>
    %43 = tpu.matmul %41, %42, %cst_26 {dimension_numbers = #tpu.dot_dimension_numbers<[1], [0], [0], [1], [0, 0, 1, 1], [], []>} : vector<8x384xbf16>, vector<384x256xbf16>, vector<8x256xf32> -> vector<8x256xf32>
    %c1 = arith.constant 1 : index
    %c0_27 = arith.constant 0 : index
    %44 = vector.load %arg7[%c1, %c0_27] : memref<6x256xf32, #tpu.memory_space<vmem>>, vector<1x256xf32>
    %45 = vector.broadcast %44 : vector<1x256xf32> to vector<8x256xf32>
    %46 = arith.addf %43, %45 : vector<8x256xf32>
    %cst_28 = arith.constant 0.000000e+00 : f32
    %47 = vector.broadcast %cst_28 : f32 to vector<8x256xf32>
    %48 = arith.cmpf oge, %46, %47 : vector<8x256xf32>
    %cst_29 = arith.constant 2.000000e-01 : f32
    %49 = vector.broadcast %cst_29 : f32 to vector<8x256xf32>
    %50 = arith.mulf %49, %46 : vector<8x256xf32>
    %51 = arith.select %48, %46, %50 : vector<8x256xi1>, vector<8x256xf32>
    %cst_30 = arith.constant dense<0.000000e+00> : vector<256xf32>
    %52 = vector.multi_reduction <add>, %51, %cst_30 [0] : vector<8x256xf32> to vector<256xf32>
    %53 = vector.shape_cast %52 : vector<256xf32> to vector<1x256xf32>
    %cst_31 = arith.constant 1.250000e-01 : f32
    %54 = vector.broadcast %cst_31 : f32 to vector<1x256xf32>
    %55 = arith.mulf %53, %54 : vector<1x256xf32>
    %56 = arith.mulf %51, %51 : vector<8x256xf32>
    %cst_32 = arith.constant dense<0.000000e+00> : vector<256xf32>
    %57 = vector.multi_reduction <add>, %56, %cst_32 [0] : vector<8x256xf32> to vector<256xf32>
    %58 = vector.shape_cast %57 : vector<256xf32> to vector<1x256xf32>
    %cst_33 = arith.constant 1.250000e-01 : f32
    %59 = vector.broadcast %cst_33 : f32 to vector<1x256xf32>
    %60 = arith.mulf %58, %59 : vector<1x256xf32>
    %61 = arith.mulf %55, %55 : vector<1x256xf32>
    %62 = arith.subf %60, %61 : vector<1x256xf32>
    %cst_34 = arith.constant 0.000000e+00 : f32
    %63 = vector.broadcast %cst_34 : f32 to vector<1x256xf32>
    %64 = arith.maximumf %62, %63 : vector<1x256xf32>
    %c1_35 = arith.constant 1 : index
    %c0_36 = arith.constant 0 : index
    %65 = vector.load %arg8[%c1_35, %c0_36] : memref<5x256xf32, #tpu.memory_space<vmem>>, vector<1x256xf32>
    %cst_37 = arith.constant 9.99999974E-6 : f32
    %66 = vector.broadcast %cst_37 : f32 to vector<1x256xf32>
    %67 = arith.addf %64, %66 : vector<1x256xf32>
    %68 = math.rsqrt %67 : vector<1x256xf32>
    %69 = arith.mulf %65, %68 : vector<1x256xf32>
    %c1_38 = arith.constant 1 : index
    %c0_39 = arith.constant 0 : index
    %70 = vector.load %arg9[%c1_38, %c0_39] : memref<5x256xf32, #tpu.memory_space<vmem>>, vector<1x256xf32>
    %71 = arith.mulf %55, %69 : vector<1x256xf32>
    %72 = arith.subf %70, %71 : vector<1x256xf32>
    %73 = vector.broadcast %69 : vector<1x256xf32> to vector<8x256xf32>
    %74 = arith.mulf %51, %73 : vector<8x256xf32>
    %75 = vector.broadcast %72 : vector<1x256xf32> to vector<8x256xf32>
    %76 = arith.addf %74, %75 : vector<8x256xf32>
    %77 = arith.truncf %76 : vector<8x256xf32> to vector<8x256xbf16>
    %c0_40 = arith.constant 0 : index
    %c384 = arith.constant 384 : index
    %78 = vector.load %arg11[%c0_40, %c384] : memref<8x1408xbf16, #tpu.memory_space<vmem>>, vector<8x256xbf16>
    tpu.vector_store %arg11[%c0_40, %c384], %77 {strides = array<i32>} : memref<8x1408xbf16, #tpu.memory_space<vmem>>, vector<8x256xbf16>,
    %c0_41 = arith.constant 0 : index
    %c0_42 = arith.constant 0 : index
    %79 = vector.load %arg11[%c0_41, %c0_42] : memref<8x1408xbf16, #tpu.memory_space<vmem>>, vector<8x640xbf16>
    %c0_43 = arith.constant 0 : index
    %c0_44 = arith.constant 0 : index
    %80 = vector.load %arg3[%c0_43, %c0_44] : memref<640x256xbf16, #tpu.memory_space<vmem>>, vector<640x256xbf16>
    %cst_45 = arith.constant dense<0.000000e+00> : vector<8x256xf32>
    %81 = tpu.matmul %79, %80, %cst_45 {dimension_numbers = #tpu.dot_dimension_numbers<[1], [0], [0], [1], [0, 0, 1, 1], [], []>} : vector<8x640xbf16>, vector<640x256xbf16>, vector<8x256xf32> -> vector<8x256xf32>
    %c2 = arith.constant 2 : index
    %c0_46 = arith.constant 0 : index
    %82 = vector.load %arg7[%c2, %c0_46] : memref<6x256xf32, #tpu.memory_space<vmem>>, vector<1x256xf32>
    %83 = vector.broadcast %82 : vector<1x256xf32> to vector<8x256xf32>
    %84 = arith.addf %81, %83 : vector<8x256xf32>
    %cst_47 = arith.constant 0.000000e+00 : f32
    %85 = vector.broadcast %cst_47 : f32 to vector<8x256xf32>
    %86 = arith.cmpf oge, %84, %85 : vector<8x256xf32>
    %cst_48 = arith.constant 2.000000e-01 : f32
    %87 = vector.broadcast %cst_48 : f32 to vector<8x256xf32>
    %88 = arith.mulf %87, %84 : vector<8x256xf32>
    %89 = arith.select %86, %84, %88 : vector<8x256xi1>, vector<8x256xf32>
    %cst_49 = arith.constant dense<0.000000e+00> : vector<256xf32>
    %90 = vector.multi_reduction <add>, %89, %cst_49 [0] : vector<8x256xf32> to vector<256xf32>
    %91 = vector.shape_cast %90 : vector<256xf32> to vector<1x256xf32>
    %cst_50 = arith.constant 1.250000e-01 : f32
    %92 = vector.broadcast %cst_50 : f32 to vector<1x256xf32>
    %93 = arith.mulf %91, %92 : vector<1x256xf32>
    %94 = arith.mulf %89, %89 : vector<8x256xf32>
    %cst_51 = arith.constant dense<0.000000e+00> : vector<256xf32>
    %95 = vector.multi_reduction <add>, %94, %cst_51 [0] : vector<8x256xf32> to vector<256xf32>
    %96 = vector.shape_cast %95 : vector<256xf32> to vector<1x256xf32>
    %cst_52 = arith.constant 1.250000e-01 : f32
    %97 = vector.broadcast %cst_52 : f32 to vector<1x256xf32>
    %98 = arith.mulf %96, %97 : vector<1x256xf32>
    %99 = arith.mulf %93, %93 : vector<1x256xf32>
    %100 = arith.subf %98, %99 : vector<1x256xf32>
    %cst_53 = arith.constant 0.000000e+00 : f32
    %101 = vector.broadcast %cst_53 : f32 to vector<1x256xf32>
    %102 = arith.maximumf %100, %101 : vector<1x256xf32>
    %c2_54 = arith.constant 2 : index
    %c0_55 = arith.constant 0 : index
    %103 = vector.load %arg8[%c2_54, %c0_55] : memref<5x256xf32, #tpu.memory_space<vmem>>, vector<1x256xf32>
    %cst_56 = arith.constant 9.99999974E-6 : f32
    %104 = vector.broadcast %cst_56 : f32 to vector<1x256xf32>
    %105 = arith.addf %102, %104 : vector<1x256xf32>
    %106 = math.rsqrt %105 : vector<1x256xf32>
    %107 = arith.mulf %103, %106 : vector<1x256xf32>
    %c2_57 = arith.constant 2 : index
    %c0_58 = arith.constant 0 : index
    %108 = vector.load %arg9[%c2_57, %c0_58] : memref<5x256xf32, #tpu.memory_space<vmem>>, vector<1x256xf32>
    %109 = arith.mulf %93, %107 : vector<1x256xf32>
    %110 = arith.subf %108, %109 : vector<1x256xf32>
    %111 = vector.broadcast %107 : vector<1x256xf32> to vector<8x256xf32>
    %112 = arith.mulf %89, %111 : vector<8x256xf32>
    %113 = vector.broadcast %110 : vector<1x256xf32> to vector<8x256xf32>
    %114 = arith.addf %112, %113 : vector<8x256xf32>
    %115 = arith.truncf %114 : vector<8x256xf32> to vector<8x256xbf16>
    %c0_59 = arith.constant 0 : index
    %c640 = arith.constant 640 : index
    %116 = vector.load %arg11[%c0_59, %c640] : memref<8x1408xbf16, #tpu.memory_space<vmem>>, vector<8x256xbf16>
    tpu.vector_store %arg11[%c0_59, %c640], %115 {strides = array<i32>} : memref<8x1408xbf16, #tpu.memory_space<vmem>>, vector<8x256xbf16>,
    %c0_60 = arith.constant 0 : index
    %c0_61 = arith.constant 0 : index
    %117 = vector.load %arg11[%c0_60, %c0_61] : memref<8x1408xbf16, #tpu.memory_space<vmem>>, vector<8x896xbf16>
    %c0_62 = arith.constant 0 : index
    %c0_63 = arith.constant 0 : index
    %118 = vector.load %arg4[%c0_62, %c0_63] : memref<896x256xbf16, #tpu.memory_space<vmem>>, vector<896x256xbf16>
    %cst_64 = arith.constant dense<0.000000e+00> : vector<8x256xf32>
    %119 = tpu.matmul %117, %118, %cst_64 {dimension_numbers = #tpu.dot_dimension_numbers<[1], [0], [0], [1], [0, 0, 1, 1], [], []>} : vector<8x896xbf16>, vector<896x256xbf16>, vector<8x256xf32> -> vector<8x256xf32>
    %c3 = arith.constant 3 : index
    %c0_65 = arith.constant 0 : index
    %120 = vector.load %arg7[%c3, %c0_65] : memref<6x256xf32, #tpu.memory_space<vmem>>, vector<1x256xf32>
    %121 = vector.broadcast %120 : vector<1x256xf32> to vector<8x256xf32>
    %122 = arith.addf %119, %121 : vector<8x256xf32>
    %cst_66 = arith.constant 0.000000e+00 : f32
    %123 = vector.broadcast %cst_66 : f32 to vector<8x256xf32>
    %124 = arith.cmpf oge, %122, %123 : vector<8x256xf32>
    %cst_67 = arith.constant 2.000000e-01 : f32
    %125 = vector.broadcast %cst_67 : f32 to vector<8x256xf32>
    %126 = arith.mulf %125, %122 : vector<8x256xf32>
    %127 = arith.select %124, %122, %126 : vector<8x256xi1>, vector<8x256xf32>
    %cst_68 = arith.constant dense<0.000000e+00> : vector<256xf32>
    %128 = vector.multi_reduction <add>, %127, %cst_68 [0] : vector<8x256xf32> to vector<256xf32>
    %129 = vector.shape_cast %128 : vector<256xf32> to vector<1x256xf32>
    %cst_69 = arith.constant 1.250000e-01 : f32
    %130 = vector.broadcast %cst_69 : f32 to vector<1x256xf32>
    %131 = arith.mulf %129, %130 : vector<1x256xf32>
    %132 = arith.mulf %127, %127 : vector<8x256xf32>
    %cst_70 = arith.constant dense<0.000000e+00> : vector<256xf32>
    %133 = vector.multi_reduction <add>, %132, %cst_70 [0] : vector<8x256xf32> to vector<256xf32>
    %134 = vector.shape_cast %133 : vector<256xf32> to vector<1x256xf32>
    %cst_71 = arith.constant 1.250000e-01 : f32
    %135 = vector.broadcast %cst_71 : f32 to vector<1x256xf32>
    %136 = arith.mulf %134, %135 : vector<1x256xf32>
    %137 = arith.mulf %131, %131 : vector<1x256xf32>
    %138 = arith.subf %136, %137 : vector<1x256xf32>
    %cst_72 = arith.constant 0.000000e+00 : f32
    %139 = vector.broadcast %cst_72 : f32 to vector<1x256xf32>
    %140 = arith.maximumf %138, %139 : vector<1x256xf32>
    %c3_73 = arith.constant 3 : index
    %c0_74 = arith.constant 0 : index
    %141 = vector.load %arg8[%c3_73, %c0_74] : memref<5x256xf32, #tpu.memory_space<vmem>>, vector<1x256xf32>
    %cst_75 = arith.constant 9.99999974E-6 : f32
    %142 = vector.broadcast %cst_75 : f32 to vector<1x256xf32>
    %143 = arith.addf %140, %142 : vector<1x256xf32>
    %144 = math.rsqrt %143 : vector<1x256xf32>
    %145 = arith.mulf %141, %144 : vector<1x256xf32>
    %c3_76 = arith.constant 3 : index
    %c0_77 = arith.constant 0 : index
    %146 = vector.load %arg9[%c3_76, %c0_77] : memref<5x256xf32, #tpu.memory_space<vmem>>, vector<1x256xf32>
    %147 = arith.mulf %131, %145 : vector<1x256xf32>
    %148 = arith.subf %146, %147 : vector<1x256xf32>
    %149 = vector.broadcast %145 : vector<1x256xf32> to vector<8x256xf32>
    %150 = arith.mulf %127, %149 : vector<8x256xf32>
    %151 = vector.broadcast %148 : vector<1x256xf32> to vector<8x256xf32>
    %152 = arith.addf %150, %151 : vector<8x256xf32>
    %153 = arith.truncf %152 : vector<8x256xf32> to vector<8x256xbf16>
    %c0_78 = arith.constant 0 : index
    %c896 = arith.constant 896 : index
    %154 = vector.load %arg11[%c0_78, %c896] : memref<8x1408xbf16, #tpu.memory_space<vmem>>, vector<8x256xbf16>
    tpu.vector_store %arg11[%c0_78, %c896], %153 {strides = array<i32>} : memref<8x1408xbf16, #tpu.memory_space<vmem>>, vector<8x256xbf16>,
    %c0_79 = arith.constant 0 : index
    %c0_80 = arith.constant 0 : index
    %155 = vector.load %arg11[%c0_79, %c0_80] : memref<8x1408xbf16, #tpu.memory_space<vmem>>, vector<8x1152xbf16>
    %c0_81 = arith.constant 0 : index
    %c0_82 = arith.constant 0 : index
    %156 = vector.load %arg5[%c0_81, %c0_82] : memref<1152x256xbf16, #tpu.memory_space<vmem>>, vector<1152x256xbf16>
    %cst_83 = arith.constant dense<0.000000e+00> : vector<8x256xf32>
    %157 = tpu.matmul %155, %156, %cst_83 {dimension_numbers = #tpu.dot_dimension_numbers<[1], [0], [0], [1], [0, 0, 1, 1], [], []>} : vector<8x1152xbf16>, vector<1152x256xbf16>, vector<8x256xf32> -> vector<8x256xf32>
    %c4 = arith.constant 4 : index
    %c0_84 = arith.constant 0 : index
    %158 = vector.load %arg7[%c4, %c0_84] : memref<6x256xf32, #tpu.memory_space<vmem>>, vector<1x256xf32>
    %159 = vector.broadcast %158 : vector<1x256xf32> to vector<8x256xf32>
    %160 = arith.addf %157, %159 : vector<8x256xf32>
    %cst_85 = arith.constant 0.000000e+00 : f32
    %161 = vector.broadcast %cst_85 : f32 to vector<8x256xf32>
    %162 = arith.cmpf oge, %160, %161 : vector<8x256xf32>
    %cst_86 = arith.constant 2.000000e-01 : f32
    %163 = vector.broadcast %cst_86 : f32 to vector<8x256xf32>
    %164 = arith.mulf %163, %160 : vector<8x256xf32>
    %165 = arith.select %162, %160, %164 : vector<8x256xi1>, vector<8x256xf32>
    %cst_87 = arith.constant dense<0.000000e+00> : vector<256xf32>
    %166 = vector.multi_reduction <add>, %165, %cst_87 [0] : vector<8x256xf32> to vector<256xf32>
    %167 = vector.shape_cast %166 : vector<256xf32> to vector<1x256xf32>
    %cst_88 = arith.constant 1.250000e-01 : f32
    %168 = vector.broadcast %cst_88 : f32 to vector<1x256xf32>
    %169 = arith.mulf %167, %168 : vector<1x256xf32>
    %170 = arith.mulf %165, %165 : vector<8x256xf32>
    %cst_89 = arith.constant dense<0.000000e+00> : vector<256xf32>
    %171 = vector.multi_reduction <add>, %170, %cst_89 [0] : vector<8x256xf32> to vector<256xf32>
    %172 = vector.shape_cast %171 : vector<256xf32> to vector<1x256xf32>
    %cst_90 = arith.constant 1.250000e-01 : f32
    %173 = vector.broadcast %cst_90 : f32 to vector<1x256xf32>
    %174 = arith.mulf %172, %173 : vector<1x256xf32>
    %175 = arith.mulf %169, %169 : vector<1x256xf32>
    %176 = arith.subf %174, %175 : vector<1x256xf32>
    %cst_91 = arith.constant 0.000000e+00 : f32
    %177 = vector.broadcast %cst_91 : f32 to vector<1x256xf32>
    %178 = arith.maximumf %176, %177 : vector<1x256xf32>
    %c4_92 = arith.constant 4 : index
    %c0_93 = arith.constant 0 : index
    %179 = vector.load %arg8[%c4_92, %c0_93] : memref<5x256xf32, #tpu.memory_space<vmem>>, vector<1x256xf32>
    %cst_94 = arith.constant 9.99999974E-6 : f32
    %180 = vector.broadcast %cst_94 : f32 to vector<1x256xf32>
    %181 = arith.addf %178, %180 : vector<1x256xf32>
    %182 = math.rsqrt %181 : vector<1x256xf32>
    %183 = arith.mulf %179, %182 : vector<1x256xf32>
    %c4_95 = arith.constant 4 : index
    %c0_96 = arith.constant 0 : index
    %184 = vector.load %arg9[%c4_95, %c0_96] : memref<5x256xf32, #tpu.memory_space<vmem>>, vector<1x256xf32>
    %185 = arith.mulf %169, %183 : vector<1x256xf32>
    %186 = arith.subf %184, %185 : vector<1x256xf32>
    %187 = vector.broadcast %183 : vector<1x256xf32> to vector<8x256xf32>
    %188 = arith.mulf %165, %187 : vector<8x256xf32>
    %189 = vector.broadcast %186 : vector<1x256xf32> to vector<8x256xf32>
    %190 = arith.addf %188, %189 : vector<8x256xf32>
    %191 = arith.truncf %190 : vector<8x256xf32> to vector<8x256xbf16>
    %c0_97 = arith.constant 0 : index
    %c1152 = arith.constant 1152 : index
    %192 = vector.load %arg11[%c0_97, %c1152] : memref<8x1408xbf16, #tpu.memory_space<vmem>>, vector<8x256xbf16>
    tpu.vector_store %arg11[%c0_97, %c1152], %191 {strides = array<i32>} : memref<8x1408xbf16, #tpu.memory_space<vmem>>, vector<8x256xbf16>,
    %c0_98 = arith.constant 0 : index
    %c0_99 = arith.constant 0 : index
    %193 = vector.load %arg11[%c0_98, %c0_99] : memref<8x1408xbf16, #tpu.memory_space<vmem>>, vector<8x1408xbf16>
    %c0_100 = arith.constant 0 : index
    %c0_101 = arith.constant 0 : index
    %194 = vector.load %arg6[%c0_100, %c0_101] : memref<1408x128xbf16, #tpu.memory_space<vmem>>, vector<1408x128xbf16>
    %cst_102 = arith.constant dense<0.000000e+00> : vector<8x128xf32>
    %195 = tpu.matmul %193, %194, %cst_102 {dimension_numbers = #tpu.dot_dimension_numbers<[1], [0], [0], [1], [0, 0, 1, 1], [], []>} : vector<8x1408xbf16>, vector<1408x128xbf16>, vector<8x128xf32> -> vector<8x128xf32>
    %c5 = arith.constant 5 : index
    %c0_103 = arith.constant 0 : index
    %196 = vector.load %arg7[%c5, %c0_103] : memref<6x256xf32, #tpu.memory_space<vmem>>, vector<1x128xf32>
    %197 = vector.broadcast %196 : vector<1x128xf32> to vector<8x128xf32>
    %198 = arith.addf %195, %197 : vector<8x128xf32>
    %199 = math.tanh %198 : vector<8x128xf32>
    %c0_104 = arith.constant 0 : index
    %c0_105 = arith.constant 0 : index
    %200 = vector.load %arg10[%c0_104, %c0_105] : memref<8x128xf32, #tpu.memory_space<vmem>>, vector<8x128xf32>
    tpu.vector_store %arg10[%c0_104, %c0_105], %199 {strides = array<i32>} : memref<8x128xf32, #tpu.memory_space<vmem>>, vector<8x128xf32>,
    return
  }
}

</mosaic_0001>

<bundles_post_ra>
// kernel: decoder_forward.1
= control target key start
LH: loop header
LB: loop body
LE: loop exit
PB: predicated region body
PF: predicated region fallthrough
CT: control target
= control target key end

     0   :  { %15 = vsyncpa [#allocation4], 0  ;;  %s6805_s0 = inlined_call_operand.vmem [shape: f32[8,256], index: 0, kind: input, shape index: {}]   ;;  %s6806_s1 = inlined_call_operand.hbm [shape: bf16[256,128], index: 1, kind: input, shape index: {}]   ;;  %s6807_s2 = inlined_call_operand.hbm [shape: bf16[384,256], index: 2, kind: input, shape index: {}]   ;;  %s6808_s3 = inlined_call_operand.hbm [shape: bf16[640,256], index: 3, kind: input, shape index: {}]   ;;  %s6809_s4 = inlined_call_operand.hbm [shape: bf16[896,256], index: 4, kind: input, shape index: {}]   ;;  %s6810_s5 = inlined_call_operand.hbm [shape: bf16[1152,256], index: 5, kind: input, shape index: {}]   ;;  %s6811_s6 = inlined_call_operand.hbm [shape: bf16[1408,128], index: 6, kind: input, shape index: {}]   ;;  %s6812_s7 = inlined_call_operand.vmem [shape: f32[6,256], index: 7, kind: input, shape index: {}]   ;;  %s6813_s8 = inlined_call_operand.vmem [shape: f32[5,256], index: 8, kind: input, shape index: {}]   ;;  %s6814_s9 = inlined_call_operand.vmem [shape: f32[5,256], index: 9, kind: input, shape index: {}]   ;;  %s6815_s10 = inlined_call_operand.hbm [shape: f32[8,128], index: 10, kind: output, shape index: {}]  }
   0x1   :  { %16 = vsyncpa [#allocation7], 0 }
   0x2   :  { %17 = vsyncpa [#allocation10], 0 }
   0x3   :  { %18 = vsyncpa [#allocation13], 0 }
   0x4   :  { %19 = vsyncpa [#allocation5], 0  ;;  %s6475_s13 = smov [#allocation6]  }
   0x5   :  { %s39_s14 = sshll.u32 %s6475_s13, 4  ;;  %s40_s14 = int_to_ptr.vmem [resolvable:$true] %s39_s14 }
   0x6   :  { %s6333_s15 = scalar_lea.vmem %s40_s14, 6144  ;;  %p6338_p1 = scmp.lt.s32.totalorder %s40_s14, %s40_s14 }
   0x7   :  { %p6334_p0 = scmp.ne.s32.totalorder %s40_s14, %s6333_s15  ;;  %p6339_p2 = scmp.lt.s32.totalorder %s6333_s15, %s6333_s15 }
   0x9   :  { %p6340_p3 = por %p6339_p2, %p6338_p1 }
   0xb   :  { %p6341_p4 = pnand %p6340_p3, %p6334_p0 }
   0xd   :  { %6344 = shalt.err (!%p6341_p4)
}
   0xe   :  { %s6476_s16 = smov 128   ;;  %s6477_s17 = smov 8  }
   0xf   :  { %45 = dma.hbm_to_vmem [thread:$0]  %s6807_s2, 6144, %s40_s14, [#allocation7], %s6476_s16, %s6476_s16, %s6477_s17  }
  0x10   :  { %s6478_s20 = smov [#allocation9]   ;;  %s6479_s22 = smov [#allocation3]  }
  0x11   :  { %s63_s21 = sshll.u32 %s6478_s20, 4  ;;  %s27_s23 = sshll.u32 %s6479_s22, 4  ;;  %s64_s21 = int_to_ptr.vmem [resolvable:$true] %s63_s21  ;;  %s28_s23 = int_to_ptr.vmem [resolvable:$true] %s27_s23 }
  0x12   :  { %s6353_s24 = scalar_lea.vmem %s64_s21, 14336  ;;  %p6358_p6 = scmp.lt.s32.totalorder %s64_s21, %s64_s21 }
  0x13   :  { %p6354_p5 = scmp.ne.s32.totalorder %s64_s21, %s6353_s24  ;;  %p6359_p7 = scmp.lt.s32.totalorder %s6353_s24, %s6353_s24 }
  0x15   :  { %p6360_p8 = por %p6359_p7, %p6358_p6 }
  0x17   :  { %p6361_p9 = pnand %p6360_p8, %p6354_p5 }
  0x19   :  { %6364 = shalt.err (!%p6361_p9)
}
  0x1a   :  { %69 = dma.hbm_to_vmem [thread:$0]  %s6809_s4, 14336, %s64_s21, [#allocation10], %s6476_s16, %s6476_s16, %s6477_s17  }
  0x1b   :  { %s6373_s2 = scalar_lea.vmem %s28_s23, 2048  ;;  %p6378_p11 = scmp.lt.s32.totalorder %s28_s23, %s28_s23 }
  0x1c   :  { %p6374_p10 = scmp.ne.s32.totalorder %s28_s23, %s6373_s2  ;;  %p6379_p12 = scmp.lt.s32.totalorder %s6373_s2, %s6373_s2 }
  0x1e   :  { %p6380_p13 = por %p6379_p12, %p6378_p11 }
  0x20   :  { %p6381_p0 = pnand %p6380_p13, %p6374_p10 }
  0x22   :  { %6384 = shalt.err (!%p6381_p0)
}
  0x23   :  { %s6480_s27 = smov 64   ;;  %s6481_s28 = smov 4  }
  0x24   :  { %33 = dma.hbm_to_vmem [thread:$0]  %s6806_s1, 2048, %s28_s23, [#allocation4], %s6480_s27, %s6480_s27, %s6481_s28  }
  0x25   :  { %s6482_s11 = smov [#allocation8]   ;;  %s6483_s4 = smov [#allocation11]  }
  0x26   :  { %s51_s12 = sshll.u32 %s6482_s11, 4  ;;  %s75_s13 = sshll.u32 %s6483_s4, 4  ;;  %s52_s12 = int_to_ptr.vmem [resolvable:$true] %s51_s12  ;;  %s76_s13 = int_to_ptr.vmem [resolvable:$true] %s75_s13 }
  0x27   :  { %s6393_s14 = scalar_lea.vmem %s52_s12, 10240  ;;  %p6398_p2 = scmp.lt.s32.totalorder %s52_s12, %s52_s12 }
  0x28   :  { %p6394_p1 = scmp.ne.s32.totalorder %s52_s12, %s6393_s14  ;;  %p6399_p3 = scmp.lt.s32.totalorder %s6393_s14, %s6393_s14 }
  0x2a   :  { %p6400_p4 = por %p6399_p3, %p6398_p2 }
  0x2c   :  { %p6401_p5 = pnand %p6400_p4, %p6394_p1 }
  0x2e   :  { %6404 = shalt.err (!%p6401_p5)
}
  0x2f   :  { %57 = dma.hbm_to_vmem [thread:$0]  %s6808_s3, 10240, %s52_s12, [#allocation7], %s6476_s16, %s6476_s16, %s6477_s17  }
  0x30   :  { %s6413_s1 = scalar_lea.vmem %s76_s13, 18432  ;;  %p6418_p7 = scmp.lt.s32.totalorder %s76_s13, %s76_s13 }
  0x31   :  { %p6414_p6 = scmp.ne.s32.totalorder %s76_s13, %s6413_s1  ;;  %p6419_p8 = scmp.lt.s32.totalorder %s6413_s1, %s6413_s1 }
  0x33   :  { %p6420_p9 = por %p6419_p8, %p6418_p7 }
  0x35   :  { %p6421_p10 = pnand %p6420_p9, %p6414_p6 }
  0x37   :  { %6424 = shalt.err (!%p6421_p10)
}
  0x38   :  { %81 = dma.hbm_to_vmem [thread:$0]  %s6810_s5, 18432, %s76_s13, [#allocation10], %s6476_s16, %s6476_s16, %s6477_s17  }
  0x39   :  { %s6484_s21 = smov [#allocation12]  }
  0x3a   :  { %s87_s22 = sshll.u32 %s6484_s21, 4  ;;  %s88_s22 = int_to_ptr.vmem [resolvable:$true] %s87_s22 }
  0x3b   :  { %s6433_s23 = scalar_lea.vmem %s88_s22, 11264  ;;  %p6438_p12 = scmp.lt.s32.totalorder %s88_s22, %s88_s22 }
  0x3c   :  { %p6434_p11 = scmp.ne.s32.totalorder %s88_s22, %s6433_s23  ;;  %p6439_p13 = scmp.lt.s32.totalorder %s6433_s23, %s6433_s23 }
  0x3e   :  { %p6440_p0 = por %p6439_p13, %p6438_p12 }
  0x40   :  { %p6441_p1 = pnand %p6440_p0, %p6434_p11 }
  0x42   :  { %6444 = shalt.err (!%p6441_p1)
}
  0x43   :  { %93 = dma.hbm_to_vmem [thread:$0]  %s6811_s6, 11264, %s88_s22, [#allocation13], %s6480_s27, %s6480_s27, %s6481_s28  }
  0x44   :  { %6465 = dma.done.wait [#allocation4], 2048  }
  0x45   :  { %6466 = vsyncadd [#allocation4], 4294965248 }
  0x46   :  { %6467 = dma.done.wait [#allocation7], 16384  }
  0x47   :  { %6468 = vsyncadd [#allocation7], 4294950912 }
  0x48   :  { %6469 = dma.done.wait [#allocation10], 32768  }
  0x49   :  { %6470 = vsyncadd [#allocation10], 4294934528 }
  0x4a   :  { %6471 = dma.done.wait [#allocation13], 11264  }
  0x4b   :  { %6472 = vsyncadd [#allocation13], 4294956032  ;;  %v5602_v0 = vld [vmem:[#allocation3 + $0x78] sm:$0xff]   ;;  %v5604_v2 = vld [vmem:[#allocation3 + $0x70] sm:$0xff]   ;;  %vm6488_vm7 = vmmov 0  }
  0x4c   :  { %v5603_v1 = vld [vmem:[#allocation3 + $0x38] sm:$0xff]   ;;  %5426 = vmatprep.subr.bf16.mxu0 %v5602_v0  ;;  %v5605_v3 = vld [vmem:[#allocation3 + $0x30] sm:$0xff]   ;;  %v5606_v4 = vld [vmem:[#allocation3 + $0x68] sm:$0xff]  }
  0x4d   :  { %5427 = vmatpush3.bf16.msra.mxu0 %v5603_v1  ;;  %v5607_v5 = vld [vmem:[#allocation3 + $0x28] sm:$0xff]   ;;  %v5608_v6 = vld [vmem:[#allocation3 + $0x60] sm:$0xff]   ;;  %v5610_v8 = vld [vmem:[#allocation3 + $0x58] sm:$0xff]  }
  0x4e   :  { %5428 = vmatprep.subr.bf16.mxu0 %v5604_v2  ;;  %v5609_v7 = vld [vmem:[#allocation3 + $0x20] sm:$0xff]   ;;  %v5611_v9 = vld [vmem:[#allocation3 + $0x18] sm:$0xff]   ;;  %v5612_v10 = vld [vmem:[#allocation3 + $0x50] sm:$0xff]  }
  0x4f   :  { %v119_v11 = vld [vmem:[%s6805_s0] sm:$0xff]  ;;  %v120_v12 = vld [vmem:[%s6805_s0 + $0x8] sm:$0xff]  ;;  %v5614_v17 = vld [vmem:[#allocation3 + $0x48] sm:$0xff]  }
  0x50   :  { %v5613_v13 = vld [vmem:[#allocation3 + $0x10] sm:$0xff]   ;;  %v5421_v14 = vpack.c.bf16 %v120_v12, %v119_v11  ;;  %v5621_v18 = vld [vmem:[#allocation6 + $0x64] ss:$8 sps:$4 sm:$0xff]   ;;  %v6587_v19 = vpack.c.bf16 %v120_v12, %v120_v12  ;;  %v5623_v20 = vld [vmem:[#allocation6 + $0x60] ss:$8 sps:$4 sm:$0xff]   ;;  %v6591_v24 = vpack.c.bf16 %v119_v11, %v119_v11 }
  0x51   :  { %5429 = vmatpush3.bf16.msra.mxu0 %v5605_v3  ;;  %v5618_v15 = vld [vmem:[#allocation6 + $0x74] ss:$8 sps:$4 sm:$0xff]   ;;  %v5620_v16 = vld [vmem:[#allocation6 + $0x70] ss:$8 sps:$4 sm:$0xff]   ;;  %v5615_v21 = vld [vmem:[#allocation3 + $0x8] sm:$0xff]  }
  0x52   :  { %5430 = vmatprep.subr.bf16.mxu0 %v5606_v4  ;;  %129 = vst [vmem:[#allocation2] sm:$0xff] %v5421_v14  ;;  %653 = vmatprep.subr.bf16.mxu1 %v5618_v15  ;;  %v5616_v22 = vld [vmem:[#allocation3 + $0x40] sm:$0xff]   ;;  %v5624_v25 = vld [vmem:[#allocation6 + $0x54] ss:$8 sps:$4 sm:$0xff]   ;;  %v5626_v26 = vld [vmem:[#allocation6 + $0x50] ss:$8 sps:$4 sm:$0xff]  }
  0x53   :  { %654 = vmatpush1.bf16.msra.mxu1 %v5620_v16  ;;  %299 = vmatprep.mubr.bf16.mxu0 %v6587_v19  ;;  %v5617_v23 = vld [vmem:[#allocation3] sm:$0xff]   ;;  %v5630_v29 = vld [vmem:[#allocation6 + $0x34] ss:$8 sps:$4 sm:$0xff]   ;;  %v5632_v30 = vld [vmem:[#allocation6 + $0x30] ss:$8 sps:$4 sm:$0xff]  }
  0x54   :  { %655 = vmatprep.subr.bf16.mxu1 %v5621_v18  ;;  %685 = vmatprep.mubr.bf16.mxu1 %v6587_v19  ;;  %v5627_v27 = vld [vmem:[#allocation6 + $0x44] ss:$8 sps:$4 sm:$0xff]   ;;  %v5629_v28 = vld [vmem:[#allocation6 + $0x40] ss:$8 sps:$4 sm:$0xff]   ;;  %v5636_v33 = vld [vmem:[#allocation6 + $0x14] ss:$8 sps:$4 sm:$0xff]  }
  0x55   :  { %5431 = vmatpush3.bf16.msra.mxu0 %v5607_v5  ;;  %v5633_v31 = vld [vmem:[#allocation6 + $0x24] ss:$8 sps:$4 sm:$0xff]   ;;  %v5635_v32 = vld [vmem:[#allocation6 + $0x20] ss:$8 sps:$4 sm:$0xff]   ;;  %v5638_v34 = vld [vmem:[#allocation6 + $0x10] ss:$8 sps:$4 sm:$0xff]  }
  0x56   :  { %5432 = vmatprep.subr.bf16.mxu0 %v5608_v6  ;;  %v5639_v35 = vld [vmem:[#allocation6 + $0x4] ss:$8 sps:$4 sm:$0xff]   ;;  %v5641_v36 = vld [vmem:[#allocation6] ss:$8 sps:$4 sm:$0xff]   ;;  %v5642_v37 = vld [vmem:[#allocation6 + $0xf4] ss:$8 sps:$4 sm:$0xff]  }
  0x57   :  { %656 = vmatpush1.bf16.msra.mxu1 %v5623_v20  ;;  %v5644_v38 = vld [vmem:[#allocation6 + $0xf0] ss:$8 sps:$4 sm:$0xff]   ;;  %v5645_v39 = vld [vmem:[#allocation6 + $0xe4] ss:$8 sps:$4 sm:$0xff]   ;;  %v5647_v40 = vld [vmem:[#allocation6 + $0xe0] ss:$8 sps:$4 sm:$0xff]  }
  0x58   :  { %657 = vmatprep.subr.bf16.mxu1 %v5624_v25  ;;  %v5648_v41 = vld [vmem:[#allocation6 + $0xd4] ss:$8 sps:$4 sm:$0xff]   ;;  %v5650_v43 = vld [vmem:[#allocation6 + $0x170] ss:$8 sps:$4 sm:$0xff]   ;;  %v5654_v45 = vld [vmem:[#allocation6 + $0xc4] ss:$8 sps:$4 sm:$0xff]  }
  0x59   :  { %5433 = vmatpush3.bf16.msra.mxu0 %v5609_v7  ;;  %v5652_v42 = vld [vmem:[#allocation6 + $0x174] ss:$8 sps:$4 sm:$0xff]   ;;  %v5653_v44 = vld [vmem:[#allocation6 + $0xd0] ss:$8 sps:$4 sm:$0xff]   ;;  %v5658_v46 = vld [vmem:[#allocation6 + $0x164] ss:$8 sps:$4 sm:$0xff]  }
  0x5a   :  { %5434 = vmatprep.subr.bf16.mxu0 %v5610_v8  ;;  %v5656_v47 = vld [vmem:[#allocation6 + $0x160] ss:$8 sps:$4 sm:$0xff]   ;;  %v5660_v49 = vld [vmem:[#allocation6 + $0xb4] ss:$8 sps:$4 sm:$0xff]   ;;  %v5662_v51 = vld [vmem:[#allocation6 + $0x150] ss:$8 sps:$4 sm:$0xff]  }
  0x5b   :  { %658 = vmatpush1.bf16.msra.mxu1 %v5626_v26  ;;  %v5659_v48 = vld [vmem:[#allocation6 + $0xc0] ss:$8 sps:$4 sm:$0xff]   ;;  %v5664_v50 = vld [vmem:[#allocation6 + $0x154] ss:$8 sps:$4 sm:$0xff]   ;;  %v5665_v52 = vld [vmem:[#allocation6 + $0xb0] ss:$8 sps:$4 sm:$0xff]  }
  0x5c   :  { %659 = vmatprep.subr.bf16.mxu1 %v5627_v27  ;;  %v5666_v53 = vld [vmem:[#allocation6 + $0xa4] ss:$8 sps:$4 sm:$0xff]   ;;  %v5668_v55 = vld [vmem:[#allocation6 + $0x140] ss:$8 sps:$4 sm:$0xff]   ;;  %v5672_v57 = vld [vmem:[#allocation6 + $0x94] ss:$8 sps:$4 sm:$0xff]  }
  0x5d   :  { %5435 = vmatpush3.bf16.msra.mxu0 %v5611_v9  ;;  %v5670_v54 = vld [vmem:[#allocation6 + $0x144] ss:$8 sps:$4 sm:$0xff]   ;;  %v5671_v56 = vld [vmem:[#allocation6 + $0xa0] ss:$8 sps:$4 sm:$0xff]   ;;  %v5676_v58 = vld [vmem:[#allocation6 + $0x134] ss:$8 sps:$4 sm:$0xff]  }
  0x5e   :  { %5436 = vmatprep.subr.bf16.mxu0 %v5612_v10  ;;  %v5674_v59 = vld [vmem:[#allocation6 + $0x130] ss:$8 sps:$4 sm:$0xff]   ;;  %v5678_v61 = vld [vmem:[#allocation6 + $0x84] ss:$8 sps:$4 sm:$0xff]   ;;  %v5680_v63 = vld [vmem:[#allocation6 + $0x120] ss:$8 sps:$4 sm:$0xff]  }
  0x5f   :  { %660 = vmatpush1.bf16.msra.mxu1 %v5629_v28  ;;  %v5677_v60 = vld [vmem:[#allocation6 + $0x90] ss:$8 sps:$4 sm:$0xff]   ;;  %v5682_v62 = vld [vmem:[#allocation6 + $0x124] ss:$8 sps:$4 sm:$0xff]   ;;  %v5683_v0 = vld [vmem:[#allocation6 + $0x80] ss:$8 sps:$4 sm:$0xff]  }
  0x60   :  { %661 = vmatprep.subr.bf16.mxu1 %v5630_v29  ;;  %v5686_v1 = vld [vmem:[#allocation6 + $0x114] ss:$8 sps:$4 sm:$0xff]   ;;  %v5684_v2 = vld [vmem:[#allocation6 + $0x110] ss:$8 sps:$4 sm:$0xff]   ;;  %v5687_v3 = vld [vmem:[#allocation6 + $0x100] ss:$8 sps:$4 sm:$0xff]  }
  0x61   :  { %5437 = vmatpush3.bf16.msra.mxu0 %v5613_v13  ;;  %v5689_v4 = vld [vmem:[#allocation6 + $0x104] ss:$8 sps:$4 sm:$0xff]   ;;  %v6485_v5 = vmov 0   ;;  %v5693_v6 = vld [vmem:[#allocation8 + $0x74] ss:$8 sps:$4 sm:$0xff]  }
  0x62   :  { %5438 = vmatprep.subr.bf16.mxu0 %v5614_v17  ;;  %v163_v8 = vld [vmem:[%s6812_s7] ss:$0 sm:$0xff] }
  0x63   :  { %662 = vmatpush1.bf16.msra.mxu1 %v5632_v30 }
  0x64   :  { %663 = vmatprep.subr.bf16.mxu1 %v5633_v31 }
  0x65   :  { %5439 = vmatpush3.bf16.msra.mxu0 %v5615_v21 }
  0x66   :  { %5440 = vmatprep.subr.bf16.mxu0 %v5616_v22 }
  0x67   :  { %664 = vmatpush1.bf16.msra.mxu1 %v5635_v32 }
  0x68   :  { %665 = vmatprep.subr.bf16.mxu1 %v5636_v33 }
  0x69   :  { %5441 = vmatpush3.bf16.msra.mxu0 %v5617_v23 }
  0x6a   :  { %694 = vmatprep.subr.bf16.mxu0 %v5652_v42 }
  0x6b   :  { %666 = vmatpush1.bf16.msra.mxu1 %v5638_v34 }
  0x6c   :  { %300 = vmatmul.mubr.bf16.vlgmr.msra.gmra.mxu0 %v6591_v24  ;;  %667 = vmatprep.subr.bf16.mxu1 %v5639_v35 }
  0x6d   :  { %695 = vmatpush1.bf16.msra.mxu0 %v5650_v43  ;;  %726 = vmatprep.mubr.bf16.mxu0 %v6485_v5 }
  0x6e   :  { %696 = vmatprep.subr.bf16.mxu0 %v5658_v46  ;;  %v5691_v46 = vld [vmem:[#allocation8 + $0x70] ss:$8 sps:$4 sm:$0xff]  }
  0x6f   :  { %668 = vmatpush1.bf16.msra.mxu1 %v5641_v36 }
  0x70   :  { %669 = vmatprep.subr.bf16.mxu1 %v5642_v37  ;;  %v328_v37 = vld [vmem:[%s6813_s8] ss:$0 sm:$0xff] }
  0x71   :  { %697 = vmatpush1.bf16.msra.mxu0 %v5656_v47 }
  0x72   :  { %698 = vmatprep.subr.bf16.mxu0 %v5664_v50  ;;  %v5699_v50 = vld [vmem:[#allocation8 + $0x54] ss:$8 sps:$4 sm:$0xff]  }
  0x73   :  { %670 = vmatpush2.bf16.msra.mxu1 %v5644_v38 }
  0x74   :  { %671 = vmatprep.subr.bf16.mxu1 %v5645_v39 }
  0x75   :  { %699 = vmatpush1.bf16.msra.mxu0 %v5662_v51  ;;  %v5697_v51 = vld [vmem:[#allocation8 + $0x50] ss:$8 sps:$4 sm:$0xff]  }
  0x76   :  { %700 = vmatprep.subr.bf16.mxu0 %v5670_v54  ;;  %v5705_v54 = vld [vmem:[#allocation8 + $0x34] ss:$8 sps:$4 sm:$0xff]  }
  0x77   :  { %672 = vmatpush2.bf16.msra.mxu1 %v5647_v40  ;;  %v332_v40 = vld [vmem:[%s6814_s9] ss:$0 sm:$0xff] }
  0x78   :  { %673 = vmatprep.subr.bf16.mxu1 %v5648_v41 }
  0x79   :  { %701 = vmatpush1.bf16.msra.mxu0 %v5668_v55  ;;  %v5703_v55 = vld [vmem:[#allocation8 + $0x30] ss:$8 sps:$4 sm:$0xff]  }
  0x7a   :  { %702 = vmatprep.subr.bf16.mxu0 %v5676_v58 }
  0x7b   :  { %674 = vmatpush2.bf16.msra.mxu1 %v5653_v44 }
  0x7c   :  { %675 = vmatprep.subr.bf16.mxu1 %v5654_v45 }
  0x7d   :  { %703 = vmatpush1.bf16.msra.mxu0 %v5674_v59  ;;  %v5708_v59 = vld [vmem:[#allocation8 + $0x24] ss:$8 sps:$4 sm:$0xff]  }
  0x7e   :  { %704 = vmatprep.subr.bf16.mxu0 %v5682_v62  ;;  %v5709_v62 = vld [vmem:[#allocation8 + $0x10] ss:$8 sps:$4 sm:$0xff]  }
  0x7f   :  { %676 = vmatpush2.bf16.msra.mxu1 %v5659_v48  ;;  %v5696_v48 = vld [vmem:[#allocation8 + $0x64] ss:$8 sps:$4 sm:$0xff]  }
  0x80   :  { %677 = vmatprep.subr.bf16.mxu1 %v5660_v49  ;;  %v5694_v49 = vld [vmem:[#allocation8 + $0x60] ss:$8 sps:$4 sm:$0xff]  }
  0x81   :  { %705 = vmatpush1.bf16.msra.mxu0 %v5680_v63  ;;  %v5714_v63 = vld [vmem:[#allocation8 + $0x4] ss:$8 sps:$4 sm:$0xff]  }
  0x82   :  { %706 = vmatprep.subr.bf16.mxu0 %v5686_v1  ;;  %v5717_v1 = vld [vmem:[#allocation8 + $0xf4] ss:$8 sps:$4 sm:$0xff]  }
  0x83   :  { %678 = vmatpush2.bf16.msra.mxu1 %v5665_v52  ;;  %v5702_v52 = vld [vmem:[#allocation8 + $0x44] ss:$8 sps:$4 sm:$0xff]  }
  0x84   :  { %679 = vmatprep.subr.bf16.mxu1 %v5666_v53  ;;  %v5700_v53 = vld [vmem:[#allocation8 + $0x40] ss:$8 sps:$4 sm:$0xff]  }
  0x85   :  { %707 = vmatpush1.bf16.msra.mxu0 %v5684_v2  ;;  %v5715_v2 = vld [vmem:[#allocation8 + $0xf0] ss:$8 sps:$4 sm:$0xff]  }
  0x86   :  { %708 = vmatprep.subr.bf16.mxu0 %v5689_v4  ;;  %v5718_v4 = vld [vmem:[#allocation8 + $0x170] ss:$8 sps:$4 sm:$0xff]  }
  0x87   :  { %680 = vmatpush2.bf16.msra.mxu1 %v5671_v56 }
  0x88   :  { %681 = vmatprep.subr.bf16.mxu1 %v5672_v57 }
  0x89   :  { %709 = vmatpush1.bf16.msra.mxu0 %v5687_v3  ;;  %v5720_v3 = vld [vmem:[#allocation8 + $0x174] ss:$8 sps:$4 sm:$0xff]  }
  0x8a   :  { %1374 = vmatprep.subr.bf16.mxu0 %v5693_v6  ;;  %v5723_v6 = vld [vmem:[#allocation8 + $0xe4] ss:$8 sps:$4 sm:$0xff]  }
  0x8b   :  { %682 = vmatpush2.bf16.msra.mxu1 %v5677_v60  ;;  %v5706_v60 = vld [vmem:[#allocation8 + $0x20] ss:$8 sps:$4 sm:$0xff]  }
  0x8c   :  { %683 = vmatprep.subr.bf16.mxu1 %v5678_v61  ;;  %v5711_v61 = vld [vmem:[#allocation8 + $0x14] ss:$8 sps:$4 sm:$0xff]  }
  0x8f   :  { %684 = vmatpush2.bf16.msra.mxu1 %v5683_v0  ;;  %v5712_v0 = vld [vmem:[#allocation8] ss:$8 sps:$4 sm:$0xff]  }
  0x90   :  { %1415 = vmatprep.subr.bf16.mxu1 %v5720_v3  ;;  %v5813_v3 = vld [vmem:[#allocation9 + $0x174] ss:$8 sps:$4 sm:$0xff]  }
  0x92   :  { %686 = vmatmul.mubr.bf16.vlgmr.msra.gmra.mxu1 %v6591_v24 }
  0x93   :  { %1416 = vmatpush1.bf16.msra.mxu1 %v5718_v4  ;;  %v5808_v4 = vld [vmem:[#allocation8 + $0x180] ss:$8 sps:$4 sm:$0xff]  }
 0x12c   :  { %v5442_v7 = vpop.f32.mrf.mxu0 }
 0x12e   :  { %v5443_v9 = vpop.f32.mrf.mxu0 }
 0x12f   :  { %v5444_v10 = vadd.f32 %v5443_v9, %v5442_v7  ;;  %v5721_v7 = vld [vmem:[#allocation8 + $0xe0] ss:$8 sps:$4 sm:$0xff]  }
 0x130   :  { %v5445_v11 = vpop.f32.mrf.mxu0  ;;  %v5724_v9 = vld [vmem:[#allocation8 + $0x160] ss:$8 sps:$4 sm:$0xff]  }
 0x131   :  { %v302_v12 = vadd.f32 %v5444_v10, %v163_v8  ;;  %v5726_v8 = vld [vmem:[#allocation8 + $0x164] ss:$8 sps:$4 sm:$0xff]   ;;  %v5729_v10 = vld [vmem:[#allocation8 + $0xd4] ss:$8 sps:$4 sm:$0xff]   ;;  %v5727_v11 = vld [vmem:[#allocation8 + $0xd0] ss:$8 sps:$4 sm:$0xff]  }
 0x132   :  { %v5446_v13 = vpop.f32.mrf.mxu0  ;;  %1417 = vmatprep.subr.bf16.mxu1 %v5726_v8 }
 0x133   :  { %vm307_vm0 = vcmp.ge.f32.partialorder %v302_v12, 0.0  ;;  %v308_v14 = vmul.f32 0.2, %v302_v12  ;;  %1418 = vmatpush1.bf16.msra.mxu1 %v5724_v9  ;;  %v5730_v13 = vld [vmem:[#allocation8 + $0x150] ss:$8 sps:$4 sm:$0xff]  }
 0x135   :  { %v309_v15 = vsel %vm307_vm0, %v302_v12, %v308_v14  ;;  %v5732_v12 = vld [vmem:[#allocation8 + $0x154] ss:$8 sps:$4 sm:$0xff]   ;;  %v5735_v14 = vld [vmem:[#allocation8 + $0xc4] ss:$8 sps:$4 sm:$0xff]  }
 0x136   :  { %v310_v16 = vrot.slane %v309_v15, 4  ;;  %v317_v17 = vmul.f32 %v309_v15, %v309_v15  ;;  %1419 = vmatprep.subr.bf16.mxu1 %v5732_v12 }
 0x137   :  { %1420 = vmatpush1.bf16.msra.mxu1 %v5730_v13 }
 0x138   :  { %v311_v18 = vadd.f32 %v310_v16, %v309_v15  ;;  %v318_v20 = vrot.slane %v317_v17, 4  ;;  %v5738_v16 = vld [vmem:[#allocation8 + $0x144] ss:$8 sps:$4 sm:$0xff]  }
 0x139   :  { %1421 = vmatprep.subr.bf16.mxu1 %v5738_v16 }
 0x13a   :  { %v312_v21 = vrot.slane %v311_v18, 2  ;;  %v319_v22 = vadd.f32 %v318_v20, %v317_v17  ;;  %v5736_v17 = vld [vmem:[#allocation8 + $0x140] ss:$8 sps:$4 sm:$0xff]   ;;  %v5739_v20 = vld [vmem:[#allocation8 + $0xb0] ss:$8 sps:$4 sm:$0xff]  }
 0x13b   :  { %1422 = vmatpush1.bf16.msra.mxu1 %v5736_v17 }
 0x13c   :  { %v313_v23 = vadd.f32 %v312_v21, %v311_v18  ;;  %v320_v25 = vrot.slane %v319_v22, 2  ;;  %v5741_v18 = vld [vmem:[#allocation8 + $0xb4] ss:$8 sps:$4 sm:$0xff]  }
 0x13d   :  { %v5744_v21 = vld [vmem:[#allocation8 + $0x134] ss:$8 sps:$4 sm:$0xff]  }
 0x13e   :  { %v314_v26 = vrot.slane %v313_v23, 1  ;;  %v321_v27 = vadd.f32 %v320_v25, %v319_v22  ;;  %v5742_v22 = vld [vmem:[#allocation8 + $0x130] ss:$8 sps:$4 sm:$0xff]   ;;  %1423 = vmatprep.subr.bf16.mxu1 %v5744_v21  ;;  %v5745_v25 = vld [vmem:[#allocation8 + $0xa0] ss:$8 sps:$4 sm:$0xff]  }
 0x13f   :  { %1424 = vmatpush1.bf16.msra.mxu1 %v5742_v22 }
 0x140   :  { %v315_v28 = vadd.f32 %v314_v26, %v313_v23  ;;  %v322_v29 = vrot.slane %v321_v27, 1  ;;  %v5747_v23 = vld [vmem:[#allocation8 + $0xa4] ss:$8 sps:$4 sm:$0xff]  }
 0x141   :  { %v5750_v26 = vld [vmem:[#allocation8 + $0x124] ss:$8 sps:$4 sm:$0xff]  }
 0x142   :  { %v316_v30 = vmul.f32 0.125, %v315_v28  ;;  %v323_v31 = vadd.f32 %v322_v29, %v321_v27  ;;  %v5748_v27 = vld [vmem:[#allocation8 + $0x120] ss:$8 sps:$4 sm:$0xff]   ;;  %1425 = vmatprep.subr.bf16.mxu1 %v5750_v26  ;;  %v5753_v28 = vld [vmem:[#allocation8 + $0x94] ss:$8 sps:$4 sm:$0xff]  }
 0x143   :  { %1426 = vmatpush1.bf16.msra.mxu1 %v5748_v27  ;;  %v5751_v29 = vld [vmem:[#allocation8 + $0x90] ss:$8 sps:$4 sm:$0xff]  }
 0x144   :  { %v324_v32 = vmul.f32 0.125, %v323_v31  ;;  %v325_v33 = vmul.f32 %v316_v30, %v316_v30  ;;  %v5754_v31 = vld [vmem:[#allocation8 + $0x110] ss:$8 sps:$4 sm:$0xff]  }
 0x146   :  { %v326_v34 = vsub.f32 %v324_v32, %v325_v33  ;;  %v5759_v32 = vld [vmem:[#allocation8 + $0x84] ss:$8 sps:$4 sm:$0xff]   ;;  %v5757_v33 = vld [vmem:[#allocation8 + $0x80] ss:$8 sps:$4 sm:$0xff]  }
 0x148   :  { %v327_v35 = vmax.f32 %v326_v34, 0.0  ;;  %v5762_v34 = vld [vmem:[#allocation8 + $0x104] ss:$8 sps:$4 sm:$0xff]  }
 0x14a   :  { %v329_v36 = vadd.f32 1e-05, %v327_v35  ;;  %v5760_v35 = vld [vmem:[#allocation8 + $0x100] ss:$8 sps:$4 sm:$0xff]  }
 0x14c   :  { %6303 = vrsqrt.f32 %v329_v36  ;;  %v5765_v36 = vld [vmem:[#allocation8 + $0x274] ss:$8 sps:$4 sm:$0xff]  }
 0x152   :  { %v6606_v56 = vpop.f32.mrf.mxu1 }
 0x154   :  { %v6608_v57 = vpop.f32.mrf.mxu1 }
 0x156   :  { %v691_v58 = vpop.f32.mrf.mxu1 }
 0x157   :  { %v5793_v58 = vld [vmem:[#allocation8 + $0x220] ss:$8 sps:$4 sm:$0xff]  }
 0x159   :  { %v6304_v38 = vpop.eup %6303 }
 0x15a   :  { %v331_v39 = vmul.f32 %v6304_v38, %v328_v37  ;;  %v5763_v37 = vld [vmem:[#allocation8 + $0x270] ss:$8 sps:$4 sm:$0xff]   ;;  %v5768_v38 = vld [vmem:[#allocation8 + $0x1f4] ss:$8 sps:$4 sm:$0xff]  }
 0x15c   :  { %v333_v41 = vmul.f32 %v331_v39, %v316_v30  ;;  %v335_v43 = vmul.f32 %v331_v39, %v309_v15  ;;  %v5733_v15 = vld [vmem:[#allocation8 + $0xc0] ss:$8 sps:$4 sm:$0xff]   ;;  %v5756_v30 = vld [vmem:[#allocation8 + $0x114] ss:$8 sps:$4 sm:$0xff]   ;;  %v5766_v39 = vld [vmem:[#allocation8 + $0x1f0] ss:$8 sps:$4 sm:$0xff]  }
 0x15d   :  { %1427 = vmatprep.subr.bf16.mxu1 %v5756_v30 }
 0x15e   :  { %v334_v42 = vsub.f32 %v332_v40, %v333_v41  ;;  %1428 = vmatpush1.bf16.msra.mxu1 %v5754_v31  ;;  %v5771_v40 = vld [vmem:[#allocation8 + $0x264] ss:$8 sps:$4 sm:$0xff]   ;;  %v5769_v41 = vld [vmem:[#allocation8 + $0x260] ss:$8 sps:$4 sm:$0xff]  }
 0x15f   :  { %1429 = vmatprep.subr.bf16.mxu1 %v5762_v34 }
 0x160   :  { %v336_v44 = vadd.f32 %v335_v43, %v334_v42  ;;  %v5774_v42 = vld [vmem:[#allocation8 + $0x1e4] ss:$8 sps:$4 sm:$0xff]   ;;  %v5772_v43 = vld [vmem:[#allocation8 + $0x1e0] ss:$8 sps:$4 sm:$0xff]  }
 0x162   :  { %v337_v45 = vpack.c.bf16 %v336_v44, %v336_v44  ;;  %1430 = vmatpush1.bf16.msra.mxu1 %v5760_v35  ;;  %v5777_v44 = vld [vmem:[#allocation8 + $0x254] ss:$8 sps:$4 sm:$0xff]  }
 0x163   :  { %1431 = vmatprep.subr.bf16.mxu1 %v5768_v38 }
 0x164   :  { %338 = vst [vmem:[#allocation2 + $0x8] sm:$0xf] %v337_v45  ;;  %v5775_v45 = vld [vmem:[#allocation8 + $0x250] ss:$8 sps:$4 sm:$0xff]  }
 0x166   :  { %1432 = vmatpush2.bf16.msra.mxu1 %v5766_v39 }
 0x167   :  { %1433 = vmatprep.subr.bf16.mxu1 %v5774_v42 }
 0x16a   :  { %1434 = vmatpush2.bf16.msra.mxu1 %v5772_v43 }
 0x16b   :  { %v5690_v47 = vld [vmem:[#allocation2 + $0x8] ss:$0 sps:$4 sm:$0xff]  }
 0x16c   :  { %727 = vmatmul.mubr.bf16.vlgmr.msra.gmra.mxu0 %v5690_v47  ;;  %v5783_v47 = vld [vmem:[#allocation8 + $0x244] ss:$8 sps:$4 sm:$0xff]  }
 0x16d   :  { %1375 = vmatpush1.bf16.msra.mxu0 %v5691_v46  ;;  %1406 = vmatprep.mubr.bf16.mxu0 %v6587_v19  ;;  %v692_v19 = vpop.f32.mrf.mxu1  ;;  %v5778_v46 = vld [vmem:[#allocation8 + $0x1d0] ss:$8 sps:$4 sm:$0xff]  }
 0x16e   :  { %1376 = vmatprep.subr.bf16.mxu0 %v5696_v48  ;;  %v5781_v48 = vld [vmem:[#allocation8 + $0x240] ss:$8 sps:$4 sm:$0xff]   ;;  %v5798_v19 = vld [vmem:[#allocation8 + $0x1a4] ss:$8 sps:$4 sm:$0xff]  }
 0x171   :  { %1377 = vmatpush1.bf16.msra.mxu0 %v5694_v49  ;;  %v5786_v49 = vld [vmem:[#allocation8 + $0x1c4] ss:$8 sps:$4 sm:$0xff]  }
 0x172   :  { %1378 = vmatprep.subr.bf16.mxu0 %v5699_v50  ;;  %v5784_v50 = vld [vmem:[#allocation8 + $0x1c0] ss:$8 sps:$4 sm:$0xff]  }
 0x175   :  { %1379 = vmatpush1.bf16.msra.mxu0 %v5697_v51  ;;  %v5789_v51 = vld [vmem:[#allocation8 + $0x234] ss:$8 sps:$4 sm:$0xff]  }
 0x176   :  { %1380 = vmatprep.subr.bf16.mxu0 %v5702_v52  ;;  %v5787_v52 = vld [vmem:[#allocation8 + $0x230] ss:$8 sps:$4 sm:$0xff]  }
 0x179   :  { %1381 = vmatpush1.bf16.msra.mxu0 %v5700_v53  ;;  %v5792_v53 = vld [vmem:[#allocation8 + $0x1b4] ss:$8 sps:$4 sm:$0xff]  }
 0x17a   :  { %1382 = vmatprep.subr.bf16.mxu0 %v5705_v54  ;;  %v5790_v54 = vld [vmem:[#allocation8 + $0x1b0] ss:$8 sps:$4 sm:$0xff]  }
 0x17d   :  { %1383 = vmatpush1.bf16.msra.mxu0 %v5703_v55  ;;  %v5795_v55 = vld [vmem:[#allocation8 + $0x224] ss:$8 sps:$4 sm:$0xff]  }
 0x17e   :  { %1384 = vmatprep.subr.bf16.mxu0 %v5708_v59  ;;  %v5796_v59 = vld [vmem:[#allocation8 + $0x1a0] ss:$8 sps:$4 sm:$0xff]  }
 0x181   :  { %1385 = vmatpush1.bf16.msra.mxu0 %v5706_v60  ;;  %v5801_v60 = vld [vmem:[#allocation8 + $0x214] ss:$8 sps:$4 sm:$0xff]  }
 0x182   :  { %1386 = vmatprep.subr.bf16.mxu0 %v5711_v61  ;;  %v5799_v61 = vld [vmem:[#allocation8 + $0x210] ss:$8 sps:$4 sm:$0xff]  }
 0x185   :  { %1387 = vmatpush1.bf16.msra.mxu0 %v5709_v62  ;;  %v5802_v62 = vld [vmem:[#allocation8 + $0x190] ss:$8 sps:$4 sm:$0xff]  }
 0x186   :  { %1388 = vmatprep.subr.bf16.mxu0 %v5714_v63  ;;  %v5804_v63 = vld [vmem:[#allocation8 + $0x194] ss:$8 sps:$4 sm:$0xff]  }
 0x189   :  { %1389 = vmatpush1.bf16.msra.mxu0 %v5712_v0  ;;  %v5805_v0 = vld [vmem:[#allocation8 + $0x200] ss:$8 sps:$4 sm:$0xff]  }
 0x18a   :  { %1390 = vmatprep.subr.bf16.mxu0 %v5717_v1  ;;  %v5807_v1 = vld [vmem:[#allocation8 + $0x204] ss:$8 sps:$4 sm:$0xff]  }
 0x18d   :  { %1391 = vmatpush2.bf16.msra.mxu0 %v5715_v2  ;;  %v5810_v2 = vld [vmem:[#allocation8 + $0x184] ss:$8 sps:$4 sm:$0xff]  }
 0x18e   :  { %1392 = vmatprep.subr.bf16.mxu0 %v5723_v6  ;;  %v5819_v6 = vld [vmem:[#allocation9 + $0x74] ss:$8 sps:$4 sm:$0xff]  }
 0x191   :  { %1393 = vmatpush2.bf16.msra.mxu0 %v5721_v7  ;;  %v392_v7 = vlaneseq }
 0x192   :  { %1394 = vmatprep.subr.bf16.mxu0 %v5729_v10  ;;  %v4898_v10 = vld [vmem:[%s6812_s7 + $0x1] ss:$8 sm:$0x3] }
 0x193   :  { %v6612_v8 = vshrl.u32 %v392_v7, 7 }
 0x195   :  { %1395 = vmatpush2.bf16.msra.mxu0 %v5727_v11  ;;  %v6615_v9 = vsub.s32 0, %v6612_v8  ;;  %v6622_v12 = vsub.s32 1, %v6612_v8 }
 0x196   :  { %1396 = vmatprep.subr.bf16.mxu0 %v5735_v14 }
 0x197   :  { %v395_v11 = vrot.slane %v4898_v10, %v6615_v9  ;;  %v399_v14 = vrot.slane %v4898_v10, %v6622_v12 }
 0x199   :  { %1397 = vmatpush2.bf16.msra.mxu0 %v5733_v15  ;;  %v688_v13 = vadd.f32 %v6606_v56, %v395_v11  ;;  %v690_v16 = vadd.f32 %v6608_v57, %v399_v14  ;;  %v4950_v11 = vld [vmem:[%s6813_s8 + $0x1] ss:$8 sm:$0x3] }
 0x19a   :  { %1398 = vmatprep.subr.bf16.mxu0 %v5741_v18 }
 0x19d   :  { %1399 = vmatpush2.bf16.msra.mxu0 %v5739_v20 }
 0x19e   :  { %1400 = vmatprep.subr.bf16.mxu0 %v5747_v23 }
 0x1a1   :  { %1401 = vmatpush2.bf16.msra.mxu0 %v5745_v25 }
 0x1a2   :  { %1402 = vmatprep.subr.bf16.mxu0 %v5753_v28 }
 0x1a5   :  { %1403 = vmatpush2.bf16.msra.mxu0 %v5751_v29 }
 0x1a6   :  { %1404 = vmatprep.subr.bf16.mxu0 %v5759_v32 }
 0x1a9   :  { %1405 = vmatpush2.bf16.msra.mxu0 %v5757_v33 }
 0x1aa   :  { %1456 = vmatprep.subr.bf16.mxu0 %v5765_v36 }
 0x1ac   :  { %1407 = vmatmul.mubr.bf16.vlgmr.msra.gmra.mxu0 %v6591_v24  ;;  %v5780_v24 = vld [vmem:[#allocation8 + $0x1d4] ss:$8 sps:$4 sm:$0xff]  }
 0x1ad   :  { %1457 = vmatpush1.bf16.msra.mxu0 %v5763_v37  ;;  %1488 = vmatprep.mubr.bf16.mxu0 %v6485_v5 }
 0x1ae   :  { %1458 = vmatprep.subr.bf16.mxu0 %v5771_v40  ;;  %1435 = vmatprep.subr.bf16.mxu1 %v5780_v24 }
 0x1af   :  { %1436 = vmatpush2.bf16.msra.mxu1 %v5778_v46 }
 0x1b0   :  { %1437 = vmatprep.subr.bf16.mxu1 %v5786_v49 }
 0x1b1   :  { %1459 = vmatpush1.bf16.msra.mxu0 %v5769_v41 }
 0x1b2   :  { %1460 = vmatprep.subr.bf16.mxu0 %v5777_v44 }
 0x1b3   :  { %1438 = vmatpush2.bf16.msra.mxu1 %v5784_v50 }
 0x1b4   :  { %1439 = vmatprep.subr.bf16.mxu1 %v5792_v53 }
 0x1b5   :  { %1461 = vmatpush1.bf16.msra.mxu0 %v5775_v45 }
 0x1b6   :  { %1462 = vmatprep.subr.bf16.mxu0 %v5783_v47 }
 0x1b7   :  { %1440 = vmatpush2.bf16.msra.mxu1 %v5790_v54 }
 0x1b8   :  { %1441 = vmatprep.subr.bf16.mxu1 %v5798_v19 }
 0x1b9   :  { %1463 = vmatpush1.bf16.msra.mxu0 %v5781_v48 }
 0x1ba   :  { %1464 = vmatprep.subr.bf16.mxu0 %v5789_v51 }
 0x1bb   :  { %1442 = vmatpush2.bf16.msra.mxu1 %v5796_v59 }
 0x1bc   :  { %1443 = vmatprep.subr.bf16.mxu1 %v5804_v63 }
 0x1bd   :  { %1465 = vmatpush1.bf16.msra.mxu0 %v5787_v52 }
 0x1be   :  { %1466 = vmatprep.subr.bf16.mxu0 %v5795_v55 }
 0x1bf   :  { %1444 = vmatpush2.bf16.msra.mxu1 %v5802_v62 }
 0x1c0   :  { %1445 = vmatprep.subr.bf16.mxu1 %v5810_v2 }
 0x1c1   :  { %1467 = vmatpush1.bf16.msra.mxu0 %v5793_v58 }
 0x1c2   :  { %1468 = vmatprep.subr.bf16.mxu0 %v5801_v60 }
 0x1c3   :  { %1446 = vmatpush2.bf16.msra.mxu1 %v5808_v4 }
 0x1c4   :  { %2336 = vmatprep.subr.bf16.mxu1 %v5819_v6 }
 0x1c5   :  { %1469 = vmatpush1.bf16.msra.mxu0 %v5799_v61 }
 0x1c6   :  { %1470 = vmatprep.subr.bf16.mxu0 %v5807_v1 }
 0x1c9   :  { %1471 = vmatpush1.bf16.msra.mxu0 %v5805_v0  ;;  %v6486_v0 = vmov 1966171168  }
 0x1ca   :  { %2377 = vmatprep.subr.bf16.mxu0 %v5813_v3  ;;  %v787_v1 = vunpack.c.l.s4 %v6486_v0  ;;  %v5856_v0 = vld [vmem:[#allocation9 + $0x100] ss:$8 sps:$4 sm:$0xff]  }
 0x1cc   :  { %v788_v2 = vunpack.c.0.s8 %v787_v1  ;;  %v5864_v1 = vld [vmem:[#allocation9 + $0x1f4] ss:$8 sps:$4 sm:$0xff]  }
 0x1ce   :  { %v6628_v4 = vsub.s32 %v788_v2, %v6612_v8  ;;  %v5859_v2 = vld [vmem:[#allocation9] ss:$8 sps:$4 sm:$0xff]  }
 0x22c   :  { %v728_v15 = vpop.f32.mrf.mxu0 }
 0x22d   :  { %v729_v17 = vadd.f32 %v728_v15, %v688_v13 }
 0x22e   :  { %v730_v18 = vpop.f32.mrf.mxu0 }
 0x22f   :  { %vm735_vm1 = vcmp.ge.f32.partialorder %v729_v17, 0.0  ;;  %v737_v20 = vmul.f32 0.2, %v729_v17  ;;  %v731_v21 = vadd.f32 %v730_v18, %v690_v16 }
 0x230   :  { %v732_v22 = vpop.f32.mrf.mxu0 }
 0x231   :  { %v739_v23 = vsel %vm735_vm1, %v729_v17, %v737_v20  ;;  %vm736_vm2 = vcmp.ge.f32.partialorder %v731_v21, 0.0  ;;  %v738_v25 = vmul.f32 0.2, %v731_v21 }
 0x232   :  { %v741_v26 = vrot.slane %v739_v23, 4  ;;  %v755_v27 = vmul.f32 %v739_v23, %v739_v23  ;;  %v733_v28 = vpop.f32.mrf.mxu0 }
 0x233   :  { %v740_v29 = vsel %vm736_vm2, %v731_v21, %v738_v25  ;;  %v4951_v25 = vld [vmem:[%s6814_s9 + $0x1] ss:$8 sm:$0x3] }
 0x234   :  { %v742_v30 = vadd.f32 %v741_v26, %v739_v23  ;;  %v757_v56 = vrot.slane %v755_v27, 4  ;;  %v747_v31 = vrot.slane %v740_v29, 4  ;;  %v756_v32 = vmul.f32 %v740_v29, %v740_v29 }
 0x236   :  { %v743_v33 = vrot.slane %v742_v30, 2  ;;  %v758_v34 = vadd.f32 %v757_v56, %v755_v27  ;;  %v748_v57 = vadd.f32 %v747_v31, %v740_v29  ;;  %v763_v35 = vrot.slane %v756_v32, 4 }
 0x238   :  { %v744_v36 = vadd.f32 %v743_v33, %v742_v30  ;;  %v759_v37 = vrot.slane %v758_v34, 2  ;;  %v749_v38 = vrot.slane %v748_v57, 2  ;;  %v764_v39 = vadd.f32 %v763_v35, %v756_v32 }
 0x23a   :  { %v745_v40 = vrot.slane %v744_v36, 1  ;;  %v760_v41 = vadd.f32 %v759_v37, %v758_v34  ;;  %v750_v42 = vadd.f32 %v749_v38, %v748_v57  ;;  %v765_v43 = vrot.slane %v764_v39, 2  ;;  %v5822_v37 = vld [vmem:[#allocation9 + $0x164] ss:$8 sps:$4 sm:$0xff]  }
 0x23b   :  { %v5825_v38 = vld [vmem:[#allocation9 + $0x64] ss:$8 sps:$4 sm:$0xff]  }
 0x23c   :  { %v746_v44 = vadd.f32 %v745_v40, %v744_v36  ;;  %v761_v45 = vrot.slane %v760_v41, 1  ;;  %v751_v24 = vrot.slane %v750_v42, 1  ;;  %v766_v46 = vadd.f32 %v765_v43, %v764_v39  ;;  %v5817_v36 = vld [vmem:[#allocation9 + $0x70] ss:$8 sps:$4 sm:$0xff]   ;;  %v5820_v40 = vld [vmem:[#allocation9 + $0x160] ss:$8 sps:$4 sm:$0xff]  }
 0x23d   :  { %v5831_v43 = vld [vmem:[#allocation9 + $0x54] ss:$8 sps:$4 sm:$0xff]  }
 0x23e   :  { %v753_v47 = vmul.f32 0.125, %v746_v44  ;;  %v762_v48 = vadd.f32 %v761_v45, %v760_v41  ;;  %v752_v49 = vadd.f32 %v751_v24, %v750_v42  ;;  %v767_v50 = vrot.slane %v766_v46, 1  ;;  %v5828_v41 = vld [vmem:[#allocation9 + $0x154] ss:$8 sps:$4 sm:$0xff]   ;;  %v5823_v42 = vld [vmem:[#allocation9 + $0x60] ss:$8 sps:$4 sm:$0xff]  }
 0x23f   :  { %v5826_v44 = vld [vmem:[#allocation9 + $0x150] ss:$8 sps:$4 sm:$0xff]   ;;  %v5834_v45 = vld [vmem:[#allocation9 + $0x144] ss:$8 sps:$4 sm:$0xff]  }
 0x240   :  { %v769_v51 = vmul.f32 0.125, %v762_v48  ;;  %v771_v52 = vmul.f32 %v753_v47, %v753_v47  ;;  %v754_v53 = vmul.f32 0.125, %v752_v49  ;;  %v768_v54 = vadd.f32 %v767_v50, %v766_v46  ;;  %v5829_v24 = vld [vmem:[#allocation9 + $0x50] ss:$8 sps:$4 sm:$0xff]   ;;  %v5837_v46 = vld [vmem:[#allocation9 + $0x44] ss:$8 sps:$4 sm:$0xff]  }
 0x241   :  { %v5840_v48 = vld [vmem:[#allocation9 + $0x134] ss:$8 sps:$4 sm:$0xff]   ;;  %v5835_v49 = vld [vmem:[#allocation9 + $0x40] ss:$8 sps:$4 sm:$0xff]  }
 0x242   :  { %v773_v55 = vsub.f32 %v769_v51, %v771_v52  ;;  %v770_v58 = vmul.f32 0.125, %v768_v54  ;;  %v772_v19 = vmul.f32 %v754_v53, %v754_v53  ;;  %v5843_v50 = vld [vmem:[#allocation9 + $0x34] ss:$8 sps:$4 sm:$0xff]   ;;  %v5838_v51 = vld [vmem:[#allocation9 + $0x130] ss:$8 sps:$4 sm:$0xff]  }
 0x243   :  { %v5846_v52 = vld [vmem:[#allocation9 + $0x124] ss:$8 sps:$4 sm:$0xff]  }
 0x244   :  { %v775_v59 = vmax.f32 %v773_v55, 0.0  ;;  %v774_v60 = vsub.f32 %v770_v58, %v772_v19  ;;  %v5849_v54 = vld [vmem:[#allocation9 + $0x24] ss:$8 sps:$4 sm:$0xff]   ;;  %v5844_v55 = vld [vmem:[#allocation9 + $0x120] ss:$8 sps:$4 sm:$0xff]  }
 0x245   :  { %v5852_v58 = vld [vmem:[#allocation9 + $0x114] ss:$8 sps:$4 sm:$0xff]   ;;  %v5847_v19 = vld [vmem:[#allocation9 + $0x20] ss:$8 sps:$4 sm:$0xff]  }
 0x246   :  { %v779_v61 = vadd.f32 1e-05, %v775_v59  ;;  %v776_v62 = vmax.f32 %v774_v60, 0.0  ;;  %v5855_v59 = vld [vmem:[#allocation9 + $0x14] ss:$8 sps:$4 sm:$0xff]  }
 0x247   :  { %v5850_v60 = vld [vmem:[#allocation9 + $0x110] ss:$8 sps:$4 sm:$0xff]  }
 0x248   :  { %v780_v63 = vadd.f32 1e-05, %v776_v62  ;;  %6305 = vrsqrt.f32 %v779_v61  ;;  %v5858_v61 = vld [vmem:[#allocation9 + $0x104] ss:$8 sps:$4 sm:$0xff]   ;;  %v5853_v62 = vld [vmem:[#allocation9 + $0x10] ss:$8 sps:$4 sm:$0xff]  }
 0x24a   :  { %6307 = vrsqrt.f32 %v780_v63  ;;  %v5861_v63 = vld [vmem:[#allocation9 + $0x4] ss:$8 sps:$4 sm:$0xff]  }
 0x255   :  { %v6306_v3 = vpop.eup %6305 }
 0x257   :  { %v6308_v6 = vpop.eup %6307 }
 0x258   :  { %v785_v7 = vcombine.low %v6306_v3, %v6308_v6  ;;  %v5867_v3 = vld [vmem:[#allocation9 + $0xf4] ss:$8 sps:$4 sm:$0xff]   ;;  %v5862_v6 = vld [vmem:[#allocation9 + $0x1f0] ss:$8 sps:$4 sm:$0xff]  }
 0x25a   :  { %v792_v10 = vrot.slane %v785_v7, %v6628_v4  ;;  %v5870_v7 = vld [vmem:[#allocation9 + $0x1e4] ss:$8 sps:$4 sm:$0xff]  }
 0x25c   :  { %v799_v13 = vrot.slane %v792_v10, %v6628_v4  ;;  %v5865_v10 = vld [vmem:[#allocation9 + $0xf0] ss:$8 sps:$4 sm:$0xff]  }
 0x25e   :  { %v801_v14 = vmul.f32 %v4950_v11, %v799_v13  ;;  %v5873_v13 = vld [vmem:[#allocation9 + $0xe4] ss:$8 sps:$4 sm:$0xff]  }
 0x260   :  { %v808_v15 = vrot.slane %v801_v14, %v6615_v9  ;;  %v812_v16 = vrot.slane %v801_v14, %v6622_v12  ;;  %v5868_v14 = vld [vmem:[#allocation9 + $0x1e0] ss:$8 sps:$4 sm:$0xff]  }
 0x262   :  { %v815_v17 = vmul.f32 %v808_v15, %v753_v47  ;;  %v816_v18 = vmul.f32 %v812_v16, %v754_v53  ;;  %v836_v20 = vmul.f32 %v808_v15, %v739_v23  ;;  %v837_v8 = vmul.f32 %v812_v16, %v740_v29  ;;  %v5811_v23 = vld [vmem:[#allocation9 + $0x170] ss:$8 sps:$4 sm:$0xff]   ;;  %v5832_v47 = vld [vmem:[#allocation9 + $0x140] ss:$8 sps:$4 sm:$0xff]   ;;  %v5876_v16 = vld [vmem:[#allocation9 + $0x1d4] ss:$8 sps:$4 sm:$0xff]  }
 0x263   :  { %v6644_v29 = vld [vmem:[#allocation2] sm:$0xff] }
 0x264   :  { %v819_v21 = vcombine.low %v815_v17, %v816_v18  ;;  %v6652_v39 = vcombine.high %v6644_v29, %v6644_v29  ;;  %v5841_v53 = vld [vmem:[#allocation9 + $0x30] ss:$8 sps:$4 sm:$0xff]   ;;  %v5871_v17 = vld [vmem:[#allocation9 + $0xe0] ss:$8 sps:$4 sm:$0xff]  }
 0x266   :  { %v826_v22 = vrot.slane %v819_v21, %v6628_v4 }
 0x268   :  { %v833_v26 = vrot.slane %v826_v22, %v6628_v4  ;;  %v5882_v22 = vld [vmem:[#allocation9 + $0x1c4] ss:$8 sps:$4 sm:$0xff]  }
 0x26a   :  { %v835_v27 = vsub.f32 %v4951_v25, %v833_v26  ;;  %v5877_v25 = vld [vmem:[#allocation9 + $0xd0] ss:$8 sps:$4 sm:$0xff]   ;;  %v5885_v26 = vld [vmem:[#allocation9 + $0xc4] ss:$8 sps:$4 sm:$0xff]  }
 0x26c   :  { %v842_v28 = vrot.slane %v835_v27, %v6615_v9  ;;  %v846_v30 = vrot.slane %v835_v27, %v6622_v12  ;;  %v6658_v11 = vpop.f32.mrf.mxu0  ;;  %v5880_v27 = vld [vmem:[#allocation9 + $0x1c0] ss:$8 sps:$4 sm:$0xff]  }
 0x26e   :  { %v849_v56 = vadd.f32 %v842_v28, %v836_v20  ;;  %v850_v31 = vadd.f32 %v846_v30, %v837_v8  ;;  %v6660_v15 = vpop.f32.mrf.mxu0  ;;  %v5879_v20 = vld [vmem:[#allocation9 + $0xd4] ss:$8 sps:$4 sm:$0xff]   ;;  %v5874_v8 = vld [vmem:[#allocation9 + $0x1d0] ss:$8 sps:$4 sm:$0xff]   ;;  %v5883_v30 = vld [vmem:[#allocation9 + $0xc0] ss:$8 sps:$4 sm:$0xff]  }
 0x26f   :  { %v5888_v28 = vld [vmem:[#allocation9 + $0x1b4] ss:$8 sps:$4 sm:$0xff]  }
 0x270   :  { %v5422_v32 = vpack.c.bf16 %v850_v31, %v849_v56  ;;  %v1412_v18 = vpop.f32.mrf.mxu0  ;;  %v5891_v56 = vld [vmem:[#allocation9 + $0xb4] ss:$8 sps:$4 sm:$0xff]   ;;  %v5886_v31 = vld [vmem:[#allocation9 + $0x1b0] ss:$8 sps:$4 sm:$0xff]  }
 0x271   :  { %v5954_v18 = vld [vmem:[#allocation9 + $0x340] ss:$8 sps:$4 sm:$0xff]  }
 0x272   :  { %859 = vst [vmem:[#allocation2 + $0xc] sm:$0xff] %v5422_v32  ;;  %v1413_v21 = vpop.f32.mrf.mxu0  ;;  %v5894_v32 = vld [vmem:[#allocation9 + $0x1a4] ss:$8 sps:$4 sm:$0xff]  }
 0x273   :  { %v5962_v21 = vld [vmem:[#allocation9 + $0x334] ss:$8 sps:$4 sm:$0xff]  }
 0x279   :  { %v861_v33 = vld [vmem:[#allocation2 + $0x8] sm:$0xff]  ;;  %v5816_v34 = vld [vmem:[#allocation2 + $0x10] ss:$0 sps:$4 sm:$0xff]  }
 0x27a   :  { %v6646_v57 = vcombine.low %v861_v33, %v861_v33  ;;  %v6648_v35 = vcombine.high %v861_v33, %v861_v33  ;;  %1489 = vmatmul.mubr.bf16.vlgmr.msra.gmra.mxu0 %v5816_v34  ;;  %v5897_v33 = vld [vmem:[#allocation9 + $0xa4] ss:$8 sps:$4 sm:$0xff]   ;;  %v5892_v34 = vld [vmem:[#allocation9 + $0x1a0] ss:$8 sps:$4 sm:$0xff]  }
 0x27b   :  { %2378 = vmatpush1.bf16.msra.mxu0 %v5811_v23  ;;  %v5889_v23 = vld [vmem:[#allocation9 + $0xb0] ss:$8 sps:$4 sm:$0xff]  }
 0x27c   :  { %1447 = vmatprep.mubr.bf16.mxu1 %v6648_v35  ;;  %2409 = vmatprep.mubr.bf16.mxu0 %v6648_v35 }
 0x27d   :  { %1448 = vmatmul.mubr.bf16.vlgmr.msra.gmra.mxu1 %v6646_v57  ;;  %2379 = vmatprep.subr.bf16.mxu0 %v5822_v37  ;;  %v5895_v37 = vld [vmem:[#allocation9 + $0xa0] ss:$8 sps:$4 sm:$0xff]  }
 0x27e   :  { %2337 = vmatpush1.bf16.msra.mxu1 %v5817_v36  ;;  %2368 = vmatprep.mubr.bf16.mxu1 %v6652_v39  ;;  %v5900_v36 = vld [vmem:[#allocation9 + $0x194] ss:$8 sps:$4 sm:$0xff]  }
 0x27f   :  { %2338 = vmatprep.subr.bf16.mxu1 %v5825_v38  ;;  %2380 = vmatpush1.bf16.msra.mxu0 %v5820_v40  ;;  %v5903_v38 = vld [vmem:[#allocation9 + $0x94] ss:$8 sps:$4 sm:$0xff]   ;;  %v5898_v40 = vld [vmem:[#allocation9 + $0x190] ss:$8 sps:$4 sm:$0xff]  }
 0x280   :  { %2381 = vmatprep.subr.bf16.mxu0 %v5828_v41  ;;  %v5906_v41 = vld [vmem:[#allocation9 + $0x184] ss:$8 sps:$4 sm:$0xff]  }
 0x282   :  { %2339 = vmatpush1.bf16.msra.mxu1 %v5823_v42  ;;  %v5901_v42 = vld [vmem:[#allocation9 + $0x90] ss:$8 sps:$4 sm:$0xff]  }
 0x283   :  { %2340 = vmatprep.subr.bf16.mxu1 %v5831_v43  ;;  %2382 = vmatpush1.bf16.msra.mxu0 %v5826_v44  ;;  %v5909_v43 = vld [vmem:[#allocation9 + $0x84] ss:$8 sps:$4 sm:$0xff]   ;;  %v5904_v44 = vld [vmem:[#allocation9 + $0x180] ss:$8 sps:$4 sm:$0xff]  }
 0x284   :  { %2383 = vmatprep.subr.bf16.mxu0 %v5834_v45  ;;  %v5907_v45 = vld [vmem:[#allocation9 + $0x80] ss:$8 sps:$4 sm:$0xff]  }
 0x286   :  { %2341 = vmatpush1.bf16.msra.mxu1 %v5829_v24  ;;  %v6664_v24 = vcombine.low %v6644_v29, %v6644_v29  ;;  %v5923_v29 = vld [vmem:[#allocation9 + $0x244] ss:$8 sps:$4 sm:$0xff]  }
 0x287   :  { %2342 = vmatprep.subr.bf16.mxu1 %v5837_v46  ;;  %2384 = vmatpush1.bf16.msra.mxu0 %v5832_v47  ;;  %v5914_v46 = vld [vmem:[#allocation9 + $0x274] ss:$8 sps:$4 sm:$0xff]   ;;  %v5912_v47 = vld [vmem:[#allocation9 + $0x270] ss:$8 sps:$4 sm:$0xff]  }
 0x288   :  { %2385 = vmatprep.subr.bf16.mxu0 %v5840_v48  ;;  %v5917_v48 = vld [vmem:[#allocation9 + $0x264] ss:$8 sps:$4 sm:$0xff]  }
 0x28a   :  { %2343 = vmatpush1.bf16.msra.mxu1 %v5835_v49  ;;  %v5915_v49 = vld [vmem:[#allocation9 + $0x260] ss:$8 sps:$4 sm:$0xff]  }
 0x28b   :  { %2344 = vmatprep.subr.bf16.mxu1 %v5843_v50  ;;  %2386 = vmatpush1.bf16.msra.mxu0 %v5838_v51  ;;  %v5920_v50 = vld [vmem:[#allocation9 + $0x254] ss:$8 sps:$4 sm:$0xff]   ;;  %v5918_v51 = vld [vmem:[#allocation9 + $0x250] ss:$8 sps:$4 sm:$0xff]  }
 0x28c   :  { %2387 = vmatprep.subr.bf16.mxu0 %v5846_v52  ;;  %v5921_v52 = vld [vmem:[#allocation9 + $0x240] ss:$8 sps:$4 sm:$0xff]  }
 0x28e   :  { %2345 = vmatpush1.bf16.msra.mxu1 %v5841_v53  ;;  %v5926_v53 = vld [vmem:[#allocation9 + $0x234] ss:$8 sps:$4 sm:$0xff]  }
 0x28f   :  { %2346 = vmatprep.subr.bf16.mxu1 %v5849_v54  ;;  %2388 = vmatpush1.bf16.msra.mxu0 %v5844_v55  ;;  %v5924_v54 = vld [vmem:[#allocation9 + $0x230] ss:$8 sps:$4 sm:$0xff]   ;;  %v5929_v55 = vld [vmem:[#allocation9 + $0x224] ss:$8 sps:$4 sm:$0xff]  }
 0x290   :  { %2389 = vmatprep.subr.bf16.mxu0 %v5852_v58  ;;  %v5927_v58 = vld [vmem:[#allocation9 + $0x220] ss:$8 sps:$4 sm:$0xff]  }
 0x292   :  { %2347 = vmatpush1.bf16.msra.mxu1 %v5847_v19  ;;  %v5932_v19 = vld [vmem:[#allocation9 + $0x214] ss:$8 sps:$4 sm:$0xff]  }
 0x293   :  { %2348 = vmatprep.subr.bf16.mxu1 %v5855_v59  ;;  %2390 = vmatpush1.bf16.msra.mxu0 %v5850_v60  ;;  %v5930_v59 = vld [vmem:[#allocation9 + $0x210] ss:$8 sps:$4 sm:$0xff]   ;;  %v5935_v60 = vld [vmem:[#allocation9 + $0x204] ss:$8 sps:$4 sm:$0xff]  }
 0x294   :  { %2391 = vmatprep.subr.bf16.mxu0 %v5858_v61  ;;  %v5933_v61 = vld [vmem:[#allocation9 + $0x200] ss:$8 sps:$4 sm:$0xff]  }
 0x296   :  { %2349 = vmatpush1.bf16.msra.mxu1 %v5853_v62  ;;  %v5938_v62 = vld [vmem:[#allocation9 + $0x374] ss:$8 sps:$4 sm:$0xff]  }
 0x297   :  { %2350 = vmatprep.subr.bf16.mxu1 %v5861_v63  ;;  %2392 = vmatpush1.bf16.msra.mxu0 %v5856_v0  ;;  %v5936_v63 = vld [vmem:[#allocation9 + $0x370] ss:$8 sps:$4 sm:$0xff]   ;;  %v5941_v0 = vld [vmem:[#allocation9 + $0x2f4] ss:$8 sps:$4 sm:$0xff]  }
 0x298   :  { %2393 = vmatprep.subr.bf16.mxu0 %v5864_v1  ;;  %v5939_v1 = vld [vmem:[#allocation9 + $0x2f0] ss:$8 sps:$4 sm:$0xff]  }
 0x29a   :  { %2351 = vmatpush1.bf16.msra.mxu1 %v5859_v2  ;;  %v5944_v2 = vld [vmem:[#allocation9 + $0x364] ss:$8 sps:$4 sm:$0xff]  }
 0x29b   :  { %2352 = vmatprep.subr.bf16.mxu1 %v5867_v3  ;;  %2394 = vmatpush2.bf16.msra.mxu0 %v5862_v6  ;;  %v5942_v3 = vld [vmem:[#allocation9 + $0x360] ss:$8 sps:$4 sm:$0xff]   ;;  %v5947_v6 = vld [vmem:[#allocation9 + $0x2e4] ss:$8 sps:$4 sm:$0xff]  }
 0x29c   :  { %2395 = vmatprep.subr.bf16.mxu0 %v5870_v7  ;;  %v5945_v7 = vld [vmem:[#allocation9 + $0x2e0] ss:$8 sps:$4 sm:$0xff]  }
 0x29e   :  { %2353 = vmatpush2.bf16.msra.mxu1 %v5865_v10  ;;  %v5950_v10 = vld [vmem:[#allocation9 + $0x354] ss:$8 sps:$4 sm:$0xff]  }
 0x29f   :  { %2354 = vmatprep.subr.bf16.mxu1 %v5873_v13  ;;  %2396 = vmatpush2.bf16.msra.mxu0 %v5868_v14  ;;  %v5948_v13 = vld [vmem:[#allocation9 + $0x350] ss:$8 sps:$4 sm:$0xff]   ;;  %v5953_v14 = vld [vmem:[#allocation9 + $0x2d4] ss:$8 sps:$4 sm:$0xff]  }
 0x2a0   :  { %2397 = vmatprep.subr.bf16.mxu0 %v5876_v16  ;;  %v5951_v16 = vld [vmem:[#allocation9 + $0x2d0] ss:$8 sps:$4 sm:$0xff]  }
 0x2a2   :  { %2355 = vmatpush2.bf16.msra.mxu1 %v5871_v17  ;;  %v5956_v17 = vld [vmem:[#allocation9 + $0x344] ss:$8 sps:$4 sm:$0xff]  }
 0x2a3   :  { %2356 = vmatprep.subr.bf16.mxu1 %v5879_v20  ;;  %2398 = vmatpush2.bf16.msra.mxu0 %v5874_v8  ;;  %v5959_v20 = vld [vmem:[#allocation9 + $0x2c4] ss:$8 sps:$4 sm:$0xff]   ;;  %v5957_v8 = vld [vmem:[#allocation9 + $0x2c0] ss:$8 sps:$4 sm:$0xff]  }
 0x2a4   :  { %2399 = vmatprep.subr.bf16.mxu0 %v5882_v22  ;;  %v5960_v22 = vld [vmem:[#allocation9 + $0x330] ss:$8 sps:$4 sm:$0xff]  }
 0x2a6   :  { %2357 = vmatpush2.bf16.msra.mxu1 %v5877_v25  ;;  %v5965_v25 = vld [vmem:[#allocation9 + $0x2b4] ss:$8 sps:$4 sm:$0xff]  }
 0x2a7   :  { %2358 = vmatprep.subr.bf16.mxu1 %v5885_v26  ;;  %2400 = vmatpush2.bf16.msra.mxu0 %v5880_v27  ;;  %v5963_v26 = vld [vmem:[#allocation9 + $0x2b0] ss:$8 sps:$4 sm:$0xff]   ;;  %v5968_v27 = vld [vmem:[#allocation9 + $0x324] ss:$8 sps:$4 sm:$0xff]  }
 0x2a8   :  { %2401 = vmatprep.subr.bf16.mxu0 %v5888_v28  ;;  %v5966_v28 = vld [vmem:[#allocation9 + $0x320] ss:$8 sps:$4 sm:$0xff]  }
 0x2aa   :  { %2359 = vmatpush2.bf16.msra.mxu1 %v5883_v30  ;;  %v5971_v30 = vld [vmem:[#allocation9 + $0x2a4] ss:$8 sps:$4 sm:$0xff]  }
 0x2ab   :  { %2360 = vmatprep.subr.bf16.mxu1 %v5891_v56  ;;  %2402 = vmatpush2.bf16.msra.mxu0 %v5886_v31  ;;  %v5969_v56 = vld [vmem:[#allocation9 + $0x2a0] ss:$8 sps:$4 sm:$0xff]   ;;  %v5974_v31 = vld [vmem:[#allocation9 + $0x314] ss:$8 sps:$4 sm:$0xff]  }
 0x2ac   :  { %2403 = vmatprep.subr.bf16.mxu0 %v5894_v32  ;;  %v5972_v32 = vld [vmem:[#allocation9 + $0x310] ss:$8 sps:$4 sm:$0xff]  }
 0x2ae   :  { %2361 = vmatpush2.bf16.msra.mxu1 %v5889_v23  ;;  %v5975_v23 = vld [vmem:[#allocation9 + $0x290] ss:$8 sps:$4 sm:$0xff]  }
 0x2af   :  { %2362 = vmatprep.subr.bf16.mxu1 %v5897_v33  ;;  %2404 = vmatpush2.bf16.msra.mxu0 %v5892_v34  ;;  %v5977_v33 = vld [vmem:[#allocation9 + $0x294] ss:$8 sps:$4 sm:$0xff]   ;;  %v5980_v34 = vld [vmem:[#allocation9 + $0x304] ss:$8 sps:$4 sm:$0xff]  }
 0x2b0   :  { %2405 = vmatprep.subr.bf16.mxu0 %v5900_v36  ;;  %v5978_v36 = vld [vmem:[#allocation9 + $0x300] ss:$8 sps:$4 sm:$0xff]  }
 0x2b2   :  { %2363 = vmatpush2.bf16.msra.mxu1 %v5895_v37  ;;  %v5983_v37 = vld [vmem:[#allocation9 + $0x284] ss:$8 sps:$4 sm:$0xff]  }
 0x2b3   :  { %2364 = vmatprep.subr.bf16.mxu1 %v5903_v38  ;;  %2406 = vmatpush2.bf16.msra.mxu0 %v5898_v40  ;;  %v5986_v38 = vld [vmem:[#allocation11 + $0x74] ss:$8 sps:$4 sm:$0xff]   ;;  %v5981_v40 = vld [vmem:[#allocation9 + $0x280] ss:$8 sps:$4 sm:$0xff]  }
 0x2b4   :  { %2407 = vmatprep.subr.bf16.mxu0 %v5906_v41  ;;  %v5992_v41 = vld [vmem:[#allocation11 + $0x174] ss:$8 sps:$4 sm:$0xff]  }
 0x2b6   :  { %2365 = vmatpush2.bf16.msra.mxu1 %v5901_v42  ;;  %v4953_v42 = vld [vmem:[%s6812_s7 + $0x2] ss:$8 sm:$0x3] }
 0x2b7   :  { %2366 = vmatprep.subr.bf16.mxu1 %v5909_v43  ;;  %2408 = vmatpush2.bf16.msra.mxu0 %v5904_v44  ;;  %v949_v43 = vrot.slane %v4953_v42, %v6615_v9  ;;  %v953_v44 = vrot.slane %v4953_v42, %v6622_v12 }
 0x2b8   :  { %2459 = vmatprep.subr.bf16.mxu0 %v5938_v62 }
 0x2ba   :  { %2367 = vmatpush2.bf16.msra.mxu1 %v5907_v45  ;;  %2410 = vmatmul.mubr.bf16.vlgmr.msra.gmra.mxu0 %v6646_v57 }
 0x2bb   :  { %2491 = vmatprep.mubr.bf16.mxu0 %v6485_v5  ;;  %2418 = vmatprep.subr.bf16.mxu1 %v5914_v46  ;;  %v1409_v46 = vadd.f32 %v6658_v11, %v949_v43 }
 0x2bc   :  { %2460 = vmatpush1.bf16.msra.mxu0 %v5936_v63 }
 0x2bd   :  { %2369 = vmatmul.mubr.bf16.vlgmr.msra.gmra.mxu1 %v6664_v24  ;;  %2461 = vmatprep.subr.bf16.mxu0 %v5944_v2 }
 0x2be   :  { %2419 = vmatpush1.bf16.msra.mxu1 %v5912_v47 }
 0x2bf   :  { %2420 = vmatprep.subr.bf16.mxu1 %v5917_v48 }
 0x2c0   :  { %2462 = vmatpush1.bf16.msra.mxu0 %v5942_v3 }
 0x2c1   :  { %2463 = vmatprep.subr.bf16.mxu0 %v5950_v10 }
 0x2c2   :  { %2421 = vmatpush1.bf16.msra.mxu1 %v5915_v49  ;;  %v1411_v49 = vadd.f32 %v6660_v15, %v953_v44 }
 0x2c3   :  { %2422 = vmatprep.subr.bf16.mxu1 %v5920_v50 }
 0x2c4   :  { %2464 = vmatpush1.bf16.msra.mxu0 %v5948_v13 }
 0x2c5   :  { %2465 = vmatprep.subr.bf16.mxu0 %v5956_v17 }
 0x2c6   :  { %2423 = vmatpush1.bf16.msra.mxu1 %v5918_v51 }
 0x2c7   :  { %2424 = vmatprep.subr.bf16.mxu1 %v5923_v29 }
 0x2c8   :  { %2466 = vmatpush1.bf16.msra.mxu0 %v5954_v18 }
 0x2c9   :  { %2467 = vmatprep.subr.bf16.mxu0 %v5962_v21 }
 0x2ca   :  { %2425 = vmatpush1.bf16.msra.mxu1 %v5921_v52 }
 0x2cb   :  { %2426 = vmatprep.subr.bf16.mxu1 %v5926_v53 }
 0x2cc   :  { %2468 = vmatpush1.bf16.msra.mxu0 %v5960_v22 }
 0x2cd   :  { %2469 = vmatprep.subr.bf16.mxu0 %v5968_v27 }
 0x2ce   :  { %2427 = vmatpush1.bf16.msra.mxu1 %v5924_v54 }
 0x2cf   :  { %2428 = vmatprep.subr.bf16.mxu1 %v5929_v55 }
 0x2d0   :  { %2470 = vmatpush1.bf16.msra.mxu0 %v5966_v28 }
 0x2d1   :  { %2471 = vmatprep.subr.bf16.mxu0 %v5974_v31 }
 0x2d2   :  { %2429 = vmatpush1.bf16.msra.mxu1 %v5927_v58 }
 0x2d3   :  { %2430 = vmatprep.subr.bf16.mxu1 %v5932_v19 }
 0x2d4   :  { %2472 = vmatpush1.bf16.msra.mxu0 %v5972_v32 }
 0x2d5   :  { %2473 = vmatprep.subr.bf16.mxu0 %v5980_v34 }
 0x2d6   :  { %2431 = vmatpush1.bf16.msra.mxu1 %v5930_v59 }
 0x2d7   :  { %2432 = vmatprep.subr.bf16.mxu1 %v5935_v60 }
 0x2d8   :  { %2474 = vmatpush1.bf16.msra.mxu0 %v5978_v36 }
 0x2d9   :  { %3539 = vmatprep.subr.bf16.mxu0 %v5986_v38 }
 0x2da   :  { %2433 = vmatpush1.bf16.msra.mxu1 %v5933_v61 }
 0x2db   :  { %2434 = vmatprep.subr.bf16.mxu1 %v5941_v0 }
 0x2de   :  { %2435 = vmatpush2.bf16.msra.mxu1 %v5939_v1 }
 0x2df   :  { %2436 = vmatprep.subr.bf16.mxu1 %v5947_v6 }
 0x2e2   :  { %2437 = vmatpush2.bf16.msra.mxu1 %v5945_v7 }
 0x2e3   :  { %2438 = vmatprep.subr.bf16.mxu1 %v5953_v14 }
 0x2e6   :  { %2439 = vmatpush2.bf16.msra.mxu1 %v5951_v16 }
 0x2e7   :  { %2440 = vmatprep.subr.bf16.mxu1 %v5959_v20 }
 0x2ea   :  { %2441 = vmatpush2.bf16.msra.mxu1 %v5957_v8 }
 0x2eb   :  { %2442 = vmatprep.subr.bf16.mxu1 %v5965_v25 }
 0x2ee   :  { %2443 = vmatpush2.bf16.msra.mxu1 %v5963_v26 }
 0x2ef   :  { %2444 = vmatprep.subr.bf16.mxu1 %v5971_v30 }
 0x2f2   :  { %2445 = vmatpush2.bf16.msra.mxu1 %v5969_v56 }
 0x2f3   :  { %2446 = vmatprep.subr.bf16.mxu1 %v5977_v33 }
 0x2f6   :  { %2447 = vmatpush2.bf16.msra.mxu1 %v5975_v23 }
 0x2f7   :  { %2448 = vmatprep.subr.bf16.mxu1 %v5983_v37 }
 0x2fa   :  { %2449 = vmatpush2.bf16.msra.mxu1 %v5981_v40 }
 0x2fb   :  { %3580 = vmatprep.subr.bf16.mxu1 %v5992_v41 }
 0x33a   :  { %v1490_v45 = vpop.f32.mrf.mxu0 }
 0x33c   :  { %v1492_v48 = vpop.f32.mrf.mxu0 }
 0x33d   :  { %v1449_v47 = vpop.f32.mrf.mxu1 }
 0x33e   :  { %v1450_v50 = vadd.f32 %v1449_v47, %v1409_v46  ;;  %v1494_v29 = vpop.f32.mrf.mxu0 }
 0x33f   :  { %v1451_v51 = vpop.f32.mrf.mxu1 }
 0x340   :  { %v1491_v52 = vadd.f32 %v1490_v45, %v1450_v50  ;;  %v1452_v53 = vadd.f32 %v1451_v51, %v1411_v49  ;;  %v1495_v55 = vpop.f32.mrf.mxu0  ;;  %v5039_v49 = vld [vmem:[%s6813_s8 + $0x2] ss:$8 sm:$0x3] }
 0x341   :  { %v1453_v54 = vpop.f32.mrf.mxu1 }
 0x342   :  { %vm1497_vm3 = vcmp.ge.f32.partialorder %v1491_v52, 0.0  ;;  %v1499_v58 = vmul.f32 0.2, %v1491_v52  ;;  %v1493_v19 = vadd.f32 %v1492_v48, %v1452_v53 }
 0x343   :  { %v1454_v59 = vpop.f32.mrf.mxu1 }
 0x344   :  { %v1501_v60 = vsel %vm1497_vm3, %v1491_v52, %v1499_v58  ;;  %vm1498_vm4 = vcmp.ge.f32.partialorder %v1493_v19, 0.0  ;;  %v1500_v61 = vmul.f32 0.2, %v1493_v19  ;;  %v5042_v59 = vld [vmem:[%s6812_s7 + $0x3] ss:$8 sm:$0x3] }
 0x345   :  { %v1503_v62 = vrot.slane %v1501_v60, 4  ;;  %v1517_v11 = vmul.f32 %v1501_v60, %v1501_v60 }
 0x346   :  { %v1502_v63 = vsel %vm1498_vm4, %v1493_v19, %v1500_v61 }
 0x347   :  { %v1504_v0 = vadd.f32 %v1503_v62, %v1501_v60  ;;  %v1519_v1 = vrot.slane %v1517_v11, 4  ;;  %v1509_v15 = vrot.slane %v1502_v63, 4  ;;  %v1518_v2 = vmul.f32 %v1502_v63, %v1502_v63  ;;  %v5040_v62 = vld [vmem:[%s6814_s9 + $0x2] ss:$8 sm:$0x3] }
 0x349   :  { %v1505_v3 = vrot.slane %v1504_v0, 2  ;;  %v1520_v6 = vadd.f32 %v1519_v1, %v1517_v11  ;;  %v1510_v7 = vadd.f32 %v1509_v15, %v1502_v63  ;;  %v1525_v10 = vrot.slane %v1518_v2, 4 }
 0x34a   :  { %v1744_v11 = vrot.slane %v5042_v59, %v6615_v9  ;;  %v1748_v15 = vrot.slane %v5042_v59, %v6622_v12  ;;  %v6032_v59 = vld [vmem:[#allocation11 + $0x100] ss:$8 sps:$4 sm:$0xff]  }
 0x34b   :  { %v1506_v13 = vadd.f32 %v1505_v3, %v1504_v0  ;;  %v1521_v14 = vrot.slane %v1520_v6, 2  ;;  %v1511_v16 = vrot.slane %v1510_v7, 2  ;;  %v1526_v17 = vadd.f32 %v1525_v10, %v1518_v2 }
 0x34d   :  { %v1507_v18 = vrot.slane %v1506_v13, 1  ;;  %v1522_v20 = vadd.f32 %v1521_v14, %v1520_v6  ;;  %v1512_v8 = vadd.f32 %v1511_v16, %v1510_v7  ;;  %v1527_v21 = vrot.slane %v1526_v17, 2 }
 0x34f   :  { %v1508_v22 = vadd.f32 %v1507_v18, %v1506_v13  ;;  %v1523_v25 = vrot.slane %v1522_v20, 1  ;;  %v1513_v26 = vrot.slane %v1512_v8, 1  ;;  %v1528_v27 = vadd.f32 %v1527_v21, %v1526_v17 }
 0x351   :  { %v1515_v28 = vmul.f32 0.125, %v1508_v22  ;;  %v1524_v30 = vadd.f32 %v1523_v25, %v1522_v20  ;;  %v1514_v56 = vadd.f32 %v1513_v26, %v1512_v8  ;;  %v1529_v31 = vrot.slane %v1528_v27, 1  ;;  %v5984_v26 = vld [vmem:[#allocation11 + $0x70] ss:$8 sps:$4 sm:$0xff]  }
 0x353   :  { %v1531_v32 = vmul.f32 0.125, %v1524_v30  ;;  %v1533_v23 = vmul.f32 %v1515_v28, %v1515_v28  ;;  %v1516_v33 = vmul.f32 0.125, %v1514_v56  ;;  %v1530_v34 = vadd.f32 %v1529_v31, %v1528_v27  ;;  %v5995_v27 = vld [vmem:[#allocation11 + $0x64] ss:$8 sps:$4 sm:$0xff]  }
 0x355   :  { %v1535_v36 = vsub.f32 %v1531_v32, %v1533_v23  ;;  %v1532_v37 = vmul.f32 0.125, %v1530_v34  ;;  %v1534_v38 = vmul.f32 %v1516_v33, %v1516_v33  ;;  %v5990_v32 = vld [vmem:[#allocation11 + $0x170] ss:$8 sps:$4 sm:$0xff]   ;;  %v5998_v23 = vld [vmem:[#allocation11 + $0x164] ss:$8 sps:$4 sm:$0xff]  }
 0x356   :  { %v6001_v34 = vld [vmem:[#allocation11 + $0x54] ss:$8 sps:$4 sm:$0xff]  }
 0x357   :  { %v1537_v40 = vmax.f32 %v1535_v36, 0.0  ;;  %v1536_v41 = vsub.f32 %v1532_v37, %v1534_v38  ;;  %v5996_v36 = vld [vmem:[#allocation11 + $0x160] ss:$8 sps:$4 sm:$0xff]   ;;  %v6004_v37 = vld [vmem:[#allocation11 + $0x154] ss:$8 sps:$4 sm:$0xff]  }
 0x358   :  { %v5999_v38 = vld [vmem:[#allocation11 + $0x50] ss:$8 sps:$4 sm:$0xff]  }
 0x359   :  { %v1541_v42 = vadd.f32 1e-05, %v1537_v40  ;;  %v1538_v43 = vmax.f32 %v1536_v41, 0.0  ;;  %v6007_v40 = vld [vmem:[#allocation11 + $0x44] ss:$8 sps:$4 sm:$0xff]  }
 0x35a   :  { %v6002_v41 = vld [vmem:[#allocation11 + $0x150] ss:$8 sps:$4 sm:$0xff]  }
 0x35b   :  { %v1542_v44 = vadd.f32 1e-05, %v1538_v43  ;;  %6309 = vrsqrt.f32 %v1541_v42  ;;  %v6010_v42 = vld [vmem:[#allocation11 + $0x144] ss:$8 sps:$4 sm:$0xff]   ;;  %v6005_v43 = vld [vmem:[#allocation11 + $0x40] ss:$8 sps:$4 sm:$0xff]  }
 0x35d   :  { %6311 = vrsqrt.f32 %v1542_v44  ;;  %v6013_v44 = vld [vmem:[#allocation11 + $0x34] ss:$8 sps:$4 sm:$0xff]  }
 0x368   :  { %v6310_v45 = vpop.eup %6309 }
 0x36a   :  { %v6312_v46 = vpop.eup %6311 }
 0x36b   :  { %v1547_v47 = vcombine.low %v6310_v45, %v6312_v46  ;;  %v6008_v45 = vld [vmem:[#allocation11 + $0x140] ss:$8 sps:$4 sm:$0xff]   ;;  %v6011_v46 = vld [vmem:[#allocation11 + $0x30] ss:$8 sps:$4 sm:$0xff]  }
 0x36d   :  { %v1554_v48 = vrot.slane %v1547_v47, %v6628_v4  ;;  %v6014_v47 = vld [vmem:[#allocation11 + $0x130] ss:$8 sps:$4 sm:$0xff]  }
 0x36f   :  { %v1561_v50 = vrot.slane %v1554_v48, %v6628_v4  ;;  %v6022_v48 = vld [vmem:[#allocation11 + $0x124] ss:$8 sps:$4 sm:$0xff]  }
 0x371   :  { %v1563_v51 = vmul.f32 %v5039_v49, %v1561_v50  ;;  %v6017_v49 = vld [vmem:[#allocation11 + $0x20] ss:$8 sps:$4 sm:$0xff]   ;;  %v6025_v50 = vld [vmem:[#allocation11 + $0x14] ss:$8 sps:$4 sm:$0xff]  }
 0x373   :  { %v1570_v29 = vrot.slane %v1563_v51, %v6615_v9  ;;  %v1574_v52 = vrot.slane %v1563_v51, %v6622_v12  ;;  %v6020_v51 = vld [vmem:[#allocation11 + $0x120] ss:$8 sps:$4 sm:$0xff]  }
 0x375   :  { %v1577_v53 = vmul.f32 %v1570_v29, %v1515_v28  ;;  %v1578_v54 = vmul.f32 %v1574_v52, %v1516_v33  ;;  %v1598_v55 = vmul.f32 %v1570_v29, %v1501_v60  ;;  %v1599_v58 = vmul.f32 %v1574_v52, %v1502_v63  ;;  %v5993_v33 = vld [vmem:[#allocation11 + $0x60] ss:$8 sps:$4 sm:$0xff]   ;;  %v6028_v29 = vld [vmem:[#allocation11 + $0x114] ss:$8 sps:$4 sm:$0xff]   ;;  %v6023_v52 = vld [vmem:[#allocation11 + $0x10] ss:$8 sps:$4 sm:$0xff]  }
 0x377   :  { %v1581_v19 = vcombine.low %v1577_v53, %v1578_v54  ;;  %v6031_v53 = vld [vmem:[#allocation11 + $0x4] ss:$8 sps:$4 sm:$0xff]   ;;  %v6026_v54 = vld [vmem:[#allocation11 + $0x110] ss:$8 sps:$4 sm:$0xff]  }
 0x379   :  { %v1588_v61 = vrot.slane %v1581_v19, %v6628_v4  ;;  %v6037_v19 = vld [vmem:[#allocation11 + $0xf4] ss:$8 sps:$4 sm:$0xff]  }
 0x37a   :  { %v2411_v1 = vpop.f32.mrf.mxu0 }
 0x37b   :  { %v1595_v0 = vrot.slane %v1588_v61, %v6628_v4  ;;  %v6040_v61 = vld [vmem:[#allocation11 + $0x1f4] ss:$8 sps:$4 sm:$0xff]  }
 0x37c   :  { %v2413_v2 = vpop.f32.mrf.mxu0 }
 0x37d   :  { %v1597_v60 = vsub.f32 %v5040_v62, %v1595_v0  ;;  %v2370_v63 = vpop.f32.mrf.mxu1  ;;  %v6035_v62 = vld [vmem:[#allocation11 + $0xf0] ss:$8 sps:$4 sm:$0xff]  }
 0x37e   :  { %v2371_v3 = vadd.f32 %v2370_v63, %v1744_v11  ;;  %v2415_v13 = vpop.f32.mrf.mxu0  ;;  %v6043_v11 = vld [vmem:[#allocation11 + $0xe4] ss:$8 sps:$4 sm:$0xff]   ;;  %v6038_v0 = vld [vmem:[#allocation11 + $0x1f0] ss:$8 sps:$4 sm:$0xff]   ;;  %v6044_v63 = vld [vmem:[#allocation11 + $0x1e0] ss:$8 sps:$4 sm:$0xff]  }
 0x37f   :  { %v1604_v6 = vrot.slane %v1597_v60, %v6615_v9  ;;  %v1608_v7 = vrot.slane %v1597_v60, %v6622_v12  ;;  %v2372_v10 = vpop.f32.mrf.mxu1  ;;  %v6049_v60 = vld [vmem:[#allocation11 + $0xd4] ss:$8 sps:$4 sm:$0xff]   ;;  %v6053_v13 = vld [vmem:[#allocation11 + $0xc0] ss:$8 sps:$4 sm:$0xff]  }
 0x380   :  { %v2373_v14 = vadd.f32 %v2372_v10, %v1748_v15  ;;  %v6695_v16 = vadd.f32 %v2411_v1, %v2371_v3  ;;  %v2416_v20 = vpop.f32.mrf.mxu0  ;;  %v6046_v1 = vld [vmem:[#allocation11 + $0x1e4] ss:$8 sps:$4 sm:$0xff]   ;;  %v6041_v15 = vld [vmem:[#allocation11 + $0xe0] ss:$8 sps:$4 sm:$0xff]   ;;  %v6047_v3 = vld [vmem:[#allocation11 + $0xd0] ss:$8 sps:$4 sm:$0xff]  }
 0x381   :  { %v1611_v17 = vadd.f32 %v1604_v6, %v1598_v55  ;;  %v1612_v18 = vadd.f32 %v1608_v7, %v1599_v58  ;;  %v2374_v8 = vpop.f32.mrf.mxu1  ;;  %v6034_v55 = vld [vmem:[#allocation11 + $0x104] ss:$8 sps:$4 sm:$0xff]   ;;  %v6029_v58 = vld [vmem:[#allocation11] ss:$8 sps:$4 sm:$0xff]   ;;  %v6050_v7 = vld [vmem:[#allocation11 + $0x1d0] ss:$8 sps:$4 sm:$0xff]  }
 0x382   :  { %v6697_v21 = vadd.f32 %v2413_v2, %v2373_v14  ;;  %v6052_v2 = vld [vmem:[#allocation11 + $0x1d4] ss:$8 sps:$4 sm:$0xff]   ;;  %v6055_v6 = vld [vmem:[#allocation11 + $0xc4] ss:$8 sps:$4 sm:$0xff]   ;;  %v6059_v20 = vld [vmem:[#allocation11 + $0xb0] ss:$8 sps:$4 sm:$0xff]  }
 0x383   :  { %v5423_v22 = vpack.c.bf16 %v1612_v18, %v1611_v17  ;;  %v2375_v25 = vpop.f32.mrf.mxu1  ;;  %v6058_v10 = vld [vmem:[#allocation11 + $0x1c4] ss:$8 sps:$4 sm:$0xff]   ;;  %v6061_v14 = vld [vmem:[#allocation11 + $0xb4] ss:$8 sps:$4 sm:$0xff]   ;;  %v6056_v17 = vld [vmem:[#allocation11 + $0x1c0] ss:$8 sps:$4 sm:$0xff]  }
 0x384   :  { %v6064_v18 = vld [vmem:[#allocation11 + $0x1b4] ss:$8 sps:$4 sm:$0xff]   ;;  %v6067_v8 = vld [vmem:[#allocation11 + $0xa4] ss:$8 sps:$4 sm:$0xff]  }
 0x385   :  { %1621 = vst [vmem:[#allocation2 + $0x14] sm:$0xff] %v5423_v22  ;;  %v6062_v22 = vld [vmem:[#allocation11 + $0x1b0] ss:$8 sps:$4 sm:$0xff]   ;;  %v6070_v25 = vld [vmem:[#allocation11 + $0x1a4] ss:$8 sps:$4 sm:$0xff]  }
 0x38c   :  { %v1624_v28 = vld [vmem:[#allocation2 + $0x10] sm:$0xff]  ;;  %v5989_v30 = vld [vmem:[#allocation2 + $0x18] ss:$0 sps:$4 sm:$0xff]  }
 0x38d   :  { %v6699_v56 = vcombine.low %v1624_v28, %v1624_v28  ;;  %v6701_v31 = vcombine.high %v1624_v28, %v1624_v28  ;;  %2492 = vmatmul.mubr.bf16.vlgmr.msra.gmra.mxu0 %v5989_v30  ;;  %v6068_v28 = vld [vmem:[#allocation11 + $0x1a0] ss:$8 sps:$4 sm:$0xff]   ;;  %v6076_v30 = vld [vmem:[#allocation11 + $0x194] ss:$8 sps:$4 sm:$0xff]  }
 0x38e   :  { %3540 = vmatpush1.bf16.msra.mxu0 %v5984_v26  ;;  %3571 = vmatprep.mubr.bf16.mxu0 %v6652_v39  ;;  %v6019_v39 = vld [vmem:[#allocation11 + $0x24] ss:$8 sps:$4 sm:$0xff]   ;;  %v6065_v26 = vld [vmem:[#allocation11 + $0xa0] ss:$8 sps:$4 sm:$0xff]  }
 0x38f   :  { %2450 = vmatprep.mubr.bf16.mxu1 %v6701_v31  ;;  %3541 = vmatprep.subr.bf16.mxu0 %v5995_v27  ;;  %v6073_v27 = vld [vmem:[#allocation11 + $0x94] ss:$8 sps:$4 sm:$0xff]  }
 0x390   :  { %2451 = vmatmul.mubr.bf16.vlgmr.msra.gmra.mxu1 %v6699_v56 }
 0x391   :  { %3581 = vmatpush1.bf16.msra.mxu1 %v5990_v32  ;;  %3612 = vmatprep.mubr.bf16.mxu1 %v6648_v35  ;;  %v6016_v35 = vld [vmem:[#allocation11 + $0x134] ss:$8 sps:$4 sm:$0xff]   ;;  %v6071_v32 = vld [vmem:[#allocation11 + $0x90] ss:$8 sps:$4 sm:$0xff]  }
 0x392   :  { %3582 = vmatprep.subr.bf16.mxu1 %v5998_v23  ;;  %3542 = vmatpush1.bf16.msra.mxu0 %v5993_v33  ;;  %v6079_v23 = vld [vmem:[#allocation11 + $0x84] ss:$8 sps:$4 sm:$0xff]   ;;  %v6074_v33 = vld [vmem:[#allocation11 + $0x190] ss:$8 sps:$4 sm:$0xff]  }
 0x393   :  { %3543 = vmatprep.subr.bf16.mxu0 %v6001_v34  ;;  %v6082_v34 = vld [vmem:[#allocation11 + $0x184] ss:$8 sps:$4 sm:$0xff]  }
 0x395   :  { %3583 = vmatpush1.bf16.msra.mxu1 %v5996_v36  ;;  %v6077_v36 = vld [vmem:[#allocation11 + $0x80] ss:$8 sps:$4 sm:$0xff]  }
 0x396   :  { %3584 = vmatprep.subr.bf16.mxu1 %v6004_v37  ;;  %3544 = vmatpush1.bf16.msra.mxu0 %v5999_v38  ;;  %v6085_v37 = vld [vmem:[#allocation11 + $0x274] ss:$8 sps:$4 sm:$0xff]   ;;  %v6080_v38 = vld [vmem:[#allocation11 + $0x180] ss:$8 sps:$4 sm:$0xff]  }
 0x397   :  { %3545 = vmatprep.subr.bf16.mxu0 %v6007_v40  ;;  %v6083_v40 = vld [vmem:[#allocation11 + $0x270] ss:$8 sps:$4 sm:$0xff]  }
 0x399   :  { %3585 = vmatpush1.bf16.msra.mxu1 %v6002_v41  ;;  %v6088_v41 = vld [vmem:[#allocation11 + $0x264] ss:$8 sps:$4 sm:$0xff]  }
 0x39a   :  { %3586 = vmatprep.subr.bf16.mxu1 %v6010_v42  ;;  %3546 = vmatpush1.bf16.msra.mxu0 %v6005_v43  ;;  %v6086_v42 = vld [vmem:[#allocation11 + $0x260] ss:$8 sps:$4 sm:$0xff]   ;;  %v6091_v43 = vld [vmem:[#allocation11 + $0x254] ss:$8 sps:$4 sm:$0xff]  }
 0x39b   :  { %3547 = vmatprep.subr.bf16.mxu0 %v6013_v44  ;;  %v6089_v44 = vld [vmem:[#allocation11 + $0x250] ss:$8 sps:$4 sm:$0xff]  }
 0x39d   :  { %3587 = vmatpush1.bf16.msra.mxu1 %v6008_v45  ;;  %v6094_v45 = vld [vmem:[#allocation11 + $0x244] ss:$8 sps:$4 sm:$0xff]  }
 0x39e   :  { %3588 = vmatprep.subr.bf16.mxu1 %v6016_v35  ;;  %3548 = vmatpush1.bf16.msra.mxu0 %v6011_v46  ;;  %v6092_v35 = vld [vmem:[#allocation11 + $0x240] ss:$8 sps:$4 sm:$0xff]   ;;  %v6097_v46 = vld [vmem:[#allocation11 + $0x234] ss:$8 sps:$4 sm:$0xff]  }
 0x39f   :  { %3549 = vmatprep.subr.bf16.mxu0 %v6019_v39  ;;  %v6095_v39 = vld [vmem:[#allocation11 + $0x230] ss:$8 sps:$4 sm:$0xff]  }
 0x3a1   :  { %3589 = vmatpush1.bf16.msra.mxu1 %v6014_v47  ;;  %v6098_v47 = vld [vmem:[#allocation11 + $0x220] ss:$8 sps:$4 sm:$0xff]  }
 0x3a2   :  { %3590 = vmatprep.subr.bf16.mxu1 %v6022_v48  ;;  %3550 = vmatpush1.bf16.msra.mxu0 %v6017_v49  ;;  %v6133_v48 = vld [vmem:[#allocation11 + $0x374] ss:$8 sps:$4 sm:$0xff]   ;;  %v6101_v49 = vld [vmem:[#allocation11 + $0x210] ss:$8 sps:$4 sm:$0xff]  }
 0x3a3   :  { %3551 = vmatprep.subr.bf16.mxu0 %v6025_v50  ;;  %v6106_v50 = vld [vmem:[#allocation11 + $0x204] ss:$8 sps:$4 sm:$0xff]  }
 0x3a5   :  { %3591 = vmatpush1.bf16.msra.mxu1 %v6020_v51  ;;  %v6136_v51 = vld [vmem:[#allocation11 + $0x364] ss:$8 sps:$4 sm:$0xff]  }
 0x3a6   :  { %3592 = vmatprep.subr.bf16.mxu1 %v6028_v29  ;;  %3552 = vmatpush1.bf16.msra.mxu0 %v6023_v52  ;;  %v6134_v29 = vld [vmem:[#allocation11 + $0x360] ss:$8 sps:$4 sm:$0xff]  }
 0x3a7   :  { %3553 = vmatprep.subr.bf16.mxu0 %v6031_v53  ;;  %v6104_v52 = vld [vmem:[#allocation11 + $0x200] ss:$8 sps:$4 sm:$0xff]   ;;  %v6109_v53 = vld [vmem:[#allocation11 + $0x2f4] ss:$8 sps:$4 sm:$0xff]  }
 0x3a9   :  { %3593 = vmatpush1.bf16.msra.mxu1 %v6026_v54  ;;  %v6139_v54 = vld [vmem:[#allocation11 + $0x354] ss:$8 sps:$4 sm:$0xff]  }
 0x3aa   :  { %3594 = vmatprep.subr.bf16.mxu1 %v6034_v55  ;;  %3554 = vmatpush1.bf16.msra.mxu0 %v6029_v58  ;;  %v6137_v55 = vld [vmem:[#allocation11 + $0x350] ss:$8 sps:$4 sm:$0xff]  }
 0x3ab   :  { %3555 = vmatprep.subr.bf16.mxu0 %v6037_v19  ;;  %v6107_v58 = vld [vmem:[#allocation11 + $0x2f0] ss:$8 sps:$4 sm:$0xff]   ;;  %v6112_v19 = vld [vmem:[#allocation11 + $0x2e4] ss:$8 sps:$4 sm:$0xff]  }
 0x3ad   :  { %3595 = vmatpush1.bf16.msra.mxu1 %v6032_v59  ;;  %v6142_v59 = vld [vmem:[#allocation11 + $0x344] ss:$8 sps:$4 sm:$0xff]  }
 0x3ae   :  { %3596 = vmatprep.subr.bf16.mxu1 %v6040_v61  ;;  %3556 = vmatpush2.bf16.msra.mxu0 %v6035_v62  ;;  %v6140_v61 = vld [vmem:[#allocation11 + $0x340] ss:$8 sps:$4 sm:$0xff]  }
 0x3af   :  { %3557 = vmatprep.subr.bf16.mxu0 %v6043_v11  ;;  %v6110_v62 = vld [vmem:[#allocation11 + $0x2e0] ss:$8 sps:$4 sm:$0xff]   ;;  %v6115_v11 = vld [vmem:[#allocation11 + $0x2d4] ss:$8 sps:$4 sm:$0xff]  }
 0x3b1   :  { %3597 = vmatpush2.bf16.msra.mxu1 %v6038_v0  ;;  %v6145_v0 = vld [vmem:[#allocation11 + $0x334] ss:$8 sps:$4 sm:$0xff]  }
 0x3b2   :  { %3598 = vmatprep.subr.bf16.mxu1 %v6046_v1  ;;  %3558 = vmatpush2.bf16.msra.mxu0 %v6041_v15  ;;  %v6143_v1 = vld [vmem:[#allocation11 + $0x330] ss:$8 sps:$4 sm:$0xff]  }
 0x3b3   :  { %3559 = vmatprep.subr.bf16.mxu0 %v6049_v60  ;;  %v6113_v15 = vld [vmem:[#allocation11 + $0x2d0] ss:$8 sps:$4 sm:$0xff]   ;;  %v6118_v60 = vld [vmem:[#allocation11 + $0x2c4] ss:$8 sps:$4 sm:$0xff]  }
 0x3b5   :  { %3599 = vmatpush2.bf16.msra.mxu1 %v6044_v63  ;;  %v6148_v63 = vld [vmem:[#allocation11 + $0x324] ss:$8 sps:$4 sm:$0xff]  }
 0x3b6   :  { %3600 = vmatprep.subr.bf16.mxu1 %v6052_v2  ;;  %3560 = vmatpush2.bf16.msra.mxu0 %v6047_v3  ;;  %v6146_v2 = vld [vmem:[#allocation11 + $0x320] ss:$8 sps:$4 sm:$0xff]  }
 0x3b7   :  { %3561 = vmatprep.subr.bf16.mxu0 %v6055_v6  ;;  %v6116_v3 = vld [vmem:[#allocation11 + $0x2c0] ss:$8 sps:$4 sm:$0xff]   ;;  %v6121_v6 = vld [vmem:[#allocation11 + $0x2b4] ss:$8 sps:$4 sm:$0xff]  }
 0x3b9   :  { %3601 = vmatpush2.bf16.msra.mxu1 %v6050_v7  ;;  %v6151_v7 = vld [vmem:[#allocation11 + $0x314] ss:$8 sps:$4 sm:$0xff]  }
 0x3ba   :  { %3602 = vmatprep.subr.bf16.mxu1 %v6058_v10  ;;  %3562 = vmatpush2.bf16.msra.mxu0 %v6053_v13  ;;  %v6149_v10 = vld [vmem:[#allocation11 + $0x310] ss:$8 sps:$4 sm:$0xff]  }
 0x3bb   :  { %3563 = vmatprep.subr.bf16.mxu0 %v6061_v14  ;;  %v6119_v13 = vld [vmem:[#allocation11 + $0x2b0] ss:$8 sps:$4 sm:$0xff]   ;;  %v6124_v14 = vld [vmem:[#allocation11 + $0x2a4] ss:$8 sps:$4 sm:$0xff]  }
 0x3bd   :  { %3603 = vmatpush2.bf16.msra.mxu1 %v6056_v17  ;;  %v6154_v17 = vld [vmem:[#allocation11 + $0x304] ss:$8 sps:$4 sm:$0xff]  }
 0x3be   :  { %3604 = vmatprep.subr.bf16.mxu1 %v6064_v18  ;;  %3564 = vmatpush2.bf16.msra.mxu0 %v6059_v20  ;;  %v6152_v18 = vld [vmem:[#allocation11 + $0x300] ss:$8 sps:$4 sm:$0xff]  }
 0x3bf   :  { %3565 = vmatprep.subr.bf16.mxu0 %v6067_v8  ;;  %v6122_v20 = vld [vmem:[#allocation11 + $0x2a0] ss:$8 sps:$4 sm:$0xff]   ;;  %v6127_v8 = vld [vmem:[#allocation11 + $0x294] ss:$8 sps:$4 sm:$0xff]  }
 0x3c1   :  { %3605 = vmatpush2.bf16.msra.mxu1 %v6062_v22  ;;  %v6160_v22 = vld [vmem:[#allocation11 + $0x3f4] ss:$8 sps:$4 sm:$0xff]  }
 0x3c2   :  { %3606 = vmatprep.subr.bf16.mxu1 %v6070_v25  ;;  %3566 = vmatpush2.bf16.msra.mxu0 %v6065_v26  ;;  %v6158_v25 = vld [vmem:[#allocation11 + $0x3f0] ss:$8 sps:$4 sm:$0xff]  }
 0x3c3   :  { %3567 = vmatprep.subr.bf16.mxu0 %v6073_v27  ;;  %v6125_v26 = vld [vmem:[#allocation11 + $0x290] ss:$8 sps:$4 sm:$0xff]   ;;  %v6130_v27 = vld [vmem:[#allocation11 + $0x284] ss:$8 sps:$4 sm:$0xff]  }
 0x3c5   :  { %3607 = vmatpush2.bf16.msra.mxu1 %v6068_v28  ;;  %v6166_v28 = vld [vmem:[#allocation11 + $0x3e4] ss:$8 sps:$4 sm:$0xff]  }
 0x3c6   :  { %3608 = vmatprep.subr.bf16.mxu1 %v6076_v30  ;;  %3568 = vmatpush2.bf16.msra.mxu0 %v6071_v32  ;;  %v6164_v30 = vld [vmem:[#allocation11 + $0x3e0] ss:$8 sps:$4 sm:$0xff]  }
 0x3c7   :  { %3569 = vmatprep.subr.bf16.mxu0 %v6079_v23  ;;  %v6128_v32 = vld [vmem:[#allocation11 + $0x280] ss:$8 sps:$4 sm:$0xff]   ;;  %v6157_v23 = vld [vmem:[#allocation11 + $0x474] ss:$8 sps:$4 sm:$0xff]  }
 0x3c9   :  { %3609 = vmatpush2.bf16.msra.mxu1 %v6074_v33  ;;  %v6172_v33 = vld [vmem:[#allocation11 + $0x3d4] ss:$8 sps:$4 sm:$0xff]  }
 0x3ca   :  { %3610 = vmatprep.subr.bf16.mxu1 %v6082_v34  ;;  %3570 = vmatpush2.bf16.msra.mxu0 %v6077_v36  ;;  %v6170_v34 = vld [vmem:[#allocation11 + $0x3d0] ss:$8 sps:$4 sm:$0xff]  }
 0x3cb   :  { %3621 = vmatprep.subr.bf16.mxu0 %v6085_v37  ;;  %v6155_v36 = vld [vmem:[#allocation11 + $0x470] ss:$8 sps:$4 sm:$0xff]   ;;  %v6163_v37 = vld [vmem:[#allocation11 + $0x464] ss:$8 sps:$4 sm:$0xff]  }
 0x3cd   :  { %3611 = vmatpush2.bf16.msra.mxu1 %v6080_v38  ;;  %3572 = vmatmul.mubr.bf16.vlgmr.msra.gmra.mxu0 %v6664_v24  ;;  %v6100_v24 = vld [vmem:[#allocation11 + $0x224] ss:$8 sps:$4 sm:$0xff]  }
 0x3ce   :  { %3622 = vmatpush1.bf16.msra.mxu0 %v6083_v40  ;;  %3653 = vmatprep.mubr.bf16.mxu0 %v6701_v31  ;;  %v6103_v31 = vld [vmem:[#allocation11 + $0x214] ss:$8 sps:$4 sm:$0xff]   ;;  %v6178_v38 = vld [vmem:[#allocation11 + $0x3c4] ss:$8 sps:$4 sm:$0xff]   ;;  %v6176_v40 = vld [vmem:[#allocation11 + $0x3c0] ss:$8 sps:$4 sm:$0xff]  }
 0x3cf   :  { %3623 = vmatprep.subr.bf16.mxu0 %v6088_v41  ;;  %3662 = vmatprep.subr.bf16.mxu1 %v6133_v48  ;;  %v6161_v41 = vld [vmem:[#allocation11 + $0x460] ss:$8 sps:$4 sm:$0xff]   ;;  %v6202_v48 = vld [vmem:[#allocation11 + $0x384] ss:$8 sps:$4 sm:$0xff]  }
 0x3d0   :  { %3613 = vmatmul.mubr.bf16.vlgmr.msra.gmra.mxu1 %v6646_v57  ;;  %v6131_v57 = vld [vmem:[#allocation11 + $0x370] ss:$8 sps:$4 sm:$0xff]  }
 0x3d1   :  { %3663 = vmatpush1.bf16.msra.mxu1 %v6131_v57  ;;  %v6187_v57 = vld [vmem:[#allocation11 + $0x424] ss:$8 sps:$4 sm:$0xff]  }
 0x3d2   :  { %3624 = vmatpush1.bf16.msra.mxu0 %v6086_v42  ;;  %3664 = vmatprep.subr.bf16.mxu1 %v6136_v51  ;;  %v6169_v42 = vld [vmem:[#allocation11 + $0x454] ss:$8 sps:$4 sm:$0xff]  }
 0x3d3   :  { %3625 = vmatprep.subr.bf16.mxu0 %v6091_v43  ;;  %v6184_v43 = vld [vmem:[#allocation11 + $0x3b4] ss:$8 sps:$4 sm:$0xff]  }
 0x3d4   :  { %v6193_v51 = vld [vmem:[#allocation11 + $0x414] ss:$8 sps:$4 sm:$0xff]  }
 0x3d5   :  { %3665 = vmatpush1.bf16.msra.mxu1 %v6134_v29  ;;  %v6207_v29 = vld [vmem:[#allocation12 + $0x78] sm:$0xff]  }
 0x3d6   :  { %3626 = vmatpush1.bf16.msra.mxu0 %v6089_v44  ;;  %3666 = vmatprep.subr.bf16.mxu1 %v6139_v54  ;;  %v6182_v44 = vld [vmem:[#allocation11 + $0x3b0] ss:$8 sps:$4 sm:$0xff]   ;;  %v6197_v54 = vld [vmem:[#allocation11 + $0x400] ss:$8 sps:$4 sm:$0xff]  }
 0x3d7   :  { %3627 = vmatprep.subr.bf16.mxu0 %v6094_v45  ;;  %v6167_v45 = vld [vmem:[#allocation11 + $0x450] ss:$8 sps:$4 sm:$0xff]  }
 0x3d9   :  { %3667 = vmatpush1.bf16.msra.mxu1 %v6137_v55  ;;  %v6203_v55 = vld [vmem:[#allocation12 + $0xf8] sm:$0xff]  }
 0x3da   :  { %3628 = vmatpush1.bf16.msra.mxu0 %v6092_v35  ;;  %3668 = vmatprep.subr.bf16.mxu1 %v6142_v59  ;;  %v6175_v35 = vld [vmem:[#allocation11 + $0x444] ss:$8 sps:$4 sm:$0xff]  }
 0x3db   :  { %3629 = vmatprep.subr.bf16.mxu0 %v6097_v46  ;;  %v6190_v46 = vld [vmem:[#allocation11 + $0x3a4] ss:$8 sps:$4 sm:$0xff]  }
 0x3dd   :  { %3669 = vmatpush1.bf16.msra.mxu1 %v6140_v61 }
 0x3de   :  { %3630 = vmatpush1.bf16.msra.mxu0 %v6095_v39  ;;  %3670 = vmatprep.subr.bf16.mxu1 %v6145_v0  ;;  %v6188_v39 = vld [vmem:[#allocation11 + $0x3a0] ss:$8 sps:$4 sm:$0xff]  }
 0x3df   :  { %3631 = vmatprep.subr.bf16.mxu0 %v6100_v24  ;;  %v6181_v24 = vld [vmem:[#allocation11 + $0x434] ss:$8 sps:$4 sm:$0xff]  }
 0x3e1   :  { %3671 = vmatpush1.bf16.msra.mxu1 %v6143_v1 }
 0x3e2   :  { %3632 = vmatpush1.bf16.msra.mxu0 %v6098_v47  ;;  %3672 = vmatprep.subr.bf16.mxu1 %v6148_v63  ;;  %v6194_v47 = vld [vmem:[#allocation11 + $0x390] ss:$8 sps:$4 sm:$0xff]  }
 0x3e3   :  { %3633 = vmatprep.subr.bf16.mxu0 %v6103_v31  ;;  %v6196_v31 = vld [vmem:[#allocation11 + $0x394] ss:$8 sps:$4 sm:$0xff]  }
 0x3e5   :  { %3673 = vmatpush1.bf16.msra.mxu1 %v6146_v2 }
 0x3e6   :  { %3634 = vmatpush1.bf16.msra.mxu0 %v6101_v49  ;;  %3674 = vmatprep.subr.bf16.mxu1 %v6151_v7  ;;  %v6200_v49 = vld [vmem:[#allocation11 + $0x380] ss:$8 sps:$4 sm:$0xff]  }
 0x3e7   :  { %3635 = vmatprep.subr.bf16.mxu0 %v6106_v50  ;;  %v6185_v50 = vld [vmem:[#allocation11 + $0x420] ss:$8 sps:$4 sm:$0xff]  }
 0x3e9   :  { %3675 = vmatpush1.bf16.msra.mxu1 %v6149_v10 }
 0x3ea   :  { %3636 = vmatpush1.bf16.msra.mxu0 %v6104_v52  ;;  %3676 = vmatprep.subr.bf16.mxu1 %v6154_v17  ;;  %v6191_v52 = vld [vmem:[#allocation11 + $0x410] ss:$8 sps:$4 sm:$0xff]  }
 0x3eb   :  { %3637 = vmatprep.subr.bf16.mxu0 %v6109_v53  ;;  %v6199_v53 = vld [vmem:[#allocation11 + $0x404] ss:$8 sps:$4 sm:$0xff]  }
 0x3ed   :  { %3677 = vmatpush1.bf16.msra.mxu1 %v6152_v18 }
 0x3ee   :  { %3638 = vmatpush2.bf16.msra.mxu0 %v6107_v58  ;;  %3678 = vmatprep.subr.bf16.mxu1 %v6160_v22 }
 0x3ef   :  { %3639 = vmatprep.subr.bf16.mxu0 %v6112_v19 }
 0x3f1   :  { %3679 = vmatpush2.bf16.msra.mxu1 %v6158_v25 }
 0x3f2   :  { %3640 = vmatpush2.bf16.msra.mxu0 %v6110_v62  ;;  %3680 = vmatprep.subr.bf16.mxu1 %v6166_v28 }
 0x3f3   :  { %3641 = vmatprep.subr.bf16.mxu0 %v6115_v11 }
 0x3f5   :  { %3681 = vmatpush2.bf16.msra.mxu1 %v6164_v30 }
 0x3f6   :  { %3642 = vmatpush2.bf16.msra.mxu0 %v6113_v15  ;;  %3682 = vmatprep.subr.bf16.mxu1 %v6172_v33 }
 0x3f7   :  { %3643 = vmatprep.subr.bf16.mxu0 %v6118_v60 }
 0x3f9   :  { %3683 = vmatpush2.bf16.msra.mxu1 %v6170_v34 }
 0x3fa   :  { %3644 = vmatpush2.bf16.msra.mxu0 %v6116_v3  ;;  %3684 = vmatprep.subr.bf16.mxu1 %v6178_v38 }
 0x3fb   :  { %3645 = vmatprep.subr.bf16.mxu0 %v6121_v6 }
 0x3fd   :  { %3685 = vmatpush2.bf16.msra.mxu1 %v6176_v40 }
 0x3fe   :  { %3646 = vmatpush2.bf16.msra.mxu0 %v6119_v13  ;;  %3686 = vmatprep.subr.bf16.mxu1 %v6184_v43 }
 0x3ff   :  { %3647 = vmatprep.subr.bf16.mxu0 %v6124_v14 }
 0x401   :  { %3687 = vmatpush2.bf16.msra.mxu1 %v6182_v44 }
 0x402   :  { %3648 = vmatpush2.bf16.msra.mxu0 %v6122_v20  ;;  %3688 = vmatprep.subr.bf16.mxu1 %v6190_v46 }
 0x403   :  { %3649 = vmatprep.subr.bf16.mxu0 %v6127_v8 }
 0x405   :  { %3689 = vmatpush2.bf16.msra.mxu1 %v6188_v39 }
 0x406   :  { %3650 = vmatpush2.bf16.msra.mxu0 %v6125_v26  ;;  %3690 = vmatprep.subr.bf16.mxu1 %v6196_v31 }
 0x407   :  { %3651 = vmatprep.subr.bf16.mxu0 %v6130_v27 }
 0x409   :  { %3691 = vmatpush2.bf16.msra.mxu1 %v6194_v47 }
 0x40a   :  { %3652 = vmatpush2.bf16.msra.mxu0 %v6128_v32  ;;  %3692 = vmatprep.subr.bf16.mxu1 %v6202_v48 }
 0x40b   :  { %3703 = vmatprep.subr.bf16.mxu0 %v6157_v23 }
 0x40d   :  { %3654 = vmatmul.mubr.bf16.vlgmr.msra.gmra.mxu0 %v6699_v56  ;;  %v6173_v56 = vld [vmem:[#allocation11 + $0x440] ss:$8 sps:$4 sm:$0xff]   ;;  %3693 = vmatpush2.bf16.msra.mxu1 %v6200_v49 }
 0x40e   :  { %3704 = vmatpush1.bf16.msra.mxu0 %v6155_v36  ;;  %3735 = vmatprep.mubr.bf16.mxu0 %v6485_v5  ;;  %v6179_v5 = vld [vmem:[#allocation11 + $0x430] ss:$8 sps:$4 sm:$0xff]  }
 0x40f   :  { %3705 = vmatprep.subr.bf16.mxu0 %v6163_v37  ;;  %5448 = vmatprep.subr.bf16.mxu1 %v6207_v29 }
 0x412   :  { %3706 = vmatpush1.bf16.msra.mxu0 %v6161_v41 }
 0x413   :  { %3707 = vmatprep.subr.bf16.mxu0 %v6169_v42 }
 0x416   :  { %3708 = vmatpush1.bf16.msra.mxu0 %v6167_v45 }
 0x417   :  { %3709 = vmatprep.subr.bf16.mxu0 %v6175_v35 }
 0x41a   :  { %3710 = vmatpush1.bf16.msra.mxu0 %v6173_v56 }
 0x41b   :  { %3711 = vmatprep.subr.bf16.mxu0 %v6181_v24 }
 0x41e   :  { %3712 = vmatpush1.bf16.msra.mxu0 %v6179_v5 }
 0x41f   :  { %3713 = vmatprep.subr.bf16.mxu0 %v6187_v57 }
 0x422   :  { %3714 = vmatpush1.bf16.msra.mxu0 %v6185_v50 }
 0x423   :  { %3715 = vmatprep.subr.bf16.mxu0 %v6193_v51 }
 0x426   :  { %3716 = vmatpush1.bf16.msra.mxu0 %v6191_v52 }
 0x427   :  { %3717 = vmatprep.subr.bf16.mxu0 %v6199_v53  ;;  %v5162_v53 = vld [vmem:[%s6813_s8 + $0x3] ss:$8 sm:$0x3] }
 0x42a   :  { %3718 = vmatpush1.bf16.msra.mxu0 %v6197_v54 }
 0x42b   :  { %5470 = vmatprep.subr.bf16.mxu0 %v6203_v55 }
 0x44d   :  { %v2493_v58 = vpop.f32.mrf.mxu0 }
 0x44f   :  { %v2495_v59 = vpop.f32.mrf.mxu0 }
 0x450   :  { %v2452_v19 = vpop.f32.mrf.mxu1 }
 0x451   :  { %v2453_v61 = vadd.f32 %v2452_v19, %v6695_v16  ;;  %v2497_v11 = vpop.f32.mrf.mxu0 }
 0x452   :  { %v2454_v62 = vpop.f32.mrf.mxu1 }
 0x453   :  { %v2494_v0 = vadd.f32 %v2493_v58, %v2453_v61  ;;  %v2455_v1 = vadd.f32 %v2454_v62, %v6697_v21  ;;  %v2498_v60 = vpop.f32.mrf.mxu0 }
 0x454   :  { %v2456_v15 = vpop.f32.mrf.mxu1 }
 0x455   :  { %vm2500_vm5 = vcmp.ge.f32.partialorder %v2494_v0, 0.0  ;;  %v2502_v63 = vmul.f32 0.2, %v2494_v0  ;;  %v2496_v2 = vadd.f32 %v2495_v59, %v2455_v1 }
 0x456   :  { %v2457_v3 = vpop.f32.mrf.mxu1 }
 0x457   :  { %v2504_v6 = vsel %vm2500_vm5, %v2494_v0, %v2502_v63  ;;  %vm2501_vm6 = vcmp.ge.f32.partialorder %v2496_v2, 0.0  ;;  %v2503_v7 = vmul.f32 0.2, %v2496_v2  ;;  %v5165_v0 = vld [vmem:[%s6812_s7 + $0x4] ss:$8 sm:$0x3] }
 0x458   :  { %v2506_v10 = vrot.slane %v2504_v6, 4  ;;  %v2520_v13 = vmul.f32 %v2504_v6, %v2504_v6  ;;  %v2780_v15 = vrot.slane %v5165_v0, %v6615_v9  ;;  %v5163_v63 = vld [vmem:[%s6814_s9 + $0x3] ss:$8 sm:$0x3] }
 0x459   :  { %v2505_v14 = vsel %vm2501_vm6, %v2496_v2, %v2503_v7  ;;  %v2784_v2 = vrot.slane %v5165_v0, %v6622_v12  ;;  %v6238_v0 = vld [vmem:[#allocation12 + $0x80] sm:$0xff]  }
 0x45a   :  { %v2507_v17 = vadd.f32 %v2506_v10, %v2504_v6  ;;  %v2522_v18 = vrot.slane %v2520_v13, 4  ;;  %v2512_v16 = vrot.slane %v2505_v14, 4  ;;  %v2521_v20 = vmul.f32 %v2505_v14, %v2505_v14 }
 0x45c   :  { %v2508_v8 = vrot.slane %v2507_v17, 2  ;;  %v2523_v22 = vadd.f32 %v2522_v18, %v2520_v13  ;;  %v2513_v25 = vadd.f32 %v2512_v16, %v2505_v14  ;;  %v2528_v21 = vrot.slane %v2521_v20, 4 }
 0x45e   :  { %v2509_v26 = vadd.f32 %v2508_v8, %v2507_v17  ;;  %v2524_v27 = vrot.slane %v2523_v22, 2  ;;  %v2514_v28 = vrot.slane %v2513_v25, 2  ;;  %v2529_v30 = vadd.f32 %v2528_v21, %v2521_v20 }
 0x460   :  { %v2510_v32 = vrot.slane %v2509_v26, 1  ;;  %v2525_v23 = vadd.f32 %v2524_v27, %v2523_v22  ;;  %v2515_v33 = vadd.f32 %v2514_v28, %v2513_v25  ;;  %v2530_v34 = vrot.slane %v2529_v30, 2 }
 0x462   :  { %v2511_v36 = vadd.f32 %v2510_v32, %v2509_v26  ;;  %v2526_v37 = vrot.slane %v2525_v23, 1  ;;  %v2516_v38 = vrot.slane %v2515_v33, 1  ;;  %v2531_v40 = vadd.f32 %v2530_v34, %v2529_v30  ;;  %v6739_v34 = vld [vmem:[#allocation2] sm:$0xff] }
 0x464   :  { %v2518_v41 = vmul.f32 0.125, %v2511_v36  ;;  %v2527_v42 = vadd.f32 %v2526_v37, %v2525_v23  ;;  %v2517_v43 = vadd.f32 %v2516_v38, %v2515_v33  ;;  %v2532_v44 = vrot.slane %v2531_v40, 1  ;;  %v6208_v23 = vld [vmem:[#allocation12 + $0xb8] sm:$0xff]  }
 0x465   :  { %v6737_v33 = vld [vmem:[#allocation2 + $0x8] sm:$0xff] }
 0x466   :  { %v2534_v45 = vmul.f32 0.125, %v2527_v42  ;;  %v2536_v35 = vmul.f32 %v2518_v41, %v2518_v41  ;;  %v2519_v46 = vmul.f32 0.125, %v2517_v43  ;;  %v2533_v39 = vadd.f32 %v2532_v44, %v2531_v40  ;;  %v6212_v42 = vld [vmem:[#allocation12 + $0xf0] sm:$0xff]  }
 0x467   :  { %v5325_v43 = vcombine.high %v6737_v33, %v6737_v33  ;;  %v6213_v44 = vld [vmem:[#allocation12 + $0x70] sm:$0xff]  }
 0x468   :  { %v2538_v56 = vsub.f32 %v2534_v45, %v2536_v35  ;;  %v2535_v24 = vmul.f32 0.125, %v2533_v39  ;;  %v2537_v47 = vmul.f32 %v2519_v46, %v2519_v46  ;;  %v5323_v45 = vcombine.high %v6739_v34, %v6739_v34  ;;  %v6214_v35 = vld [vmem:[#allocation12 + $0xb0] sm:$0xff]  }
 0x469   :  { %v6215_v39 = vld [vmem:[#allocation12 + $0x30] sm:$0xff]  }
 0x46a   :  { %v2540_v31 = vmax.f32 %v2538_v56, 0.0  ;;  %v2539_v48 = vsub.f32 %v2535_v24, %v2537_v47  ;;  %v6217_v56 = vld [vmem:[#allocation12 + $0x68] sm:$0xff]   ;;  %v6220_v47 = vld [vmem:[#allocation12 + $0xe0] sm:$0xff]  }
 0x46b   :  { %v6218_v24 = vld [vmem:[#allocation12 + $0xa8] sm:$0xff]  }
 0x46c   :  { %v2544_v5 = vadd.f32 1e-05, %v2540_v31  ;;  %v2541_v57 = vmax.f32 %v2539_v48, 0.0  ;;  %v6219_v31 = vld [vmem:[#allocation12 + $0x28] sm:$0xff]   ;;  %v6221_v48 = vld [vmem:[#allocation12 + $0x60] sm:$0xff]  }
 0x46e   :  { %v2545_v49 = vadd.f32 1e-05, %v2541_v57  ;;  %6313 = vrsqrt.f32 %v2544_v5  ;;  %v6222_v5 = vld [vmem:[#allocation12 + $0xa0] sm:$0xff]   ;;  %v6224_v57 = vld [vmem:[#allocation12 + $0xd8] sm:$0xff]  }
 0x470   :  { %6315 = vrsqrt.f32 %v2545_v49  ;;  %v6223_v49 = vld [vmem:[#allocation12 + $0x20] sm:$0xff]  }
 0x47b   :  { %v6314_v50 = vpop.eup %6313 }
 0x47d   :  { %v6316_v51 = vpop.eup %6315 }
 0x47e   :  { %v2550_v29 = vcombine.low %v6314_v50, %v6316_v51  ;;  %v6225_v50 = vld [vmem:[#allocation12 + $0x58] sm:$0xff]  }
 0x47f   :  { %v6226_v51 = vld [vmem:[#allocation12 + $0x98] sm:$0xff]  }
 0x480   :  { %v2557_v52 = vrot.slane %v2550_v29, %v6628_v4  ;;  %v6228_v29 = vld [vmem:[#allocation12 + $0xd0] sm:$0xff]  }
 0x482   :  { %v2564_v54 = vrot.slane %v2557_v52, %v6628_v4  ;;  %v6227_v52 = vld [vmem:[#allocation12 + $0x18] sm:$0xff]  }
 0x484   :  { %v2566_v55 = vmul.f32 %v5162_v53, %v2564_v54  ;;  %v6229_v53 = vld [vmem:[#allocation12 + $0x50] sm:$0xff]  }
 0x485   :  { %v6230_v54 = vld [vmem:[#allocation12 + $0x90] sm:$0xff]  }
 0x486   :  { %v2573_v58 = vrot.slane %v2566_v55, %v6615_v9  ;;  %v2577_v19 = vrot.slane %v2566_v55, %v6622_v12  ;;  %v6232_v55 = vld [vmem:[#allocation12 + $0xc8] sm:$0xff]  }
 0x488   :  { %v2580_v59 = vmul.f32 %v2573_v58, %v2518_v41  ;;  %v2581_v61 = vmul.f32 %v2577_v19, %v2519_v46  ;;  %v2601_v62 = vmul.f32 %v2573_v58, %v2504_v6  ;;  %v2602_v11 = vmul.f32 %v2577_v19, %v2505_v14  ;;  %v6209_v41 = vld [vmem:[#allocation12 + $0x38] sm:$0xff]   ;;  %v6216_v46 = vld [vmem:[#allocation12 + $0xe8] sm:$0xff]   ;;  %v6231_v58 = vld [vmem:[#allocation12 + $0x10] sm:$0xff]  }
 0x489   :  { %v6233_v19 = vld [vmem:[#allocation12 + $0x48] sm:$0xff]  }
 0x48a   :  { %v2584_v1 = vcombine.low %v2580_v59, %v2581_v61  ;;  %v6234_v59 = vld [vmem:[#allocation12 + $0x88] sm:$0xff]   ;;  %v6236_v61 = vld [vmem:[#allocation12 + $0xc0] sm:$0xff]  }
 0x48c   :  { %v2591_v60 = vrot.slane %v2584_v1, %v6628_v4  ;;  %v6242_v1 = vld [vmem:[#allocation12 + $0x1f8] sm:$0xff]  }
 0x48d   :  { %v3573_v7 = vpop.f32.mrf.mxu0 }
 0x48e   :  { %v2598_v3 = vrot.slane %v2591_v60, %v6628_v4  ;;  %v3574_v6 = vadd.f32 %v3573_v7, %v2780_v15  ;;  %v6239_v15 = vld [vmem:[#allocation12] sm:$0xff]   ;;  %v6243_v60 = vld [vmem:[#allocation12 + $0x178] sm:$0xff]  }
 0x48f   :  { %v3575_v14 = vpop.f32.mrf.mxu0  ;;  %v6755_v7 = vld [vmem:[#allocation2 + $0x10] sm:$0xff] }
 0x490   :  { %v2600_v10 = vsub.f32 %v5163_v63, %v2598_v3  ;;  %v3614_v13 = vpop.f32.mrf.mxu1  ;;  %v3576_v18 = vadd.f32 %v3575_v14, %v2784_v2  ;;  %v6244_v63 = vld [vmem:[#allocation12 + $0x1b8] sm:$0xff]   ;;  %v5324_v2 = vcombine.low %v6737_v33, %v6737_v33  ;;  %v5322_v3 = vcombine.low %v6739_v34, %v6739_v34 }
 0x491   :  { %v6731_v17 = vadd.f32 %v3614_v13, %v3574_v6  ;;  %v3577_v22 = vpop.f32.mrf.mxu0  ;;  %v6248_v6 = vld [vmem:[#allocation12 + $0x1f0] sm:$0xff]   ;;  %v5327_v14 = vcombine.high %v6755_v7, %v6755_v7  ;;  %v6262_v34 = vld [vmem:[#allocation12 + $0x198] sm:$0xff]  }
 0x492   :  { %v2607_v16 = vrot.slane %v2600_v10, %v6615_v9  ;;  %v2611_v20 = vrot.slane %v2600_v10, %v6622_v12  ;;  %v3616_v8 = vpop.f32.mrf.mxu1  ;;  %v6245_v10 = vld [vmem:[#allocation12 + $0x138] sm:$0xff]   ;;  %v6249_v13 = vld [vmem:[#allocation12 + $0x170] sm:$0xff]   ;;  %v6254_v22 = vld [vmem:[#allocation12 + $0x1a8] sm:$0xff]  }
 0x493   :  { %v6735_v25 = vadd.f32 %v3616_v8, %v3576_v18  ;;  %v3578_v28 = vpop.f32.mrf.mxu0  ;;  %v6250_v18 = vld [vmem:[#allocation12 + $0x1b0] sm:$0xff]   ;;  %v6253_v8 = vld [vmem:[#allocation12 + $0x168] sm:$0xff]  }
 0x494   :  { %v2614_v21 = vadd.f32 %v2607_v16, %v2601_v62  ;;  %v2615_v26 = vadd.f32 %v2611_v20, %v2602_v11  ;;  %v3618_v27 = vpop.f32.mrf.mxu1  ;;  %v6235_v62 = vld [vmem:[#allocation12 + $0x8] sm:$0xff]   ;;  %v6237_v11 = vld [vmem:[#allocation12 + $0x40] sm:$0xff]   ;;  %v6251_v20 = vld [vmem:[#allocation12 + $0x130] sm:$0xff]  }
 0x495   :  { %v6252_v16 = vld [vmem:[#allocation12 + $0x1e8] sm:$0xff]   ;;  %v6257_v27 = vld [vmem:[#allocation12 + $0x160] sm:$0xff]  }
 0x496   :  { %v5424_v30 = vpack.c.bf16 %v2615_v26, %v2614_v21  ;;  %v3619_v32 = vpop.f32.mrf.mxu1  ;;  %v6256_v21 = vld [vmem:[#allocation12 + $0x1e0] sm:$0xff]   ;;  %v6255_v26 = vld [vmem:[#allocation12 + $0x128] sm:$0xff]  }
 0x497   :  { %v6258_v28 = vld [vmem:[#allocation12 + $0x1a0] sm:$0xff]  }
 0x498   :  { %2624 = vst [vmem:[#allocation2 + $0x1c] sm:$0xff] %v5424_v30  ;;  %v6260_v30 = vld [vmem:[#allocation12 + $0x1d8] sm:$0xff]   ;;  %v6259_v32 = vld [vmem:[#allocation12 + $0x120] sm:$0xff]  }
 0x49f   :  { %v2628_v36 = vld [vmem:[#allocation2 + $0x18] sm:$0xff]  ;;  %v6206_v37 = vld [vmem:[#allocation2 + $0x20] ss:$0 sps:$4 sm:$0xff]  }
 0x4a0   :  { %v6741_v38 = vcombine.low %v2628_v36, %v2628_v36  ;;  %v6743_v40 = vcombine.high %v2628_v36, %v2628_v36  ;;  %3736 = vmatmul.mubr.bf16.vlgmr.msra.gmra.mxu0 %v6206_v37  ;;  %v6264_v37 = vld [vmem:[#allocation12 + $0x1d0] sm:$0xff]  }
 0x4a1   :  { %5471 = vmatpush3.bf16.msra.mxu0 %v6208_v23  ;;  %4691 = vmatprep.mubr.bf16.mxu0 %v5325_v43  ;;  %v6261_v23 = vld [vmem:[#allocation12 + $0x158] sm:$0xff]   ;;  %v6265_v43 = vld [vmem:[#allocation12 + $0x150] sm:$0xff]  }
 0x4a2   :  { %3694 = vmatprep.mubr.bf16.mxu1 %v6743_v40  ;;  %5472 = vmatprep.subr.bf16.mxu0 %v6212_v42 }
 0x4a3   :  { %3695 = vmatmul.mubr.bf16.vlgmr.msra.gmra.mxu1 %v6741_v38 }
 0x4a4   :  { %5449 = vmatpush3.bf16.msra.mxu1 %v6209_v41  ;;  %4651 = vmatprep.mubr.bf16.mxu1 %v5323_v45  ;;  %v6263_v41 = vld [vmem:[#allocation12 + $0x118] sm:$0xff]   ;;  %v6266_v45 = vld [vmem:[#allocation12 + $0x190] sm:$0xff]  }
 0x4a5   :  { %5450 = vmatprep.subr.bf16.mxu1 %v6213_v44  ;;  %5473 = vmatpush3.bf16.msra.mxu0 %v6214_v35  ;;  %v6268_v35 = vld [vmem:[#allocation12 + $0x1c8] sm:$0xff]  }
 0x4a6   :  { %5474 = vmatprep.subr.bf16.mxu0 %v6216_v46 }
 0x4a8   :  { %5451 = vmatpush3.bf16.msra.mxu1 %v6215_v39  ;;  %v6267_v39 = vld [vmem:[#allocation12 + $0x110] sm:$0xff]  }
 0x4a9   :  { %5452 = vmatprep.subr.bf16.mxu1 %v6217_v56  ;;  %5475 = vmatpush3.bf16.msra.mxu0 %v6218_v24  ;;  %v6270_v56 = vld [vmem:[#allocation12 + $0x188] sm:$0xff]   ;;  %v6272_v24 = vld [vmem:[#allocation12 + $0x1c0] sm:$0xff]  }
 0x4aa   :  { %5476 = vmatprep.subr.bf16.mxu0 %v6220_v47  ;;  %v6271_v47 = vld [vmem:[#allocation12 + $0x108] sm:$0xff]  }
 0x4ac   :  { %5453 = vmatpush3.bf16.msra.mxu1 %v6219_v31  ;;  %v6274_v31 = vld [vmem:[#allocation12 + $0x180] sm:$0xff]  }
 0x4ad   :  { %5454 = vmatprep.subr.bf16.mxu1 %v6221_v48  ;;  %5477 = vmatpush3.bf16.msra.mxu0 %v6222_v5  ;;  %v6275_v48 = vld [vmem:[#allocation12 + $0x100] sm:$0xff]   ;;  %v5326_v5 = vcombine.low %v6755_v7, %v6755_v7 }
 0x4ae   :  { %5478 = vmatprep.subr.bf16.mxu0 %v6224_v57  ;;  %v6277_v57 = vld [vmem:[#allocation12 + $0x2b8] sm:$0xff]   ;;  %v6298_v7 = vld [vmem:[#allocation12 + $0x280] sm:$0xff]  }
 0x4b0   :  { %5455 = vmatpush3.bf16.msra.mxu1 %v6223_v49  ;;  %v6487_v49 = vmov 0.0  }
 0x4b1   :  { %5456 = vmatprep.subr.bf16.mxu1 %v6225_v50  ;;  %5479 = vmatpush3.bf16.msra.mxu0 %v6226_v51  ;;  %v6276_v50 = vld [vmem:[#allocation12 + $0x278] sm:$0xff]  }
 0x4b2   :  { %5480 = vmatprep.subr.bf16.mxu0 %v6228_v29  ;;  %v6278_v51 = vld [vmem:[#allocation12 + $0x238] sm:$0xff]   ;;  %v6280_v29 = vld [vmem:[#allocation12 + $0x2b0] sm:$0xff]  }
 0x4b4   :  { %5457 = vmatpush3.bf16.msra.mxu1 %v6227_v52  ;;  %v6279_v52 = vld [vmem:[#allocation12 + $0x270] sm:$0xff]  }
 0x4b5   :  { %5458 = vmatprep.subr.bf16.mxu1 %v6229_v53  ;;  %5481 = vmatpush3.bf16.msra.mxu0 %v6230_v54  ;;  %v6281_v53 = vld [vmem:[#allocation12 + $0x230] sm:$0xff]   ;;  %v6283_v54 = vld [vmem:[#allocation12 + $0x2a8] sm:$0xff]  }
 0x4b6   :  { %5482 = vmatprep.subr.bf16.mxu0 %v6232_v55  ;;  %v6282_v55 = vld [vmem:[#allocation12 + $0x268] sm:$0xff]  }
 0x4b8   :  { %5459 = vmatpush3.bf16.msra.mxu1 %v6231_v58  ;;  %v6286_v58 = vld [vmem:[#allocation12 + $0x2a0] sm:$0xff]  }
 0x4b9   :  { %5460 = vmatprep.subr.bf16.mxu1 %v6233_v19  ;;  %5483 = vmatpush3.bf16.msra.mxu0 %v6234_v59  ;;  %v6285_v19 = vld [vmem:[#allocation12 + $0x260] sm:$0xff]  }
 0x4ba   :  { %5484 = vmatprep.subr.bf16.mxu0 %v6236_v61  ;;  %v6287_v59 = vld [vmem:[#allocation12 + $0x220] sm:$0xff]   ;;  %v6289_v61 = vld [vmem:[#allocation12 + $0x298] sm:$0xff]  }
 0x4bc   :  { %5461 = vmatpush3.bf16.msra.mxu1 %v6235_v62  ;;  %v6288_v62 = vld [vmem:[#allocation12 + $0x258] sm:$0xff]  }
 0x4bd   :  { %5462 = vmatprep.subr.bf16.mxu1 %v6237_v11  ;;  %5485 = vmatpush3.bf16.msra.mxu0 %v6238_v0  ;;  %v6290_v11 = vld [vmem:[#allocation12 + $0x218] sm:$0xff]   ;;  %v6292_v0 = vld [vmem:[#allocation12 + $0x290] sm:$0xff]  }
 0x4be   :  { %5514 = vmatprep.subr.bf16.mxu0 %v6242_v1  ;;  %v6291_v1 = vld [vmem:[#allocation12 + $0x250] sm:$0xff]  }
 0x4c0   :  { %5463 = vmatpush3.bf16.msra.mxu1 %v6239_v15  ;;  %4692 = vmatmul.mubr.bf16.vlgmr.msra.gmra.mxu0 %v5324_v2  ;;  %v6293_v15 = vld [vmem:[#allocation12 + $0x210] sm:$0xff]   ;;  %v6296_v2 = vld [vmem:[#allocation12 + $0x208] sm:$0xff]  }
 0x4c1   :  { %5492 = vmatprep.subr.bf16.mxu1 %v6243_v60  ;;  %5515 = vmatpush3.bf16.msra.mxu0 %v6244_v63  ;;  %v6294_v60 = vld [vmem:[#allocation12 + $0x248] sm:$0xff]  }
 0x4c2   :  { %4771 = vmatprep.mubr.bf16.mxu0 %v6743_v40  ;;  %5516 = vmatprep.subr.bf16.mxu0 %v6248_v6  ;;  %v6295_v63 = vld [vmem:[#allocation12 + $0x288] sm:$0xff]   ;;  %v6299_v6 = vld [vmem:[#allocation12 + $0x200] sm:$0xff]  }
 0x4c3   :  { %4652 = vmatmul.mubr.bf16.vlgmr.msra.gmra.mxu1 %v5322_v3  ;;  %v6297_v3 = vld [vmem:[#allocation12 + $0x240] sm:$0xff]  }
 0x4c4   :  { %5493 = vmatpush3.bf16.msra.mxu1 %v6245_v10  ;;  %4731 = vmatprep.mubr.bf16.mxu1 %v5327_v14 }
 0x4c5   :  { %5494 = vmatprep.subr.bf16.mxu1 %v6249_v13  ;;  %5517 = vmatpush3.bf16.msra.mxu0 %v6250_v18 }
 0x4c6   :  { %5518 = vmatprep.subr.bf16.mxu0 %v6252_v16 }
 0x4c8   :  { %5495 = vmatpush3.bf16.msra.mxu1 %v6251_v20 }
 0x4c9   :  { %5496 = vmatprep.subr.bf16.mxu1 %v6253_v8  ;;  %5519 = vmatpush3.bf16.msra.mxu0 %v6254_v22 }
 0x4ca   :  { %5520 = vmatprep.subr.bf16.mxu0 %v6256_v21 }
 0x4cc   :  { %5497 = vmatpush3.bf16.msra.mxu1 %v6255_v26 }
 0x4cd   :  { %5498 = vmatprep.subr.bf16.mxu1 %v6257_v27  ;;  %v3655_v33 = vpop.f32.mrf.mxu0  ;;  %5521 = vmatpush3.bf16.msra.mxu0 %v6258_v28 }
 0x4ce   :  { %v6761_v36 = vadd.f32 %v3655_v33, %v6731_v17  ;;  %5522 = vmatprep.subr.bf16.mxu0 %v6260_v30  ;;  %v6269_v17 = vld [vmem:[#allocation12 + $0x148] sm:$0xff]  }
 0x4cf   :  { %v3657_v40 = vpop.f32.mrf.mxu0 }
 0x4d0   :  { %5499 = vmatpush3.bf16.msra.mxu1 %v6259_v32  ;;  %v6764_v42 = vadd.f32 %v3657_v40, %v6735_v25  ;;  %v6273_v25 = vld [vmem:[#allocation12 + $0x140] sm:$0xff]  }
 0x4d1   :  { %5500 = vmatprep.subr.bf16.mxu1 %v6261_v23  ;;  %v3659_v44 = vpop.f32.mrf.mxu0  ;;  %5523 = vmatpush3.bf16.msra.mxu0 %v6262_v34 }
 0x4d2   :  { %5524 = vmatprep.subr.bf16.mxu0 %v6264_v37 }
 0x4d3   :  { %v3660_v46 = vpop.f32.mrf.mxu0 }
 0x4d4   :  { %5501 = vmatpush3.bf16.msra.mxu1 %v6263_v41 }
 0x4d5   :  { %5502 = vmatprep.subr.bf16.mxu1 %v6265_v43  ;;  %5525 = vmatpush3.bf16.msra.mxu0 %v6266_v45 }
 0x4d6   :  { %5526 = vmatprep.subr.bf16.mxu0 %v6268_v35 }
 0x4d8   :  { %5503 = vmatpush3.bf16.msra.mxu1 %v6267_v39 }
 0x4d9   :  { %5504 = vmatprep.subr.bf16.mxu1 %v6269_v17  ;;  %5527 = vmatpush3.bf16.msra.mxu0 %v6270_v56 }
 0x4da   :  { %5528 = vmatprep.subr.bf16.mxu0 %v6272_v24 }
 0x4dc   :  { %5505 = vmatpush3.bf16.msra.mxu1 %v6271_v47 }
 0x4dd   :  { %5506 = vmatprep.subr.bf16.mxu1 %v6273_v25  ;;  %5529 = vmatpush3.bf16.msra.mxu0 %v6274_v31 }
 0x4de   :  { %5567 = vmatprep.subr.bf16.mxu0 %v6487_v49 }
 0x4e0   :  { %5507 = vmatpush3.bf16.msra.mxu1 %v6275_v48  ;;  %4772 = vmatmul.mubr.bf16.vlgmr.msra.gmra.mxu0 %v6741_v38  ;;  %v6284_v38 = vld [vmem:[#allocation12 + $0x228] sm:$0xff]  }
 0x4e1   :  { %5568 = vmatpush3.bf16.msra.mxu0 %v6277_v57  ;;  %5536 = vmatprep.subr.bf16.mxu1 %v6276_v50 }
 0x4e2   :  { %5569 = vmatprep.subr.bf16.mxu0 %v6487_v49  ;;  %5583 = vmatprep.mubr.msk.bf16.mxu0 %vm6488_vm7, %v6487_v49 }
 0x4e3   :  { %4732 = vmatmul.mubr.bf16.vlgmr.msra.gmra.mxu1 %v5326_v5 }
 0x4e4   :  { %5537 = vmatpush3.bf16.msra.mxu1 %v6278_v51 }
 0x4e5   :  { %5570 = vmatpush3.bf16.msra.mxu0 %v6280_v29  ;;  %5538 = vmatprep.subr.bf16.mxu1 %v6279_v52 }
 0x4e6   :  { %5571 = vmatprep.subr.bf16.mxu0 %v6487_v49 }
 0x4e8   :  { %5539 = vmatpush3.bf16.msra.mxu1 %v6281_v53 }
 0x4e9   :  { %5572 = vmatpush3.bf16.msra.mxu0 %v6283_v54  ;;  %5540 = vmatprep.subr.bf16.mxu1 %v6282_v55 }
 0x4ea   :  { %5573 = vmatprep.subr.bf16.mxu0 %v6487_v49 }
 0x4ec   :  { %5541 = vmatpush3.bf16.msra.mxu1 %v6284_v38 }
 0x4ed   :  { %5574 = vmatpush3.bf16.msra.mxu0 %v6286_v58  ;;  %5542 = vmatprep.subr.bf16.mxu1 %v6285_v19 }
 0x4ee   :  { %5575 = vmatprep.subr.bf16.mxu0 %v6487_v49 }
 0x4f0   :  { %5543 = vmatpush3.bf16.msra.mxu1 %v6287_v59 }
 0x4f1   :  { %5576 = vmatpush3.bf16.msra.mxu0 %v6289_v61  ;;  %5544 = vmatprep.subr.bf16.mxu1 %v6288_v62 }
 0x4f2   :  { %5577 = vmatprep.subr.bf16.mxu0 %v6487_v49 }
 0x4f4   :  { %5545 = vmatpush3.bf16.msra.mxu1 %v6290_v11 }
 0x4f5   :  { %5578 = vmatpush3.bf16.msra.mxu0 %v6292_v0  ;;  %5546 = vmatprep.subr.bf16.mxu1 %v6291_v1 }
 0x4f6   :  { %5579 = vmatprep.subr.bf16.mxu0 %v6487_v49 }
 0x4f8   :  { %5547 = vmatpush3.bf16.msra.mxu1 %v6293_v15 }
 0x4f9   :  { %5548 = vmatprep.subr.bf16.mxu1 %v6294_v60  ;;  %5580 = vmatpush3.bf16.msra.mxu0 %v6295_v63 }
 0x4fa   :  { %5581 = vmatprep.subr.bf16.mxu0 %v6487_v49 }
 0x4fc   :  { %5549 = vmatpush3.bf16.msra.mxu1 %v6296_v2 }
 0x4fd   :  { %5550 = vmatprep.subr.bf16.mxu1 %v6297_v3  ;;  %5582 = vmatpush3.bf16.msra.mxu0 %v6298_v7  ;;  %v4051_v3 = vld [vmem:[%s6812_s7 + $0x5] ss:$0 sm:$0xff] }
 0x500   :  { %5551 = vmatpush3.bf16.msra.mxu1 %v6299_v6 }
 0x560   :  { %v3737_v10 = vpop.f32.mrf.mxu0 }
 0x562   :  { %v3739_v14 = vpop.f32.mrf.mxu0 }
 0x563   :  { %v3696_v13 = vpop.f32.mrf.mxu1 }
 0x564   :  { %v3697_v18 = vadd.f32 %v3696_v13, %v6761_v36  ;;  %v3741_v20 = vpop.f32.mrf.mxu0 }
 0x565   :  { %v3698_v16 = vpop.f32.mrf.mxu1 }
 0x566   :  { %v3738_v8 = vadd.f32 %v3737_v10, %v3697_v18  ;;  %v3699_v22 = vadd.f32 %v3698_v16, %v6764_v42  ;;  %v3742_v26 = vpop.f32.mrf.mxu0 }
 0x567   :  { %v3700_v21 = vpop.f32.mrf.mxu1 }
 0x568   :  { %vm3744_vm8 = vcmp.ge.f32.partialorder %v3738_v8, 0.0  ;;  %v3746_v27 = vmul.f32 0.2, %v3738_v8  ;;  %v3740_v28 = vadd.f32 %v3739_v14, %v3699_v22 }
 0x569   :  { %v3701_v30 = vpop.f32.mrf.mxu1 }
 0x56a   :  { %v6771_v32 = vsel %vm3744_vm8, %v3738_v8, %v3746_v27  ;;  %vm3745_vm9 = vcmp.ge.f32.partialorder %v3740_v28, 0.0  ;;  %v3747_v23 = vmul.f32 0.2, %v3740_v28  ;;  %v5319_v27 = vld [vmem:[%s6813_s8 + $0x4] ss:$8 sm:$0x3] }
 0x56b   :  { %v3750_v33 = vrot.slane %v6771_v32, 4  ;;  %v3764_v34 = vmul.f32 %v6771_v32, %v6771_v32  ;;  %s6489_s8 = smov [#allocation14]  }
 0x56c   :  { %v6776_v36 = vsel %vm3745_vm9, %v3740_v28, %v3747_v23 }
 0x56d   :  { %v3751_v37 = vadd.f32 %v3750_v33, %v6771_v32  ;;  %v3766_v40 = vrot.slane %v3764_v34, 4  ;;  %v3756_v41 = vrot.slane %v6776_v36, 4  ;;  %v3765_v42 = vmul.f32 %v6776_v36, %v6776_v36 }
 0x56f   :  { %v3752_v43 = vrot.slane %v3751_v37, 2  ;;  %v3767_v44 = vadd.f32 %v3766_v40, %v3764_v34  ;;  %v3757_v45 = vadd.f32 %v3756_v41, %v6776_v36  ;;  %v3772_v35 = vrot.slane %v3765_v42, 4 }
 0x571   :  { %v3753_v46 = vadd.f32 %v3752_v43, %v3751_v37  ;;  %v3768_v39 = vrot.slane %v3767_v44, 2  ;;  %v3758_v17 = vrot.slane %v3757_v45, 2  ;;  %v3773_v56 = vadd.f32 %v3772_v35, %v3765_v42 }
 0x573   :  { %v3754_v24 = vrot.slane %v3753_v46, 1  ;;  %v3769_v47 = vadd.f32 %v3768_v39, %v3767_v44  ;;  %v3759_v25 = vadd.f32 %v3758_v17, %v3757_v45  ;;  %v3774_v31 = vrot.slane %v3773_v56, 2  ;;  %v5320_v44 = vld [vmem:[%s6814_s9 + $0x4] ss:$8 sm:$0x3]  ;;  %s4867_s9 = sshll.u32 %s6489_s8, 4  ;;  %s4868_s9 = int_to_ptr.vmem [resolvable:$true] %s4867_s9 }
 0x574   :  { %s6445_s27 = scalar_lea.vmem %s4868_s9, 128  ;;  %p6450_p3 = scmp.lt.s32.totalorder %s4868_s9, %s4868_s9 }
 0x575   :  { %v3755_v48 = vadd.f32 %v3754_v24, %v3753_v46  ;;  %v3770_v5 = vrot.slane %v3769_v47, 1  ;;  %v3760_v57 = vrot.slane %v3759_v25, 1  ;;  %v3775_v49 = vadd.f32 %v3774_v31, %v3773_v56  ;;  %p6446_p2 = scmp.ne.s32.totalorder %s4868_s9, %s6445_s27  ;;  %p6451_p4 = scmp.lt.s32.totalorder %s6445_s27, %s6445_s27 }
 0x577   :  { %v3762_v50 = vmul.f32 0.125, %v3755_v48  ;;  %v3771_v51 = vadd.f32 %v3770_v5, %v3769_v47  ;;  %v3761_v29 = vadd.f32 %v3760_v57, %v3759_v25  ;;  %v3776_v52 = vrot.slane %v3775_v49, 1  ;;  %p6452_p5 = por %p6451_p4, %p6450_p3 }
 0x579   :  { %v3778_v53 = vmul.f32 0.125, %v3771_v51  ;;  %v3780_v54 = vmul.f32 %v3762_v50, %v3762_v50  ;;  %v3763_v55 = vmul.f32 0.125, %v3761_v29  ;;  %v3777_v38 = vadd.f32 %v3776_v52, %v3775_v49  ;;  %p6453_p6 = pnand %p6452_p5, %p6446_p2 }
 0x57b   :  { %v3782_v58 = vsub.f32 %v3778_v53, %v3780_v54  ;;  %v3779_v19 = vmul.f32 0.125, %v3777_v38  ;;  %v3781_v59 = vmul.f32 %v3763_v55, %v3763_v55 }
 0x57d   :  { %v3784_v61 = vmax.f32 %v3782_v58, 0.0  ;;  %v3783_v62 = vsub.f32 %v3779_v19, %v3781_v59 }
 0x57f   :  { %v3788_v11 = vadd.f32 1e-05, %v3784_v61  ;;  %v3785_v0 = vmax.f32 %v3783_v62, 0.0 }
 0x580   :  { %v5486_v15 = vpop.f32.mrf.mxu0 }
 0x581   :  { %v3789_v1 = vadd.f32 1e-05, %v3785_v0  ;;  %6317 = vrsqrt.f32 %v3788_v11 }
 0x582   :  { %v5487_v63 = vpop.f32.mrf.mxu0 }
 0x583   :  { %6319 = vrsqrt.f32 %v3789_v1  ;;  %v5464_v60 = vpop.f32.mrf.mxu1  ;;  %v5488_v2 = vadd.f32 %v5487_v63, %v5486_v15 }
 0x584   :  { %v5489_v6 = vpop.f32.mrf.mxu0 }
 0x585   :  { %v5465_v7 = vpop.f32.mrf.mxu1 }
 0x586   :  { %v5466_v10 = vadd.f32 %v5465_v7, %v5464_v60  ;;  %v5490_v13 = vpop.f32.mrf.mxu0 }
 0x587   :  { %v5467_v14 = vpop.f32.mrf.mxu1 }
 0x588   :  { %v4654_v18 = vadd.f32 %v5466_v10, %v4051_v3 }
 0x589   :  { %v5468_v16 = vpop.f32.mrf.mxu1 }
 0x58a   :  { %v4694_v20 = vadd.f32 %v5488_v2, %v4654_v18 }
 0x58e   :  { %v6318_v8 = vpop.eup %6317 }
 0x590   :  { %v6320_v22 = vpop.eup %6319 }
 0x591   :  { %v3794_v21 = vcombine.low %v6318_v8, %v6320_v22 }
 0x593   :  { %v3801_v26 = vrot.slane %v3794_v21, %v6628_v4 }
 0x595   :  { %v3808_v28 = vrot.slane %v3801_v26, %v6628_v4 }
 0x597   :  { %v3810_v30 = vmul.f32 %v5319_v27, %v3808_v28 }
 0x599   :  { %v3817_v23 = vrot.slane %v3810_v30, %v6615_v9  ;;  %v3821_v33 = vrot.slane %v3810_v30, %v6622_v12 }
 0x59b   :  { %v3824_v34 = vmul.f32 %v3817_v23, %v3762_v50  ;;  %v3825_v37 = vmul.f32 %v3821_v33, %v3763_v55  ;;  %v3845_v40 = vmul.f32 %v3817_v23, %v6771_v32  ;;  %v3846_v41 = vmul.f32 %v3821_v33, %v6776_v36 }
 0x59d   :  { %v3828_v42 = vcombine.low %v3824_v34, %v3825_v37 }
 0x59f   :  { %v3835_v43 = vrot.slane %v3828_v42, %v6628_v4 }
 0x5a0   :  { %v5530_v35 = vpop.f32.mrf.mxu0 }
 0x5a1   :  { %v3842_v45 = vrot.slane %v3835_v43, %v6628_v4 }
 0x5a2   :  { %v5531_v17 = vpop.f32.mrf.mxu0 }
 0x5a3   :  { %v3844_v46 = vsub.f32 %v5320_v44, %v3842_v45  ;;  %v5508_v39 = vpop.f32.mrf.mxu1  ;;  %v5532_v56 = vadd.f32 %v5531_v17, %v5530_v35 }
 0x5a4   :  { %v5533_v36 = vpop.f32.mrf.mxu0 }
 0x5a5   :  { %v3851_v24 = vrot.slane %v3844_v46, %v6615_v9  ;;  %v3855_v32 = vrot.slane %v3844_v46, %v6622_v12  ;;  %v5509_v47 = vpop.f32.mrf.mxu1 }
 0x5a6   :  { %v5510_v25 = vadd.f32 %v5509_v47, %v5508_v39  ;;  %v5534_v57 = vpop.f32.mrf.mxu0 }
 0x5a7   :  { %v3858_v31 = vadd.f32 %v3851_v24, %v3845_v40  ;;  %v3859_v48 = vadd.f32 %v3855_v32, %v3846_v41  ;;  %v5511_v5 = vpop.f32.mrf.mxu1 }
 0x5a8   :  { %v4734_v49 = vadd.f32 %v5510_v25, %v4694_v20 }
 0x5a9   :  { %v5425_v50 = vpack.c.bf16 %v3859_v48, %v3858_v31  ;;  %v5512_v51 = vpop.f32.mrf.mxu1 }
 0x5aa   :  { %v4774_v4 = vadd.f32 %v5532_v56, %v4734_v49 }
 0x5ab   :  { %3868 = vst [vmem:[#allocation2 + $0x24] sm:$0xff] %v5425_v50 }
 0x5b2   :  { %v3873_v29 = vld [vmem:[#allocation2 + $0x20] sm:$0xff]  ;;  %v6302_v52 = vld [vmem:[#allocation2 + $0x28] ss:$0 sps:$4 sm:$0xff]  }
 0x5b3   :  { %v5330_v53 = vcombine.low %v3873_v29, %v3873_v29  ;;  %v5331_v54 = vcombine.high %v3873_v29, %v3873_v29  ;;  %5584 = vmatmul.mubr.bf16.vlgmr.msra.gmra.mxu0 %v6302_v52 }
 0x5b5   :  { %4811 = vmatprep.mubr.bf16.mxu1 %v5331_v54 }
 0x5b6   :  { %4812 = vmatmul.mubr.bf16.vlgmr.msra.gmra.mxu1 %v5330_v53 }
 0x673   :  { %v4853_v9 = vpop.f32.mrf.mxu0 }
 0x675   :  { %v5585_v55 = vpop.f32.mrf.mxu0 }
 0x676   :  { %v5552_v12 = vpop.f32.mrf.mxu1 }
 0x677   :  { %v4856_v58 = vpop.f32.mrf.mxu0 }
 0x678   :  { %v5553_v38 = vpop.f32.mrf.mxu1 }
 0x679   :  { %v5554_v19 = vadd.f32 %v5553_v38, %v5552_v12  ;;  %v5586_v61 = vpop.f32.mrf.mxu0 }
 0x67a   :  { %v5555_v59 = vpop.f32.mrf.mxu1 }
 0x67b   :  { %v4814_v62 = vadd.f32 %v5554_v19, %v4774_v4 }
 0x67c   :  { %v5556_v11 = vpop.f32.mrf.mxu1 }
 0x67d   :  { %v4854_v0 = vadd.f32 %v4853_v9, %v4814_v62 }
 0x67f   :  { %6321 = vtanh.f32 %v4854_v0 }
 0x68c   :  { %v6322_v1 = vpop.eup %6321 }
 0x68d   :  { %4860 = vst [vmem:[#allocation14] sm:$0xff] %v6322_v1 }
 0x68e   :  { %6456 = shalt.err (!%p6453_p6)
}
 0x68f   :  { %4870 = dma.vmem_to_hbm [thread:$0]  %s4868_s9, 128, %s6815_s10, [#allocation5]  }
 0x690   :  { %6473 = dma.done.wait [#allocation5], 128  }
 0x691   :  { %6474 = vsyncadd [#allocation5], 4294967168 }
 0x692   :  { %4874 = vsyncpa [#allocation4], 1 }
 0x693   :  { %4875 = vsyncpa [#allocation7], 1 }
 0x694   :  { %4876 = vsyncpa [#allocation10], 1 }
 0x695   :  { %4877 = vsyncpa [#allocation13], 1 }
 0x696   :  { %4878 = vsyncpa [#allocation5], 1 }

</bundles_post_ra>
